<compile_context>
chip_gen: v6e
topology: v6e:2x2x1
jax: 0.10.0
libtpu: 0.0.40
codegen_flags: <defaults>
</compile_context>

<pallas_src>
import jax
import jax.numpy as jnp
from jax.experimental import pallas as pl
from jax.experimental.pallas import tpu as pltpu


# ----------------------------- fused Pallas kernel ---------------------------

def _network2_fused_kernel(x_ref, w1_ref, b1_ref, w2_ref, b2_ref,
                           wf1_ref, bf1_ref, wf2_ref, bf2_ref,
                           wo_ref, bo_ref, o_ref):
    """Whole Network_2 forward for one block of TB images (one grid program).

    x_ref : (1, 8, 6*TB, 28)  x_ref[0, t, m*TB+b, :] = image[b, 4*m + t, :]   (bf16)
    w1_ref: (5, 28, 256)      conv1 row-band Toeplitz; col = wparity*128 + jh*6 + cout
    w2_ref: (5, 128, 96)      conv2 row-band Toeplitz; row = w*6 + cin (72..127 zero),
                              col = wparity*48 + jh*12 + cout
    wf1_ref:(4, 48, 128)      fc1 weights per pooled row (PyTorch flatten order folded in)
    wf2_ref/wo_ref:(128,128)  fc2 / out weights, K and N zero-padded to 128
    o_ref : (TB, 128)         padded logits (first 10 lanes valid); row b = image b
    """
    f32 = jnp.float32
    cdt = x_ref.dtype                        # MXU operand dtype (bf16; f32 also works)
    tb = x_ref.shape[2] // 6                 # images per grid step
    b1 = b1_ref[...]                         # (1, 256) f32, hoisted once
    b2 = b2_ref[...]                         # (1, 96)

    # ---- conv1 (5x5, 1->6) + ReLU + 2x2 max-pool -----------------------------
    # Matmul rows are (m, b) m-major so conv2's row windows below are contiguous
    # 2-D slices; pooled rows are produced grouped by height parity q.
    p1 = []                                                  # p1[q]: (6*TB, 128) f32
    for q in range(2):
        h = None
        for pi in range(2):                                  # height-pool pair
            acc = jnp.zeros((6 * tb, 256), f32)
            for di in range(5):                              # kernel-row taps
                t = 2 * q + pi + di                          # input row = 4*m + t
                acc = acc + jnp.dot(x_ref[0, t], w1_ref[di],
                                    preferred_element_type=f32)
            v = jnp.maximum(acc + b1, 0.0)                   # bias + ReLU (f32, VPU)
            h = v if h is None else jnp.maximum(h, v)        # height pool
        p1.append(jnp.maximum(h[:, :128], h[:, 128:]))       # width pool, vreg-aligned

    # ---- conv2 (5x5, 6->12) + ReLU + 2x2 max-pool -----------------------------
    h = None
    for pi in range(2):
        acc = jnp.zeros((4 * tb, 96), f32)
        for di in range(5):
            s = pi + di                                      # pool1 row = 2*h2 + s
            rows = p1[s % 2][(s // 2) * tb:(s // 2 + 4) * tb, :]   # (4*TB, 128) slice
            acc = acc + jnp.dot(rows.astype(cdt), w2_ref[di],
                                preferred_element_type=f32)
        v = jnp.maximum(acc + b2, 0.0)
        h = v if h is None else jnp.maximum(h, v)            # height pool
    p2 = jnp.maximum(h[:, :48], h[:, 48:])                   # (4*TB, 48): row h2*TB + b

    # ---- fc1 + ReLU, fc2 + ReLU, out  (K/N zero-padded to 128 lanes) ----------
    acc = bf1_ref[...]                                       # (1, 128) bias as acc init
    for h2 in range(4):
        acc = acc + jnp.dot(p2[h2 * tb:(h2 + 1) * tb, :].astype(cdt),
                            wf1_ref[h2], preferred_element_type=f32)
    t = jnp.maximum(acc, 0.0)                                # fc1  (TB, 128)
    t = jnp.maximum(jnp.dot(t.astype(cdt), wf2_ref[...],
                            preferred_element_type=f32) + bf2_ref[...], 0.0)
    t = jnp.dot(t.astype(cdt), wo_ref[...],
                preferred_element_type=f32) + bo_ref[...]
    o_ref[...] = t.astype(o_ref.dtype)                       # lane-dense (TB,128) store


# --------------------- host-side weight/layout preparation -------------------

def _conv1_toeplitz(w1):
    """(6,1,5,5) OIHW -> (5,28,256): W[di, w, pj*128+jh*6+c] = w1[c,0,di, w-(2*jh+pj)]
    for jh < 12; lanes 72..127 and 200..255 are zero."""
    w1s = w1[:, 0, :, :]                                   # (6, 5, 5)
    w_in = jnp.arange(28)[None, :, None]                   # (1, 28, 1)
    col = jnp.arange(256)[None, None, :]                   # (1, 1, 256)
    pj, rem = col // 128, col % 128
    jh, c = rem // 6, rem % 6
    di = jnp.arange(5)[:, None, None]                      # (5, 1, 1)
    dj = w_in - (2 * jh + pj)
    valid = (rem < 72) & (dj >= 0) & (dj <= 4)
    vals = w1s[c, di, jnp.clip(dj, 0, 4)]                  # (5, 28, 256)
    return jnp.where(valid, vals, 0.0).astype(jnp.float32)


def _conv2_toeplitz(w2):
    """(12,6,5,5) OIHW -> (5,128,96):
       W[di, w*6+cin, pj*48+jh*12+co] = w2[co,cin,di, w-(2*jh+pj)]; rows 72..127 zero."""
    r = jnp.arange(128)[None, :, None]
    w_in, cin = r // 6, r % 6
    col = jnp.arange(96)[None, None, :]
    pj, rem = col // 48, col % 48
    jh, co = rem // 12, rem % 12
    di = jnp.arange(5)[:, None, None]
    dj = w_in - (2 * jh + pj)
    valid = (r < 72) & (dj >= 0) & (dj <= 4)
    vals = w2[co, cin, di, jnp.clip(dj, 0, 4)]             # (5, 128, 96)
    return jnp.where(valid, vals, 0.0).astype(jnp.float32)


def _fc1_pack(fw1, fb1):
    """fc1 (120,192) -> (4,48,128): per pooled row h2, lane k = jh*12+co maps to the
       PyTorch flatten index co*16 + h2*4 + jh; output padded to 128 lanes."""
    k = jnp.arange(48)
    jh, co = k // 12, k % 12
    wf1 = jnp.zeros((4, 48, 128), jnp.float32)
    for h2 in range(4):
        src = co * 16 + h2 * 4 + jh
        wf1 = wf1.at[h2, :, :120].set(fw1[:, src].T)
    bf1 = jnp.zeros((1, 128), jnp.float32).at[0, :120].set(fb1)
    return wf1, bf1


def _const_spec(shape):
    zeros = (0,) * len(shape)
    return pl.BlockSpec(shape, lambda g, _z=zeros: _z)


def network2_forward(x_nchw, params, *, tb=8, dot_dtype=jnp.bfloat16):
    """Network_2.forward on a (B,1,28,28) batch with one fused Pallas kernel."""
    (w1, b1, w2, b2, fw1, fb1, fw2, fb2, ow, ob) = params
    B = x_nchw.shape[0]
    assert x_nchw.shape[1:] == (1, 28, 28)
    assert tb % 8 == 0, "tb must be a multiple of 8"
    f32 = jnp.float32

    # Pad batch to a multiple of tb (padded rows are discarded after the call).
    grid_n = -(-B // tb)
    bp = grid_n * tb
    if bp != B:
        x_nchw = jnp.pad(x_nchw, ((0, bp - B), (0, 0), (0, 0), (0, 0)))

    # Input relayout: xr[g, t, m*tb + b, :] = image[g*tb + b, 4*m + t, :]
    # so every conv1 matmul LHS is a single static 2-D (6*tb, 28) slab (batch folded
    # into M; m-major rows make conv2's row windows contiguous slices as well).
    img = x_nchw.astype(f32)[:, 0, :, :]                               # (bp, 28, 28)
    ridx = 4 * jnp.arange(6)[None, :] + jnp.arange(8)[:, None]         # (8, 6): 4m + t
    xr = img[:, ridx, :]                                               # (bp, 8, 6, 28)
    xr = xr.reshape(grid_n, tb, 8, 6, 28).transpose(0, 2, 3, 1, 4)
    xr = xr.reshape(grid_n, 8, 6 * tb, 28).astype(dot_dtype)

    # Weight / bias preparation (tiny, host-side); matmul operands in dot_dtype.
    w1t = _conv1_toeplitz(w1.astype(f32)).astype(dot_dtype)            # (5, 28, 256)
    b1r = jnp.tile(jnp.concatenate([jnp.tile(b1.astype(f32), 12),
                                    jnp.zeros((56,), f32)]), 2).reshape(1, 256)
    w2t = _conv2_toeplitz(w2.astype(f32)).astype(dot_dtype)            # (5, 128, 96)
    b2r = jnp.tile(b2.astype(f32), 8).reshape(1, 96)
    wf1t, bf1r = _fc1_pack(fw1.astype(f32), fb1.astype(f32))
    wf1t = wf1t.astype(dot_dtype)                                      # (4, 48, 128)
    wf2t = jnp.zeros((128, 128), f32).at[:120, :60].set(
        fw2.astype(f32).T).astype(dot_dtype)
    bf2r = jnp.zeros((1, 128), f32).at[0, :60].set(fb2.astype(f32))
    wot = jnp.zeros((128, 128), f32).at[:60, :10].set(
        ow.astype(f32).T).astype(dot_dtype)
    obr = jnp.zeros((1, 128), f32).at[0, :10].set(ob.astype(f32))

    out = pl.pallas_call(
        _network2_fused_kernel,
        out_shape=jax.ShapeDtypeStruct((bp, 128), f32),
        grid=(grid_n,),
        in_specs=[
            pl.BlockSpec((1, 8, 6 * tb, 28), lambda g: (g, 0, 0, 0)),
            _const_spec((5, 28, 256)),
            _const_spec((1, 256)),
            _const_spec((5, 128, 96)),
            _const_spec((1, 96)),
            _const_spec((4, 48, 128)),
            _const_spec((1, 128)),
            _const_spec((128, 128)),
            _const_spec((1, 128)),
            _const_spec((128, 128)),
            _const_spec((1, 128)),
        ],
        out_specs=pl.BlockSpec((tb, 128), lambda g: (g, 0)),
        compiler_params=pltpu.CompilerParams(dimension_semantics=("parallel",)),
    )(xr, w1t, b1r, w2t, b2r, wf1t, bf1r, wf2t, bf2r, wot, obr)
    return out[:B, :10]


# ------------------------------ pure-JAX reference ----------------------------

def network2_reference(x_nchw, params):
    (w1, b1, w2, b2, fw1, fb1, fw2, fb2, ow, ob) = params

    def conv(x, w, b):
        y = jax.lax.conv_general_dilated(
            x, w, window_strides=(1, 1), padding="VALID",
            dimension_numbers=("NCHW", "OIHW", "NCHW"))
        return jax.nn.relu(y + b[None, :, None, None])

    def pool(x):
        B, C, H, W = x.shape
        return jnp.max(x.reshape(B, C, H // 2, 2, W // 2, 2), axis=(3, 5))

    t = pool(conv(x_nchw, w1, b1))
    t = pool(conv(t, w2, b2))
    t = t.reshape(t.shape[0], -1)
    t = jax.nn.relu(t @ fw1.T + fb1)
    t = jax.nn.relu(t @ fw2.T + fb2)
    return t @ ow.T + ob


# ----------------------------------- main --------------------------------------

if __name__ == "__main__":
    key = jax.random.PRNGKey(0)
    keys = jax.random.split(key, 11)

    def init(k, shape, scale=0.1):
        return (scale * jax.random.normal(k, shape)).astype(jnp.float32)

    # Parameter shapes exactly as in Network_2.__init__ (PyTorch conventions).
    w1 = init(keys[0], (6, 1, 5, 5));    b1 = init(keys[1], (6,))
    w2 = init(keys[2], (12, 6, 5, 5));   b2 = init(keys[3], (12,))
    fw1 = init(keys[4], (120, 192));     fb1 = init(keys[5], (120,))
    fw2 = init(keys[6], (60, 120));      fb2 = init(keys[7], (60,))
    ow = init(keys[8], (10, 60));        ob = init(keys[9], (10,))
    params = (w1, b1, w2, b2, fw1, fb1, fw2, fb2, ow, ob)

    # The forward pass requires 28x28 single-channel input (12*4*4 flatten).
    # B=16 with TB=8 -> 2 "parallel" grid steps (both TensorCores busy on v7x).
    x = jax.random.normal(keys[10], (16, 1, 28, 28), dtype=jnp.float32)

    out = jax.block_until_ready(network2_forward(x, params, tb=8))
    assert out.shape == (16, 10), out.shape

    ref = network2_reference(x, params)
    # bf16 MXU operands (f32 accumulation) -> loosened tolerance vs the f32 reference.
    if not jnp.allclose(out, ref, rtol=5e-2, atol=5e-2):
        err = float(jnp.max(jnp.abs(out - ref)))
        raise AssertionError(f"Pallas output mismatch (max abs err {err})")

    print("KERNEL_OK")
</pallas_src>

<mosaic_0001>
module attributes {stable_mosaic.version = 11 : i64} {
  func.func @_network2_fused_kernel(%arg0: i32, %arg1: memref<1x8x48x28xbf16, #tpu.memory_space<vmem>>, %arg2: memref<5x28x256xbf16, #tpu.memory_space<vmem>>, %arg3: memref<1x256xf32, #tpu.memory_space<vmem>>, %arg4: memref<5x128x96xbf16, #tpu.memory_space<vmem>>, %arg5: memref<1x96xf32, #tpu.memory_space<vmem>>, %arg6: memref<4x48x128xbf16, #tpu.memory_space<vmem>>, %arg7: memref<1x128xf32, #tpu.memory_space<vmem>>, %arg8: memref<128x128xbf16, #tpu.memory_space<vmem>>, %arg9: memref<1x128xf32, #tpu.memory_space<vmem>>, %arg10: memref<128x128xbf16, #tpu.memory_space<vmem>>, %arg11: memref<1x128xf32, #tpu.memory_space<vmem>>, %arg12: memref<8x128xf32, #tpu.memory_space<vmem>>) attributes {dimension_semantics = [#tpu.dimension_semantics<parallel>], iteration_bounds = array<i64: 2>, scalar_prefetch = 0 : i64, scratch_operands = 0 : i64, tpu.core_type = #tpu.core_type<tc>, window_params = [{transform_indices = @transform_0, window_bounds = array<i64: 1, 8, 48, 28>}, {pipeline_mode = #tpu.pipeline_mode<synchronous>, transform_indices = @transform_1, window_bounds = array<i64: 5, 28, 256>}, {pipeline_mode = #tpu.pipeline_mode<synchronous>, transform_indices = @transform_2, window_bounds = array<i64: 1, 256>}, {pipeline_mode = #tpu.pipeline_mode<synchronous>, transform_indices = @transform_3, window_bounds = array<i64: 5, 128, 96>}, {pipeline_mode = #tpu.pipeline_mode<synchronous>, transform_indices = @transform_4, window_bounds = array<i64: 1, 96>}, {pipeline_mode = #tpu.pipeline_mode<synchronous>, transform_indices = @transform_5, window_bounds = array<i64: 4, 48, 128>}, {pipeline_mode = #tpu.pipeline_mode<synchronous>, transform_indices = @transform_6, window_bounds = array<i64: 1, 128>}, {pipeline_mode = #tpu.pipeline_mode<synchronous>, transform_indices = @transform_7, window_bounds = array<i64: 128, 128>}, {pipeline_mode = #tpu.pipeline_mode<synchronous>, transform_indices = @transform_8, window_bounds = array<i64: 1, 128>}, {pipeline_mode = #tpu.pipeline_mode<synchronous>, transform_indices = @transform_9, window_bounds = array<i64: 128, 128>}, {pipeline_mode = #tpu.pipeline_mode<synchronous>, transform_indices = @transform_10, window_bounds = array<i64: 1, 128>}, {transform_indices = @transform_11, window_bounds = array<i64: 8, 128>}]} {
    %c0 = arith.constant 0 : index
    %c0_0 = arith.constant 0 : index
    %0 = vector.load %arg3[%c0, %c0_0] : memref<1x256xf32, #tpu.memory_space<vmem>>, vector<1x256xf32>
    %c0_1 = arith.constant 0 : index
    %c0_2 = arith.constant 0 : index
    %1 = vector.load %arg5[%c0_1, %c0_2] : memref<1x96xf32, #tpu.memory_space<vmem>>, vector<1x96xf32>
    %cst = arith.constant 0.000000e+00 : f32
    %2 = vector.broadcast %cst : f32 to vector<48x256xf32>
    %c0_3 = arith.constant 0 : index
    %c0_4 = arith.constant 0 : index
    %c0_5 = arith.constant 0 : index
    %c0_6 = arith.constant 0 : index
    %3 = vector.load %arg1[%c0_3, %c0_4, %c0_5, %c0_6] : memref<1x8x48x28xbf16, #tpu.memory_space<vmem>>, vector<1x1x48x28xbf16>
    %4 = vector.shape_cast %3 : vector<1x1x48x28xbf16> to vector<48x28xbf16>
    %c0_7 = arith.constant 0 : index
    %c0_8 = arith.constant 0 : index
    %c0_9 = arith.constant 0 : index
    %5 = vector.load %arg2[%c0_7, %c0_8, %c0_9] : memref<5x28x256xbf16, #tpu.memory_space<vmem>>, vector<1x28x256xbf16>
    %6 = vector.shape_cast %5 : vector<1x28x256xbf16> to vector<28x256xbf16>
    %cst_10 = arith.constant dense<0.000000e+00> : vector<48x256xf32>
    %7 = tpu.matmul %4, %6, %cst_10 {dimension_numbers = #tpu.dot_dimension_numbers<[1], [0], [0], [1], [0, 0, 1, 1], [], []>} : vector<48x28xbf16>, vector<28x256xbf16>, vector<48x256xf32> -> vector<48x256xf32>
    %8 = arith.addf %2, %7 : vector<48x256xf32>
    %c0_11 = arith.constant 0 : index
    %c1 = arith.constant 1 : index
    %c0_12 = arith.constant 0 : index
    %c0_13 = arith.constant 0 : index
    %9 = vector.load %arg1[%c0_11, %c1, %c0_12, %c0_13] : memref<1x8x48x28xbf16, #tpu.memory_space<vmem>>, vector<1x1x48x28xbf16>
    %10 = vector.shape_cast %9 : vector<1x1x48x28xbf16> to vector<48x28xbf16>
    %c1_14 = arith.constant 1 : index
    %c0_15 = arith.constant 0 : index
    %c0_16 = arith.constant 0 : index
    %11 = vector.load %arg2[%c1_14, %c0_15, %c0_16] : memref<5x28x256xbf16, #tpu.memory_space<vmem>>, vector<1x28x256xbf16>
    %12 = vector.shape_cast %11 : vector<1x28x256xbf16> to vector<28x256xbf16>
    %cst_17 = arith.constant dense<0.000000e+00> : vector<48x256xf32>
    %13 = tpu.matmul %10, %12, %cst_17 {dimension_numbers = #tpu.dot_dimension_numbers<[1], [0], [0], [1], [0, 0, 1, 1], [], []>} : vector<48x28xbf16>, vector<28x256xbf16>, vector<48x256xf32> -> vector<48x256xf32>
    %14 = arith.addf %8, %13 : vector<48x256xf32>
    %c0_18 = arith.constant 0 : index
    %c2 = arith.constant 2 : index
    %c0_19 = arith.constant 0 : index
    %c0_20 = arith.constant 0 : index
    %15 = vector.load %arg1[%c0_18, %c2, %c0_19, %c0_20] : memref<1x8x48x28xbf16, #tpu.memory_space<vmem>>, vector<1x1x48x28xbf16>
    %16 = vector.shape_cast %15 : vector<1x1x48x28xbf16> to vector<48x28xbf16>
    %c2_21 = arith.constant 2 : index
    %c0_22 = arith.constant 0 : index
    %c0_23 = arith.constant 0 : index
    %17 = vector.load %arg2[%c2_21, %c0_22, %c0_23] : memref<5x28x256xbf16, #tpu.memory_space<vmem>>, vector<1x28x256xbf16>
    %18 = vector.shape_cast %17 : vector<1x28x256xbf16> to vector<28x256xbf16>
    %cst_24 = arith.constant dense<0.000000e+00> : vector<48x256xf32>
    %19 = tpu.matmul %16, %18, %cst_24 {dimension_numbers = #tpu.dot_dimension_numbers<[1], [0], [0], [1], [0, 0, 1, 1], [], []>} : vector<48x28xbf16>, vector<28x256xbf16>, vector<48x256xf32> -> vector<48x256xf32>
    %20 = arith.addf %14, %19 : vector<48x256xf32>
    %c0_25 = arith.constant 0 : index
    %c3 = arith.constant 3 : index
    %c0_26 = arith.constant 0 : index
    %c0_27 = arith.constant 0 : index
    %21 = vector.load %arg1[%c0_25, %c3, %c0_26, %c0_27] : memref<1x8x48x28xbf16, #tpu.memory_space<vmem>>, vector<1x1x48x28xbf16>
    %22 = vector.shape_cast %21 : vector<1x1x48x28xbf16> to vector<48x28xbf16>
    %c3_28 = arith.constant 3 : index
    %c0_29 = arith.constant 0 : index
    %c0_30 = arith.constant 0 : index
    %23 = vector.load %arg2[%c3_28, %c0_29, %c0_30] : memref<5x28x256xbf16, #tpu.memory_space<vmem>>, vector<1x28x256xbf16>
    %24 = vector.shape_cast %23 : vector<1x28x256xbf16> to vector<28x256xbf16>
    %cst_31 = arith.constant dense<0.000000e+00> : vector<48x256xf32>
    %25 = tpu.matmul %22, %24, %cst_31 {dimension_numbers = #tpu.dot_dimension_numbers<[1], [0], [0], [1], [0, 0, 1, 1], [], []>} : vector<48x28xbf16>, vector<28x256xbf16>, vector<48x256xf32> -> vector<48x256xf32>
    %26 = arith.addf %20, %25 : vector<48x256xf32>
    %c0_32 = arith.constant 0 : index
    %c4 = arith.constant 4 : index
    %c0_33 = arith.constant 0 : index
    %c0_34 = arith.constant 0 : index
    %27 = vector.load %arg1[%c0_32, %c4, %c0_33, %c0_34] : memref<1x8x48x28xbf16, #tpu.memory_space<vmem>>, vector<1x1x48x28xbf16>
    %28 = vector.shape_cast %27 : vector<1x1x48x28xbf16> to vector<48x28xbf16>
    %c4_35 = arith.constant 4 : index
    %c0_36 = arith.constant 0 : index
    %c0_37 = arith.constant 0 : index
    %29 = vector.load %arg2[%c4_35, %c0_36, %c0_37] : memref<5x28x256xbf16, #tpu.memory_space<vmem>>, vector<1x28x256xbf16>
    %30 = vector.shape_cast %29 : vector<1x28x256xbf16> to vector<28x256xbf16>
    %cst_38 = arith.constant dense<0.000000e+00> : vector<48x256xf32>
    %31 = tpu.matmul %28, %30, %cst_38 {dimension_numbers = #tpu.dot_dimension_numbers<[1], [0], [0], [1], [0, 0, 1, 1], [], []>} : vector<48x28xbf16>, vector<28x256xbf16>, vector<48x256xf32> -> vector<48x256xf32>
    %32 = arith.addf %26, %31 : vector<48x256xf32>
    %33 = vector.broadcast %0 : vector<1x256xf32> to vector<48x256xf32>
    %34 = arith.addf %32, %33 : vector<48x256xf32>
    %cst_39 = arith.constant 0.000000e+00 : f32
    %35 = vector.broadcast %cst_39 : f32 to vector<48x256xf32>
    %36 = arith.maximumf %34, %35 : vector<48x256xf32>
    %cst_40 = arith.constant 0.000000e+00 : f32
    %37 = vector.broadcast %cst_40 : f32 to vector<48x256xf32>
    %c0_41 = arith.constant 0 : index
    %c1_42 = arith.constant 1 : index
    %c0_43 = arith.constant 0 : index
    %c0_44 = arith.constant 0 : index
    %38 = vector.load %arg1[%c0_41, %c1_42, %c0_43, %c0_44] : memref<1x8x48x28xbf16, #tpu.memory_space<vmem>>, vector<1x1x48x28xbf16>
    %39 = vector.shape_cast %38 : vector<1x1x48x28xbf16> to vector<48x28xbf16>
    %c0_45 = arith.constant 0 : index
    %c0_46 = arith.constant 0 : index
    %c0_47 = arith.constant 0 : index
    %40 = vector.load %arg2[%c0_45, %c0_46, %c0_47] : memref<5x28x256xbf16, #tpu.memory_space<vmem>>, vector<1x28x256xbf16>
    %41 = vector.shape_cast %40 : vector<1x28x256xbf16> to vector<28x256xbf16>
    %cst_48 = arith.constant dense<0.000000e+00> : vector<48x256xf32>
    %42 = tpu.matmul %39, %41, %cst_48 {dimension_numbers = #tpu.dot_dimension_numbers<[1], [0], [0], [1], [0, 0, 1, 1], [], []>} : vector<48x28xbf16>, vector<28x256xbf16>, vector<48x256xf32> -> vector<48x256xf32>
    %43 = arith.addf %37, %42 : vector<48x256xf32>
    %c0_49 = arith.constant 0 : index
    %c2_50 = arith.constant 2 : index
    %c0_51 = arith.constant 0 : index
    %c0_52 = arith.constant 0 : index
    %44 = vector.load %arg1[%c0_49, %c2_50, %c0_51, %c0_52] : memref<1x8x48x28xbf16, #tpu.memory_space<vmem>>, vector<1x1x48x28xbf16>
    %45 = vector.shape_cast %44 : vector<1x1x48x28xbf16> to vector<48x28xbf16>
    %c1_53 = arith.constant 1 : index
    %c0_54 = arith.constant 0 : index
    %c0_55 = arith.constant 0 : index
    %46 = vector.load %arg2[%c1_53, %c0_54, %c0_55] : memref<5x28x256xbf16, #tpu.memory_space<vmem>>, vector<1x28x256xbf16>
    %47 = vector.shape_cast %46 : vector<1x28x256xbf16> to vector<28x256xbf16>
    %cst_56 = arith.constant dense<0.000000e+00> : vector<48x256xf32>
    %48 = tpu.matmul %45, %47, %cst_56 {dimension_numbers = #tpu.dot_dimension_numbers<[1], [0], [0], [1], [0, 0, 1, 1], [], []>} : vector<48x28xbf16>, vector<28x256xbf16>, vector<48x256xf32> -> vector<48x256xf32>
    %49 = arith.addf %43, %48 : vector<48x256xf32>
    %c0_57 = arith.constant 0 : index
    %c3_58 = arith.constant 3 : index
    %c0_59 = arith.constant 0 : index
    %c0_60 = arith.constant 0 : index
    %50 = vector.load %arg1[%c0_57, %c3_58, %c0_59, %c0_60] : memref<1x8x48x28xbf16, #tpu.memory_space<vmem>>, vector<1x1x48x28xbf16>
    %51 = vector.shape_cast %50 : vector<1x1x48x28xbf16> to vector<48x28xbf16>
    %c2_61 = arith.constant 2 : index
    %c0_62 = arith.constant 0 : index
    %c0_63 = arith.constant 0 : index
    %52 = vector.load %arg2[%c2_61, %c0_62, %c0_63] : memref<5x28x256xbf16, #tpu.memory_space<vmem>>, vector<1x28x256xbf16>
    %53 = vector.shape_cast %52 : vector<1x28x256xbf16> to vector<28x256xbf16>
    %cst_64 = arith.constant dense<0.000000e+00> : vector<48x256xf32>
    %54 = tpu.matmul %51, %53, %cst_64 {dimension_numbers = #tpu.dot_dimension_numbers<[1], [0], [0], [1], [0, 0, 1, 1], [], []>} : vector<48x28xbf16>, vector<28x256xbf16>, vector<48x256xf32> -> vector<48x256xf32>
    %55 = arith.addf %49, %54 : vector<48x256xf32>
    %c0_65 = arith.constant 0 : index
    %c4_66 = arith.constant 4 : index
    %c0_67 = arith.constant 0 : index
    %c0_68 = arith.constant 0 : index
    %56 = vector.load %arg1[%c0_65, %c4_66, %c0_67, %c0_68] : memref<1x8x48x28xbf16, #tpu.memory_space<vmem>>, vector<1x1x48x28xbf16>
    %57 = vector.shape_cast %56 : vector<1x1x48x28xbf16> to vector<48x28xbf16>
    %c3_69 = arith.constant 3 : index
    %c0_70 = arith.constant 0 : index
    %c0_71 = arith.constant 0 : index
    %58 = vector.load %arg2[%c3_69, %c0_70, %c0_71] : memref<5x28x256xbf16, #tpu.memory_space<vmem>>, vector<1x28x256xbf16>
    %59 = vector.shape_cast %58 : vector<1x28x256xbf16> to vector<28x256xbf16>
    %cst_72 = arith.constant dense<0.000000e+00> : vector<48x256xf32>
    %60 = tpu.matmul %57, %59, %cst_72 {dimension_numbers = #tpu.dot_dimension_numbers<[1], [0], [0], [1], [0, 0, 1, 1], [], []>} : vector<48x28xbf16>, vector<28x256xbf16>, vector<48x256xf32> -> vector<48x256xf32>
    %61 = arith.addf %55, %60 : vector<48x256xf32>
    %c0_73 = arith.constant 0 : index
    %c5 = arith.constant 5 : index
    %c0_74 = arith.constant 0 : index
    %c0_75 = arith.constant 0 : index
    %62 = vector.load %arg1[%c0_73, %c5, %c0_74, %c0_75] : memref<1x8x48x28xbf16, #tpu.memory_space<vmem>>, vector<1x1x48x28xbf16>
    %63 = vector.shape_cast %62 : vector<1x1x48x28xbf16> to vector<48x28xbf16>
    %c4_76 = arith.constant 4 : index
    %c0_77 = arith.constant 0 : index
    %c0_78 = arith.constant 0 : index
    %64 = vector.load %arg2[%c4_76, %c0_77, %c0_78] : memref<5x28x256xbf16, #tpu.memory_space<vmem>>, vector<1x28x256xbf16>
    %65 = vector.shape_cast %64 : vector<1x28x256xbf16> to vector<28x256xbf16>
    %cst_79 = arith.constant dense<0.000000e+00> : vector<48x256xf32>
    %66 = tpu.matmul %63, %65, %cst_79 {dimension_numbers = #tpu.dot_dimension_numbers<[1], [0], [0], [1], [0, 0, 1, 1], [], []>} : vector<48x28xbf16>, vector<28x256xbf16>, vector<48x256xf32> -> vector<48x256xf32>
    %67 = arith.addf %61, %66 : vector<48x256xf32>
    %68 = vector.broadcast %0 : vector<1x256xf32> to vector<48x256xf32>
    %69 = arith.addf %67, %68 : vector<48x256xf32>
    %cst_80 = arith.constant 0.000000e+00 : f32
    %70 = vector.broadcast %cst_80 : f32 to vector<48x256xf32>
    %71 = arith.maximumf %69, %70 : vector<48x256xf32>
    %72 = arith.maximumf %36, %71 : vector<48x256xf32>
    %73 = vector.extract_strided_slice %72 {offsets = [0, 0], sizes = [48, 128], strides = [1, 1]} : vector<48x256xf32> to vector<48x128xf32>
    %74 = vector.extract_strided_slice %72 {offsets = [0, 128], sizes = [48, 128], strides = [1, 1]} : vector<48x256xf32> to vector<48x128xf32>
    %75 = arith.maximumf %73, %74 : vector<48x128xf32>
    %cst_81 = arith.constant 0.000000e+00 : f32
    %76 = vector.broadcast %cst_81 : f32 to vector<48x256xf32>
    %c0_82 = arith.constant 0 : index
    %c2_83 = arith.constant 2 : index
    %c0_84 = arith.constant 0 : index
    %c0_85 = arith.constant 0 : index
    %77 = vector.load %arg1[%c0_82, %c2_83, %c0_84, %c0_85] : memref<1x8x48x28xbf16, #tpu.memory_space<vmem>>, vector<1x1x48x28xbf16>
    %78 = vector.shape_cast %77 : vector<1x1x48x28xbf16> to vector<48x28xbf16>
    %c0_86 = arith.constant 0 : index
    %c0_87 = arith.constant 0 : index
    %c0_88 = arith.constant 0 : index
    %79 = vector.load %arg2[%c0_86, %c0_87, %c0_88] : memref<5x28x256xbf16, #tpu.memory_space<vmem>>, vector<1x28x256xbf16>
    %80 = vector.shape_cast %79 : vector<1x28x256xbf16> to vector<28x256xbf16>
    %cst_89 = arith.constant dense<0.000000e+00> : vector<48x256xf32>
    %81 = tpu.matmul %78, %80, %cst_89 {dimension_numbers = #tpu.dot_dimension_numbers<[1], [0], [0], [1], [0, 0, 1, 1], [], []>} : vector<48x28xbf16>, vector<28x256xbf16>, vector<48x256xf32> -> vector<48x256xf32>
    %82 = arith.addf %76, %81 : vector<48x256xf32>
    %c0_90 = arith.constant 0 : index
    %c3_91 = arith.constant 3 : index
    %c0_92 = arith.constant 0 : index
    %c0_93 = arith.constant 0 : index
    %83 = vector.load %arg1[%c0_90, %c3_91, %c0_92, %c0_93] : memref<1x8x48x28xbf16, #tpu.memory_space<vmem>>, vector<1x1x48x28xbf16>
    %84 = vector.shape_cast %83 : vector<1x1x48x28xbf16> to vector<48x28xbf16>
    %c1_94 = arith.constant 1 : index
    %c0_95 = arith.constant 0 : index
    %c0_96 = arith.constant 0 : index
    %85 = vector.load %arg2[%c1_94, %c0_95, %c0_96] : memref<5x28x256xbf16, #tpu.memory_space<vmem>>, vector<1x28x256xbf16>
    %86 = vector.shape_cast %85 : vector<1x28x256xbf16> to vector<28x256xbf16>
    %cst_97 = arith.constant dense<0.000000e+00> : vector<48x256xf32>
    %87 = tpu.matmul %84, %86, %cst_97 {dimension_numbers = #tpu.dot_dimension_numbers<[1], [0], [0], [1], [0, 0, 1, 1], [], []>} : vector<48x28xbf16>, vector<28x256xbf16>, vector<48x256xf32> -> vector<48x256xf32>
    %88 = arith.addf %82, %87 : vector<48x256xf32>
    %c0_98 = arith.constant 0 : index
    %c4_99 = arith.constant 4 : index
    %c0_100 = arith.constant 0 : index
    %c0_101 = arith.constant 0 : index
    %89 = vector.load %arg1[%c0_98, %c4_99, %c0_100, %c0_101] : memref<1x8x48x28xbf16, #tpu.memory_space<vmem>>, vector<1x1x48x28xbf16>
    %90 = vector.shape_cast %89 : vector<1x1x48x28xbf16> to vector<48x28xbf16>
    %c2_102 = arith.constant 2 : index
    %c0_103 = arith.constant 0 : index
    %c0_104 = arith.constant 0 : index
    %91 = vector.load %arg2[%c2_102, %c0_103, %c0_104] : memref<5x28x256xbf16, #tpu.memory_space<vmem>>, vector<1x28x256xbf16>
    %92 = vector.shape_cast %91 : vector<1x28x256xbf16> to vector<28x256xbf16>
    %cst_105 = arith.constant dense<0.000000e+00> : vector<48x256xf32>
    %93 = tpu.matmul %90, %92, %cst_105 {dimension_numbers = #tpu.dot_dimension_numbers<[1], [0], [0], [1], [0, 0, 1, 1], [], []>} : vector<48x28xbf16>, vector<28x256xbf16>, vector<48x256xf32> -> vector<48x256xf32>
    %94 = arith.addf %88, %93 : vector<48x256xf32>
    %c0_106 = arith.constant 0 : index
    %c5_107 = arith.constant 5 : index
    %c0_108 = arith.constant 0 : index
    %c0_109 = arith.constant 0 : index
    %95 = vector.load %arg1[%c0_106, %c5_107, %c0_108, %c0_109] : memref<1x8x48x28xbf16, #tpu.memory_space<vmem>>, vector<1x1x48x28xbf16>
    %96 = vector.shape_cast %95 : vector<1x1x48x28xbf16> to vector<48x28xbf16>
    %c3_110 = arith.constant 3 : index
    %c0_111 = arith.constant 0 : index
    %c0_112 = arith.constant 0 : index
    %97 = vector.load %arg2[%c3_110, %c0_111, %c0_112] : memref<5x28x256xbf16, #tpu.memory_space<vmem>>, vector<1x28x256xbf16>
    %98 = vector.shape_cast %97 : vector<1x28x256xbf16> to vector<28x256xbf16>
    %cst_113 = arith.constant dense<0.000000e+00> : vector<48x256xf32>
    %99 = tpu.matmul %96, %98, %cst_113 {dimension_numbers = #tpu.dot_dimension_numbers<[1], [0], [0], [1], [0, 0, 1, 1], [], []>} : vector<48x28xbf16>, vector<28x256xbf16>, vector<48x256xf32> -> vector<48x256xf32>
    %100 = arith.addf %94, %99 : vector<48x256xf32>
    %c0_114 = arith.constant 0 : index
    %c6 = arith.constant 6 : index
    %c0_115 = arith.constant 0 : index
    %c0_116 = arith.constant 0 : index
    %101 = vector.load %arg1[%c0_114, %c6, %c0_115, %c0_116] : memref<1x8x48x28xbf16, #tpu.memory_space<vmem>>, vector<1x1x48x28xbf16>
    %102 = vector.shape_cast %101 : vector<1x1x48x28xbf16> to vector<48x28xbf16>
    %c4_117 = arith.constant 4 : index
    %c0_118 = arith.constant 0 : index
    %c0_119 = arith.constant 0 : index
    %103 = vector.load %arg2[%c4_117, %c0_118, %c0_119] : memref<5x28x256xbf16, #tpu.memory_space<vmem>>, vector<1x28x256xbf16>
    %104 = vector.shape_cast %103 : vector<1x28x256xbf16> to vector<28x256xbf16>
    %cst_120 = arith.constant dense<0.000000e+00> : vector<48x256xf32>
    %105 = tpu.matmul %102, %104, %cst_120 {dimension_numbers = #tpu.dot_dimension_numbers<[1], [0], [0], [1], [0, 0, 1, 1], [], []>} : vector<48x28xbf16>, vector<28x256xbf16>, vector<48x256xf32> -> vector<48x256xf32>
    %106 = arith.addf %100, %105 : vector<48x256xf32>
    %107 = vector.broadcast %0 : vector<1x256xf32> to vector<48x256xf32>
    %108 = arith.addf %106, %107 : vector<48x256xf32>
    %cst_121 = arith.constant 0.000000e+00 : f32
    %109 = vector.broadcast %cst_121 : f32 to vector<48x256xf32>
    %110 = arith.maximumf %108, %109 : vector<48x256xf32>
    %cst_122 = arith.constant 0.000000e+00 : f32
    %111 = vector.broadcast %cst_122 : f32 to vector<48x256xf32>
    %c0_123 = arith.constant 0 : index
    %c3_124 = arith.constant 3 : index
    %c0_125 = arith.constant 0 : index
    %c0_126 = arith.constant 0 : index
    %112 = vector.load %arg1[%c0_123, %c3_124, %c0_125, %c0_126] : memref<1x8x48x28xbf16, #tpu.memory_space<vmem>>, vector<1x1x48x28xbf16>
    %113 = vector.shape_cast %112 : vector<1x1x48x28xbf16> to vector<48x28xbf16>
    %c0_127 = arith.constant 0 : index
    %c0_128 = arith.constant 0 : index
    %c0_129 = arith.constant 0 : index
    %114 = vector.load %arg2[%c0_127, %c0_128, %c0_129] : memref<5x28x256xbf16, #tpu.memory_space<vmem>>, vector<1x28x256xbf16>
    %115 = vector.shape_cast %114 : vector<1x28x256xbf16> to vector<28x256xbf16>
    %cst_130 = arith.constant dense<0.000000e+00> : vector<48x256xf32>
    %116 = tpu.matmul %113, %115, %cst_130 {dimension_numbers = #tpu.dot_dimension_numbers<[1], [0], [0], [1], [0, 0, 1, 1], [], []>} : vector<48x28xbf16>, vector<28x256xbf16>, vector<48x256xf32> -> vector<48x256xf32>
    %117 = arith.addf %111, %116 : vector<48x256xf32>
    %c0_131 = arith.constant 0 : index
    %c4_132 = arith.constant 4 : index
    %c0_133 = arith.constant 0 : index
    %c0_134 = arith.constant 0 : index
    %118 = vector.load %arg1[%c0_131, %c4_132, %c0_133, %c0_134] : memref<1x8x48x28xbf16, #tpu.memory_space<vmem>>, vector<1x1x48x28xbf16>
    %119 = vector.shape_cast %118 : vector<1x1x48x28xbf16> to vector<48x28xbf16>
    %c1_135 = arith.constant 1 : index
    %c0_136 = arith.constant 0 : index
    %c0_137 = arith.constant 0 : index
    %120 = vector.load %arg2[%c1_135, %c0_136, %c0_137] : memref<5x28x256xbf16, #tpu.memory_space<vmem>>, vector<1x28x256xbf16>
    %121 = vector.shape_cast %120 : vector<1x28x256xbf16> to vector<28x256xbf16>
    %cst_138 = arith.constant dense<0.000000e+00> : vector<48x256xf32>
    %122 = tpu.matmul %119, %121, %cst_138 {dimension_numbers = #tpu.dot_dimension_numbers<[1], [0], [0], [1], [0, 0, 1, 1], [], []>} : vector<48x28xbf16>, vector<28x256xbf16>, vector<48x256xf32> -> vector<48x256xf32>
    %123 = arith.addf %117, %122 : vector<48x256xf32>
    %c0_139 = arith.constant 0 : index
    %c5_140 = arith.constant 5 : index
    %c0_141 = arith.constant 0 : index
    %c0_142 = arith.constant 0 : index
    %124 = vector.load %arg1[%c0_139, %c5_140, %c0_141, %c0_142] : memref<1x8x48x28xbf16, #tpu.memory_space<vmem>>, vector<1x1x48x28xbf16>
    %125 = vector.shape_cast %124 : vector<1x1x48x28xbf16> to vector<48x28xbf16>
    %c2_143 = arith.constant 2 : index
    %c0_144 = arith.constant 0 : index
    %c0_145 = arith.constant 0 : index
    %126 = vector.load %arg2[%c2_143, %c0_144, %c0_145] : memref<5x28x256xbf16, #tpu.memory_space<vmem>>, vector<1x28x256xbf16>
    %127 = vector.shape_cast %126 : vector<1x28x256xbf16> to vector<28x256xbf16>
    %cst_146 = arith.constant dense<0.000000e+00> : vector<48x256xf32>
    %128 = tpu.matmul %125, %127, %cst_146 {dimension_numbers = #tpu.dot_dimension_numbers<[1], [0], [0], [1], [0, 0, 1, 1], [], []>} : vector<48x28xbf16>, vector<28x256xbf16>, vector<48x256xf32> -> vector<48x256xf32>
    %129 = arith.addf %123, %128 : vector<48x256xf32>
    %c0_147 = arith.constant 0 : index
    %c6_148 = arith.constant 6 : index
    %c0_149 = arith.constant 0 : index
    %c0_150 = arith.constant 0 : index
    %130 = vector.load %arg1[%c0_147, %c6_148, %c0_149, %c0_150] : memref<1x8x48x28xbf16, #tpu.memory_space<vmem>>, vector<1x1x48x28xbf16>
    %131 = vector.shape_cast %130 : vector<1x1x48x28xbf16> to vector<48x28xbf16>
    %c3_151 = arith.constant 3 : index
    %c0_152 = arith.constant 0 : index
    %c0_153 = arith.constant 0 : index
    %132 = vector.load %arg2[%c3_151, %c0_152, %c0_153] : memref<5x28x256xbf16, #tpu.memory_space<vmem>>, vector<1x28x256xbf16>
    %133 = vector.shape_cast %132 : vector<1x28x256xbf16> to vector<28x256xbf16>
    %cst_154 = arith.constant dense<0.000000e+00> : vector<48x256xf32>
    %134 = tpu.matmul %131, %133, %cst_154 {dimension_numbers = #tpu.dot_dimension_numbers<[1], [0], [0], [1], [0, 0, 1, 1], [], []>} : vector<48x28xbf16>, vector<28x256xbf16>, vector<48x256xf32> -> vector<48x256xf32>
    %135 = arith.addf %129, %134 : vector<48x256xf32>
    %c0_155 = arith.constant 0 : index
    %c7 = arith.constant 7 : index
    %c0_156 = arith.constant 0 : index
    %c0_157 = arith.constant 0 : index
    %136 = vector.load %arg1[%c0_155, %c7, %c0_156, %c0_157] : memref<1x8x48x28xbf16, #tpu.memory_space<vmem>>, vector<1x1x48x28xbf16>
    %137 = vector.shape_cast %136 : vector<1x1x48x28xbf16> to vector<48x28xbf16>
    %c4_158 = arith.constant 4 : index
    %c0_159 = arith.constant 0 : index
    %c0_160 = arith.constant 0 : index
    %138 = vector.load %arg2[%c4_158, %c0_159, %c0_160] : memref<5x28x256xbf16, #tpu.memory_space<vmem>>, vector<1x28x256xbf16>
    %139 = vector.shape_cast %138 : vector<1x28x256xbf16> to vector<28x256xbf16>
    %cst_161 = arith.constant dense<0.000000e+00> : vector<48x256xf32>
    %140 = tpu.matmul %137, %139, %cst_161 {dimension_numbers = #tpu.dot_dimension_numbers<[1], [0], [0], [1], [0, 0, 1, 1], [], []>} : vector<48x28xbf16>, vector<28x256xbf16>, vector<48x256xf32> -> vector<48x256xf32>
    %141 = arith.addf %135, %140 : vector<48x256xf32>
    %142 = vector.broadcast %0 : vector<1x256xf32> to vector<48x256xf32>
    %143 = arith.addf %141, %142 : vector<48x256xf32>
    %cst_162 = arith.constant 0.000000e+00 : f32
    %144 = vector.broadcast %cst_162 : f32 to vector<48x256xf32>
    %145 = arith.maximumf %143, %144 : vector<48x256xf32>
    %146 = arith.maximumf %110, %145 : vector<48x256xf32>
    %147 = vector.extract_strided_slice %146 {offsets = [0, 0], sizes = [48, 128], strides = [1, 1]} : vector<48x256xf32> to vector<48x128xf32>
    %148 = vector.extract_strided_slice %146 {offsets = [0, 128], sizes = [48, 128], strides = [1, 1]} : vector<48x256xf32> to vector<48x128xf32>
    %149 = arith.maximumf %147, %148 : vector<48x128xf32>
    %cst_163 = arith.constant 0.000000e+00 : f32
    %150 = vector.broadcast %cst_163 : f32 to vector<32x96xf32>
    %151 = vector.extract_strided_slice %75 {offsets = [0, 0], sizes = [32, 128], strides = [1, 1]} : vector<48x128xf32> to vector<32x128xf32>
    %152 = arith.truncf %151 : vector<32x128xf32> to vector<32x128xbf16>
    %c0_164 = arith.constant 0 : index
    %c0_165 = arith.constant 0 : index
    %c0_166 = arith.constant 0 : index
    %153 = vector.load %arg4[%c0_164, %c0_165, %c0_166] : memref<5x128x96xbf16, #tpu.memory_space<vmem>>, vector<1x128x96xbf16>
    %154 = vector.shape_cast %153 : vector<1x128x96xbf16> to vector<128x96xbf16>
    %cst_167 = arith.constant dense<0.000000e+00> : vector<32x96xf32>
    %155 = tpu.matmul %152, %154, %cst_167 {dimension_numbers = #tpu.dot_dimension_numbers<[1], [0], [0], [1], [0, 0, 1, 1], [], []>} : vector<32x128xbf16>, vector<128x96xbf16>, vector<32x96xf32> -> vector<32x96xf32>
    %156 = arith.addf %150, %155 : vector<32x96xf32>
    %157 = vector.extract_strided_slice %149 {offsets = [0, 0], sizes = [32, 128], strides = [1, 1]} : vector<48x128xf32> to vector<32x128xf32>
    %158 = arith.truncf %157 : vector<32x128xf32> to vector<32x128xbf16>
    %c1_168 = arith.constant 1 : index
    %c0_169 = arith.constant 0 : index
    %c0_170 = arith.constant 0 : index
    %159 = vector.load %arg4[%c1_168, %c0_169, %c0_170] : memref<5x128x96xbf16, #tpu.memory_space<vmem>>, vector<1x128x96xbf16>
    %160 = vector.shape_cast %159 : vector<1x128x96xbf16> to vector<128x96xbf16>
    %cst_171 = arith.constant dense<0.000000e+00> : vector<32x96xf32>
    %161 = tpu.matmul %158, %160, %cst_171 {dimension_numbers = #tpu.dot_dimension_numbers<[1], [0], [0], [1], [0, 0, 1, 1], [], []>} : vector<32x128xbf16>, vector<128x96xbf16>, vector<32x96xf32> -> vector<32x96xf32>
    %162 = arith.addf %156, %161 : vector<32x96xf32>
    %163 = vector.extract_strided_slice %75 {offsets = [8, 0], sizes = [32, 128], strides = [1, 1]} : vector<48x128xf32> to vector<32x128xf32>
    %164 = arith.truncf %163 : vector<32x128xf32> to vector<32x128xbf16>
    %c2_172 = arith.constant 2 : index
    %c0_173 = arith.constant 0 : index
    %c0_174 = arith.constant 0 : index
    %165 = vector.load %arg4[%c2_172, %c0_173, %c0_174] : memref<5x128x96xbf16, #tpu.memory_space<vmem>>, vector<1x128x96xbf16>
    %166 = vector.shape_cast %165 : vector<1x128x96xbf16> to vector<128x96xbf16>
    %cst_175 = arith.constant dense<0.000000e+00> : vector<32x96xf32>
    %167 = tpu.matmul %164, %166, %cst_175 {dimension_numbers = #tpu.dot_dimension_numbers<[1], [0], [0], [1], [0, 0, 1, 1], [], []>} : vector<32x128xbf16>, vector<128x96xbf16>, vector<32x96xf32> -> vector<32x96xf32>
    %168 = arith.addf %162, %167 : vector<32x96xf32>
    %169 = vector.extract_strided_slice %149 {offsets = [8, 0], sizes = [32, 128], strides = [1, 1]} : vector<48x128xf32> to vector<32x128xf32>
    %170 = arith.truncf %169 : vector<32x128xf32> to vector<32x128xbf16>
    %c3_176 = arith.constant 3 : index
    %c0_177 = arith.constant 0 : index
    %c0_178 = arith.constant 0 : index
    %171 = vector.load %arg4[%c3_176, %c0_177, %c0_178] : memref<5x128x96xbf16, #tpu.memory_space<vmem>>, vector<1x128x96xbf16>
    %172 = vector.shape_cast %171 : vector<1x128x96xbf16> to vector<128x96xbf16>
    %cst_179 = arith.constant dense<0.000000e+00> : vector<32x96xf32>
    %173 = tpu.matmul %170, %172, %cst_179 {dimension_numbers = #tpu.dot_dimension_numbers<[1], [0], [0], [1], [0, 0, 1, 1], [], []>} : vector<32x128xbf16>, vector<128x96xbf16>, vector<32x96xf32> -> vector<32x96xf32>
    %174 = arith.addf %168, %173 : vector<32x96xf32>
    %175 = vector.extract_strided_slice %75 {offsets = [16, 0], sizes = [32, 128], strides = [1, 1]} : vector<48x128xf32> to vector<32x128xf32>
    %176 = arith.truncf %175 : vector<32x128xf32> to vector<32x128xbf16>
    %c4_180 = arith.constant 4 : index
    %c0_181 = arith.constant 0 : index
    %c0_182 = arith.constant 0 : index
    %177 = vector.load %arg4[%c4_180, %c0_181, %c0_182] : memref<5x128x96xbf16, #tpu.memory_space<vmem>>, vector<1x128x96xbf16>
    %178 = vector.shape_cast %177 : vector<1x128x96xbf16> to vector<128x96xbf16>
    %cst_183 = arith.constant dense<0.000000e+00> : vector<32x96xf32>
    %179 = tpu.matmul %176, %178, %cst_183 {dimension_numbers = #tpu.dot_dimension_numbers<[1], [0], [0], [1], [0, 0, 1, 1], [], []>} : vector<32x128xbf16>, vector<128x96xbf16>, vector<32x96xf32> -> vector<32x96xf32>
    %180 = arith.addf %174, %179 : vector<32x96xf32>
    %181 = vector.broadcast %1 : vector<1x96xf32> to vector<32x96xf32>
    %182 = arith.addf %180, %181 : vector<32x96xf32>
    %cst_184 = arith.constant 0.000000e+00 : f32
    %183 = vector.broadcast %cst_184 : f32 to vector<32x96xf32>
    %184 = arith.maximumf %182, %183 : vector<32x96xf32>
    %cst_185 = arith.constant 0.000000e+00 : f32
    %185 = vector.broadcast %cst_185 : f32 to vector<32x96xf32>
    %186 = vector.extract_strided_slice %149 {offsets = [0, 0], sizes = [32, 128], strides = [1, 1]} : vector<48x128xf32> to vector<32x128xf32>
    %187 = arith.truncf %186 : vector<32x128xf32> to vector<32x128xbf16>
    %c0_186 = arith.constant 0 : index
    %c0_187 = arith.constant 0 : index
    %c0_188 = arith.constant 0 : index
    %188 = vector.load %arg4[%c0_186, %c0_187, %c0_188] : memref<5x128x96xbf16, #tpu.memory_space<vmem>>, vector<1x128x96xbf16>
    %189 = vector.shape_cast %188 : vector<1x128x96xbf16> to vector<128x96xbf16>
    %cst_189 = arith.constant dense<0.000000e+00> : vector<32x96xf32>
    %190 = tpu.matmul %187, %189, %cst_189 {dimension_numbers = #tpu.dot_dimension_numbers<[1], [0], [0], [1], [0, 0, 1, 1], [], []>} : vector<32x128xbf16>, vector<128x96xbf16>, vector<32x96xf32> -> vector<32x96xf32>
    %191 = arith.addf %185, %190 : vector<32x96xf32>
    %192 = vector.extract_strided_slice %75 {offsets = [8, 0], sizes = [32, 128], strides = [1, 1]} : vector<48x128xf32> to vector<32x128xf32>
    %193 = arith.truncf %192 : vector<32x128xf32> to vector<32x128xbf16>
    %c1_190 = arith.constant 1 : index
    %c0_191 = arith.constant 0 : index
    %c0_192 = arith.constant 0 : index
    %194 = vector.load %arg4[%c1_190, %c0_191, %c0_192] : memref<5x128x96xbf16, #tpu.memory_space<vmem>>, vector<1x128x96xbf16>
    %195 = vector.shape_cast %194 : vector<1x128x96xbf16> to vector<128x96xbf16>
    %cst_193 = arith.constant dense<0.000000e+00> : vector<32x96xf32>
    %196 = tpu.matmul %193, %195, %cst_193 {dimension_numbers = #tpu.dot_dimension_numbers<[1], [0], [0], [1], [0, 0, 1, 1], [], []>} : vector<32x128xbf16>, vector<128x96xbf16>, vector<32x96xf32> -> vector<32x96xf32>
    %197 = arith.addf %191, %196 : vector<32x96xf32>
    %198 = vector.extract_strided_slice %149 {offsets = [8, 0], sizes = [32, 128], strides = [1, 1]} : vector<48x128xf32> to vector<32x128xf32>
    %199 = arith.truncf %198 : vector<32x128xf32> to vector<32x128xbf16>
    %c2_194 = arith.constant 2 : index
    %c0_195 = arith.constant 0 : index
    %c0_196 = arith.constant 0 : index
    %200 = vector.load %arg4[%c2_194, %c0_195, %c0_196] : memref<5x128x96xbf16, #tpu.memory_space<vmem>>, vector<1x128x96xbf16>
    %201 = vector.shape_cast %200 : vector<1x128x96xbf16> to vector<128x96xbf16>
    %cst_197 = arith.constant dense<0.000000e+00> : vector<32x96xf32>
    %202 = tpu.matmul %199, %201, %cst_197 {dimension_numbers = #tpu.dot_dimension_numbers<[1], [0], [0], [1], [0, 0, 1, 1], [], []>} : vector<32x128xbf16>, vector<128x96xbf16>, vector<32x96xf32> -> vector<32x96xf32>
    %203 = arith.addf %197, %202 : vector<32x96xf32>
    %204 = vector.extract_strided_slice %75 {offsets = [16, 0], sizes = [32, 128], strides = [1, 1]} : vector<48x128xf32> to vector<32x128xf32>
    %205 = arith.truncf %204 : vector<32x128xf32> to vector<32x128xbf16>
    %c3_198 = arith.constant 3 : index
    %c0_199 = arith.constant 0 : index
    %c0_200 = arith.constant 0 : index
    %206 = vector.load %arg4[%c3_198, %c0_199, %c0_200] : memref<5x128x96xbf16, #tpu.memory_space<vmem>>, vector<1x128x96xbf16>
    %207 = vector.shape_cast %206 : vector<1x128x96xbf16> to vector<128x96xbf16>
    %cst_201 = arith.constant dense<0.000000e+00> : vector<32x96xf32>
    %208 = tpu.matmul %205, %207, %cst_201 {dimension_numbers = #tpu.dot_dimension_numbers<[1], [0], [0], [1], [0, 0, 1, 1], [], []>} : vector<32x128xbf16>, vector<128x96xbf16>, vector<32x96xf32> -> vector<32x96xf32>
    %209 = arith.addf %203, %208 : vector<32x96xf32>
    %210 = vector.extract_strided_slice %149 {offsets = [16, 0], sizes = [32, 128], strides = [1, 1]} : vector<48x128xf32> to vector<32x128xf32>
    %211 = arith.truncf %210 : vector<32x128xf32> to vector<32x128xbf16>
    %c4_202 = arith.constant 4 : index
    %c0_203 = arith.constant 0 : index
    %c0_204 = arith.constant 0 : index
    %212 = vector.load %arg4[%c4_202, %c0_203, %c0_204] : memref<5x128x96xbf16, #tpu.memory_space<vmem>>, vector<1x128x96xbf16>
    %213 = vector.shape_cast %212 : vector<1x128x96xbf16> to vector<128x96xbf16>
    %cst_205 = arith.constant dense<0.000000e+00> : vector<32x96xf32>
    %214 = tpu.matmul %211, %213, %cst_205 {dimension_numbers = #tpu.dot_dimension_numbers<[1], [0], [0], [1], [0, 0, 1, 1], [], []>} : vector<32x128xbf16>, vector<128x96xbf16>, vector<32x96xf32> -> vector<32x96xf32>
    %215 = arith.addf %209, %214 : vector<32x96xf32>
    %216 = vector.broadcast %1 : vector<1x96xf32> to vector<32x96xf32>
    %217 = arith.addf %215, %216 : vector<32x96xf32>
    %cst_206 = arith.constant 0.000000e+00 : f32
    %218 = vector.broadcast %cst_206 : f32 to vector<32x96xf32>
    %219 = arith.maximumf %217, %218 : vector<32x96xf32>
    %220 = arith.maximumf %184, %219 : vector<32x96xf32>
    %221 = vector.extract_strided_slice %220 {offsets = [0, 0], sizes = [32, 48], strides = [1, 1]} : vector<32x96xf32> to vector<32x48xf32>
    %222 = vector.extract_strided_slice %220 {offsets = [0, 48], sizes = [32, 48], strides = [1, 1]} : vector<32x96xf32> to vector<32x48xf32>
    %223 = arith.maximumf %221, %222 : vector<32x48xf32>
    %c0_207 = arith.constant 0 : index
    %c0_208 = arith.constant 0 : index
    %224 = vector.load %arg7[%c0_207, %c0_208] : memref<1x128xf32, #tpu.memory_space<vmem>>, vector<1x128xf32>
    %225 = vector.extract_strided_slice %223 {offsets = [0, 0], sizes = [8, 48], strides = [1, 1]} : vector<32x48xf32> to vector<8x48xf32>
    %226 = arith.truncf %225 : vector<8x48xf32> to vector<8x48xbf16>
    %c0_209 = arith.constant 0 : index
    %c0_210 = arith.constant 0 : index
    %c0_211 = arith.constant 0 : index
    %227 = vector.load %arg6[%c0_209, %c0_210, %c0_211] : memref<4x48x128xbf16, #tpu.memory_space<vmem>>, vector<1x48x128xbf16>
    %228 = vector.shape_cast %227 : vector<1x48x128xbf16> to vector<48x128xbf16>
    %cst_212 = arith.constant dense<0.000000e+00> : vector<8x128xf32>
    %229 = tpu.matmul %226, %228, %cst_212 {dimension_numbers = #tpu.dot_dimension_numbers<[1], [0], [0], [1], [0, 0, 1, 1], [], []>} : vector<8x48xbf16>, vector<48x128xbf16>, vector<8x128xf32> -> vector<8x128xf32>
    %230 = vector.broadcast %224 : vector<1x128xf32> to vector<8x128xf32>
    %231 = arith.addf %230, %229 : vector<8x128xf32>
    %232 = vector.extract_strided_slice %223 {offsets = [8, 0], sizes = [8, 48], strides = [1, 1]} : vector<32x48xf32> to vector<8x48xf32>
    %233 = arith.truncf %232 : vector<8x48xf32> to vector<8x48xbf16>
    %c1_213 = arith.constant 1 : index
    %c0_214 = arith.constant 0 : index
    %c0_215 = arith.constant 0 : index
    %234 = vector.load %arg6[%c1_213, %c0_214, %c0_215] : memref<4x48x128xbf16, #tpu.memory_space<vmem>>, vector<1x48x128xbf16>
    %235 = vector.shape_cast %234 : vector<1x48x128xbf16> to vector<48x128xbf16>
    %cst_216 = arith.constant dense<0.000000e+00> : vector<8x128xf32>
    %236 = tpu.matmul %233, %235, %cst_216 {dimension_numbers = #tpu.dot_dimension_numbers<[1], [0], [0], [1], [0, 0, 1, 1], [], []>} : vector<8x48xbf16>, vector<48x128xbf16>, vector<8x128xf32> -> vector<8x128xf32>
    %237 = arith.addf %231, %236 : vector<8x128xf32>
    %238 = vector.extract_strided_slice %223 {offsets = [16, 0], sizes = [8, 48], strides = [1, 1]} : vector<32x48xf32> to vector<8x48xf32>
    %239 = arith.truncf %238 : vector<8x48xf32> to vector<8x48xbf16>
    %c2_217 = arith.constant 2 : index
    %c0_218 = arith.constant 0 : index
    %c0_219 = arith.constant 0 : index
    %240 = vector.load %arg6[%c2_217, %c0_218, %c0_219] : memref<4x48x128xbf16, #tpu.memory_space<vmem>>, vector<1x48x128xbf16>
    %241 = vector.shape_cast %240 : vector<1x48x128xbf16> to vector<48x128xbf16>
    %cst_220 = arith.constant dense<0.000000e+00> : vector<8x128xf32>
    %242 = tpu.matmul %239, %241, %cst_220 {dimension_numbers = #tpu.dot_dimension_numbers<[1], [0], [0], [1], [0, 0, 1, 1], [], []>} : vector<8x48xbf16>, vector<48x128xbf16>, vector<8x128xf32> -> vector<8x128xf32>
    %243 = arith.addf %237, %242 : vector<8x128xf32>
    %244 = vector.extract_strided_slice %223 {offsets = [24, 0], sizes = [8, 48], strides = [1, 1]} : vector<32x48xf32> to vector<8x48xf32>
    %245 = arith.truncf %244 : vector<8x48xf32> to vector<8x48xbf16>
    %c3_221 = arith.constant 3 : index
    %c0_222 = arith.constant 0 : index
    %c0_223 = arith.constant 0 : index
    %246 = vector.load %arg6[%c3_221, %c0_222, %c0_223] : memref<4x48x128xbf16, #tpu.memory_space<vmem>>, vector<1x48x128xbf16>
    %247 = vector.shape_cast %246 : vector<1x48x128xbf16> to vector<48x128xbf16>
    %cst_224 = arith.constant dense<0.000000e+00> : vector<8x128xf32>
    %248 = tpu.matmul %245, %247, %cst_224 {dimension_numbers = #tpu.dot_dimension_numbers<[1], [0], [0], [1], [0, 0, 1, 1], [], []>} : vector<8x48xbf16>, vector<48x128xbf16>, vector<8x128xf32> -> vector<8x128xf32>
    %249 = arith.addf %243, %248 : vector<8x128xf32>
    %cst_225 = arith.constant 0.000000e+00 : f32
    %250 = vector.broadcast %cst_225 : f32 to vector<8x128xf32>
    %251 = arith.maximumf %249, %250 : vector<8x128xf32>
    %252 = arith.truncf %251 : vector<8x128xf32> to vector<8x128xbf16>
    %c0_226 = arith.constant 0 : index
    %c0_227 = arith.constant 0 : index
    %253 = vector.load %arg8[%c0_226, %c0_227] : memref<128x128xbf16, #tpu.memory_space<vmem>>, vector<128x128xbf16>
    %cst_228 = arith.constant dense<0.000000e+00> : vector<8x128xf32>
    %254 = tpu.matmul %252, %253, %cst_228 {dimension_numbers = #tpu.dot_dimension_numbers<[1], [0], [0], [1], [0, 0, 1, 1], [], []>} : vector<8x128xbf16>, vector<128x128xbf16>, vector<8x128xf32> -> vector<8x128xf32>
    %c0_229 = arith.constant 0 : index
    %c0_230 = arith.constant 0 : index
    %255 = vector.load %arg9[%c0_229, %c0_230] : memref<1x128xf32, #tpu.memory_space<vmem>>, vector<1x128xf32>
    %256 = vector.broadcast %255 : vector<1x128xf32> to vector<8x128xf32>
    %257 = arith.addf %254, %256 : vector<8x128xf32>
    %cst_231 = arith.constant 0.000000e+00 : f32
    %258 = vector.broadcast %cst_231 : f32 to vector<8x128xf32>
    %259 = arith.maximumf %257, %258 : vector<8x128xf32>
    %260 = arith.truncf %259 : vector<8x128xf32> to vector<8x128xbf16>
    %c0_232 = arith.constant 0 : index
    %c0_233 = arith.constant 0 : index
    %261 = vector.load %arg10[%c0_232, %c0_233] : memref<128x128xbf16, #tpu.memory_space<vmem>>, vector<128x128xbf16>
    %cst_234 = arith.constant dense<0.000000e+00> : vector<8x128xf32>
    %262 = tpu.matmul %260, %261, %cst_234 {dimension_numbers = #tpu.dot_dimension_numbers<[1], [0], [0], [1], [0, 0, 1, 1], [], []>} : vector<8x128xbf16>, vector<128x128xbf16>, vector<8x128xf32> -> vector<8x128xf32>
    %c0_235 = arith.constant 0 : index
    %c0_236 = arith.constant 0 : index
    %263 = vector.load %arg11[%c0_235, %c0_236] : memref<1x128xf32, #tpu.memory_space<vmem>>, vector<1x128xf32>
    %264 = vector.broadcast %263 : vector<1x128xf32> to vector<8x128xf32>
    %265 = arith.addf %262, %264 : vector<8x128xf32>
    %c0_237 = arith.constant 0 : index
    %c0_238 = arith.constant 0 : index
    %266 = vector.load %arg12[%c0_237, %c0_238] : memref<8x128xf32, #tpu.memory_space<vmem>>, vector<8x128xf32>
    tpu.vector_store %arg12[%c0_237, %c0_238], %265 {strides = array<i32>} : memref<8x128xf32, #tpu.memory_space<vmem>>, vector<8x128xf32>,
    return
  }
  func.func @transform_0(%arg0: i32) -> (i32, i32, i32, i32) {
    %c0_i32 = arith.constant 0 : i32
    %c0_i32_0 = arith.constant 0 : i32
    %c0_i32_1 = arith.constant 0 : i32
    %c0_i32_2 = arith.constant 0 : i32
    return %arg0, %c0_i32, %c0_i32_0, %c0_i32_1 : i32, i32, i32, i32
  }
  func.func @transform_1(%arg0: i32) -> (i32, i32, i32) {
    %c0_i32 = arith.constant 0 : i32
    %c0_i32_0 = arith.constant 0 : i32
    %c0_i32_1 = arith.constant 0 : i32
    %c0_i32_2 = arith.constant 0 : i32
    return %c0_i32, %c0_i32_0, %c0_i32_1 : i32, i32, i32
  }
  func.func @transform_2(%arg0: i32) -> (i32, i32) {
    %c0_i32 = arith.constant 0 : i32
    %c0_i32_0 = arith.constant 0 : i32
    %c0_i32_1 = arith.constant 0 : i32
    return %c0_i32, %c0_i32_0 : i32, i32
  }
  func.func @transform_3(%arg0: i32) -> (i32, i32, i32) {
    %c0_i32 = arith.constant 0 : i32
    %c0_i32_0 = arith.constant 0 : i32
    %c0_i32_1 = arith.constant 0 : i32
    %c0_i32_2 = arith.constant 0 : i32
    return %c0_i32, %c0_i32_0, %c0_i32_1 : i32, i32, i32
  }
  func.func @transform_4(%arg0: i32) -> (i32, i32) {
    %c0_i32 = arith.constant 0 : i32
    %c0_i32_0 = arith.constant 0 : i32
    %c0_i32_1 = arith.constant 0 : i32
    return %c0_i32, %c0_i32_0 : i32, i32
  }
  func.func @transform_5(%arg0: i32) -> (i32, i32, i32) {
    %c0_i32 = arith.constant 0 : i32
    %c0_i32_0 = arith.constant 0 : i32
    %c0_i32_1 = arith.constant 0 : i32
    %c0_i32_2 = arith.constant 0 : i32
    return %c0_i32, %c0_i32_0, %c0_i32_1 : i32, i32, i32
  }
  func.func @transform_6(%arg0: i32) -> (i32, i32) {
    %c0_i32 = arith.constant 0 : i32
    %c0_i32_0 = arith.constant 0 : i32
    %c0_i32_1 = arith.constant 0 : i32
    return %c0_i32, %c0_i32_0 : i32, i32
  }
  func.func @transform_7(%arg0: i32) -> (i32, i32) {
    %c0_i32 = arith.constant 0 : i32
    %c0_i32_0 = arith.constant 0 : i32
    %c0_i32_1 = arith.constant 0 : i32
    return %c0_i32, %c0_i32_0 : i32, i32
  }
  func.func @transform_8(%arg0: i32) -> (i32, i32) {
    %c0_i32 = arith.constant 0 : i32
    %c0_i32_0 = arith.constant 0 : i32
    %c0_i32_1 = arith.constant 0 : i32
    return %c0_i32, %c0_i32_0 : i32, i32
  }
  func.func @transform_9(%arg0: i32) -> (i32, i32) {
    %c0_i32 = arith.constant 0 : i32
    %c0_i32_0 = arith.constant 0 : i32
    %c0_i32_1 = arith.constant 0 : i32
    return %c0_i32, %c0_i32_0 : i32, i32
  }
  func.func @transform_10(%arg0: i32) -> (i32, i32) {
    %c0_i32 = arith.constant 0 : i32
    %c0_i32_0 = arith.constant 0 : i32
    %c0_i32_1 = arith.constant 0 : i32
    return %c0_i32, %c0_i32_0 : i32, i32
  }
  func.func @transform_11(%arg0: i32) -> (i32, i32) {
    %c0_i32 = arith.constant 0 : i32
    %c0_i32_0 = arith.constant 0 : i32
    return %arg0, %c0_i32 : i32, i32
  }
}

</mosaic_0001>

<bundles_post_ra>
// kernel: tpu_custom_call.1
= control target key start
LH: loop header
LB: loop body
LE: loop exit
PB: predicated region body
PF: predicated region fallthrough
CT: control target
= control target key end

     0   :  { %16 = vsyncpa [#allocation3], 0  ;;  %s6209_s0 = inlined_call_operand.vmem [shape: bf16[2,8,48,28], index: 0, kind: input, shape index: {}]   ;;  %s6210_s1 = inlined_call_operand.vmem [shape: bf16[5,28,256], index: 1, kind: input, shape index: {}]   ;;  %s6211_s2 = inlined_call_operand.vmem [shape: f32[1,256], index: 2, kind: input, shape index: {}]   ;;  %s6212_s3 = inlined_call_operand.vmem [shape: bf16[5,128,96], index: 3, kind: input, shape index: {}]   ;;  %s6213_s4 = inlined_call_operand.vmem [shape: f32[1,96], index: 4, kind: input, shape index: {}]   ;;  %s6214_s5 = inlined_call_operand.vmem [shape: bf16[4,48,128], index: 5, kind: input, shape index: {}]   ;;  %s6215_s6 = inlined_call_operand.vmem [shape: f32[1,128], index: 6, kind: input, shape index: {}]   ;;  %s6216_s7 = inlined_call_operand.vmem [shape: bf16[128,128], index: 7, kind: input, shape index: {}]   ;;  %s6217_s8 = inlined_call_operand.vmem [shape: f32[1,128], index: 8, kind: input, shape index: {}]   ;;  %s6218_s9 = inlined_call_operand.vmem [shape: bf16[128,128], index: 9, kind: input, shape index: {}]   ;;  %s6219_s10 = inlined_call_operand.vmem [shape: f32[1,128], index: 10, kind: input, shape index: {}]   ;;  %s6220_s11 = inlined_call_operand.hbm [shape: f32[16,128], index: 11, kind: output, shape index: {}]  }
   0x1   :  { %18 = vsyncpa [#allocation3 + $0x1], 0  ;;  %s4878_s17 = smov 0   ;;  %s4880_s18 = smov 0  }
   0x2   :  { %s4882_s19 = smov 0   ;;  %s4884_s20 = smov 0  }
   0x3 LB: > { %s4899_s21 = sadd.s32 4294967295, %s4811_s20   ;;  %s3809_s22 = sadd.s32 4294967294, %s4811_s20   ;;  %s4811_s20 = sphi %s4884_s20, %s6322_s20   ;;  %s4807_s19 = sphi %s4882_s19, %s6321_s19   ;;  %s4803_s18 = sphi %s4880_s18, %s6320_s18   ;;  %s4799_s17 = sphi %s4878_s17, %s6319_s17  }
   0x4   : > { %s4903_s23 = sadd.s32 1, %s4811_s20   ;;  %s267_s24 = sadd.s32 1, %s4807_s19 }
   0x5   : > { %s264_s25 = ssub.s32 %s4811_s20, %s4903_s23  ;;  %p277_p0 = scmp.ne.s32.totalorder %s4807_s19, %s4803_s18 }
   0x6   : > { %p265_p1 = scmp.eq.s32.totalorder %s264_s25, 0  ;;  %p278_p2 = scmp.eq.s32.totalorder %s4899_s21, 1 }
   0x7   : > { %p283_p3 = scmp.ne.s32.totalorder %s4803_s18, %s4799_s17  ;;  %p284_p4 = scmp.eq.s32.totalorder %s3809_s22, 1 }
   0x8   : > { %s4914_s26 = scalar_select %p265_p1, %s4807_s19, %s267_s24  }
   0x9   : > { %p4916_p5 = por %p278_p2, %p277_p0  ;;  %p4920_p6 = por %p284_p4, %p283_p3 }
   0xa   : > { %6255 = sst [smem:[#allocation5_spill]] %s4914_s26  ;;  %p3812_p7 = scmp.ge.s32.totalorder %s4811_s20, 1 }
   0xb   : > { %p340_p8 = scmp.lt.s32.totalorder %s4811_s20, 3 }
   0xd   : > { %p341_p9 = pnand %p3812_p7, %p340_p8 }
   0xf   : > { %344 = sbr.rel (%p341_p9) target bundleno = 1542 (0x606), region = 64 }
  0x14   : > { %v4929_v0 = vld [vmem:[%s6210_s1 + $0x34] ss:$8 sps:$4 sm:$0x3f]   ;;  %vm453_vm0 = vcmask 1045504   ;;  %v4813_v3 = vmov 0   ;;  %p380_p10 = scmp.lt.s32.totalorder %s4899_s21, 1 }
  0x15   : > { %3832 = vmatprep.subr.msk.bf16.mxu0 %vm453_vm0, %v4929_v0  ;;  %v4936_v1 = vld [vmem:[%s6210_s1 + $0x14] ss:$8 sps:$4 sm:$0x3f]   ;;  %v4621_v2 = vld [vmem:[%s6210_s1 + $0x30] ss:$8 sps:$4 sm:$0x3f]   ;;  %492 = vmatprep.mubr.bf16.mxu0 %v4813_v3 }
  0x16   : > { %v4622_v4 = vld [vmem:[%s6210_s1 + $0x10] ss:$8 sps:$4 sm:$0x3f]   ;;  %v4948_v5 = vld [vmem:[%s6210_s1 + $0x24] ss:$8 sps:$4 sm:$0xff]   ;;  %603 = vmatprep.mubr.bf16.mxu1 %v4813_v3  ;;  %3843 = vmatprep.subr.msk.bf16.mxu1 %vm453_vm0, %v4936_v1  ;;  %v4954_v6 = vsel %vm453_vm0, %v4621_v2, 0 }
  0x17   : > { %v4959_v7 = vld [vmem:[%s6210_s1 + $0x4] ss:$8 sps:$4 sm:$0xff]   ;;  %473 = vmatpush1.bf16.msra.mxu0 %v4954_v6  ;;  %v4964_v8 = vsel %vm453_vm0, %v4622_v4, 0  ;;  %v4969_v9 = vld [vmem:[%s6210_s1 + $0x20] ss:$8 sps:$4 sm:$0xff]   ;;  %s381_s16 = scalar_select %p380_p10, %s4899_s21, 1 }
  0x18   : > { %v4974_v10 = vld [vmem:[%s6210_s1] ss:$8 sps:$4 sm:$0xff]   ;;  %584 = vmatpush1.bf16.msra.mxu1 %v4964_v8  ;;  %474 = vmatprep.subr.bf16.mxu0 %v4948_v5  ;;  %v4983_v11 = vld [vmem:[%s6210_s1 + $0x54] ss:$8 sps:$4 sm:$0x3f]   ;;  %vm443_vm1 = vcmask 228352  }
  0x19   : > { %585 = vmatprep.subr.bf16.mxu1 %v4959_v7  ;;  %v4633_v12 = vld [vmem:[%s6210_s1 + $0x50] ss:$8 sps:$4 sm:$0x3f]   ;;  %s4573_s30 = smul.u32 192, %s381_s16  ;;  %v5008_v15 = vld [vmem:[%s6210_s1 + $0x44] ss:$8 sps:$4 sm:$0xff]  }
  0x1a   : > { %v4991_v13 = vld [vmem:[%s6210_s1 + $0x74] ss:$8 sps:$4 sm:$0x3f]   ;;  %v4636_v14 = vld [vmem:[%s6210_s1 + $0x70] ss:$8 sps:$4 sm:$0x3f]  }
  0x1b   : > { %475 = vmatpush1.bf16.msra.mxu0 %v4969_v9  ;;  %s5001_s26 = scalar_lea.vmem %s6209_s0, %s4573_s30  ;;  %v5014_v17 = vsel %vm453_vm0, %v4633_v12, 0  ;;  %v5020_v19 = vsel %vm453_vm0, %v4636_v14, 0  ;;  %v5029_v20 = vld [vmem:[%s6210_s1 + $0x40] ss:$8 sps:$4 sm:$0xff]   ;;  %v5036_v21 = vld [vmem:[%s6210_s1 + $0x64] ss:$8 sps:$4 sm:$0xff]  }
  0x1c   : > { %586 = vmatpush1.bf16.msra.mxu1 %v4974_v10  ;;  %3864 = vmatprep.subr.msk.bf16.mxu0 %vm453_vm0, %v4983_v11  ;;  %v5011_v16 = vld [vmem:[%s5001_s26 + $0x18] sm:$0xff]   ;;  %v4630_v18 = vld [vmem:[%s5001_s26] sm:$0xff]   ;;  %v4638_v24 = vld [vmem:[%s5001_s26 + $0x8] sm:$0xff]   ;;  %vm4815_vm2 = vmmov 0   ;;  %s4816_s14 = smov 80   ;;  %vm3248_vm3 = vcmask 392192  }
  0x1d   : > { %3885 = vmatprep.subr.msk.bf16.mxu1 %vm453_vm0, %v4991_v13  ;;  %v5041_v22 = vld [vmem:[%s6210_s1 + $0x60] ss:$8 sps:$4 sm:$0xff]   ;;  %v5055_v25 = vld [vmem:[%s6210_s1 + $0x94] ss:$8 sps:$4 sm:$0x3f]   ;;  %s377_s16 = sand.u32 1, %s4803_s18  }
  0x1e   : > { %3833 = vmatmul.mubr.msk.bf16.vlgmr.msra.gmra.mxu0 %vm443_vm1, %v5011_v16  ;;  %v5046_v23 = vld [vmem:[%s5001_s26 + $0x20] sm:$0xff]   ;;  %v5067_v26 = vld [vmem:[%s5001_s26 + $0x28] sm:$0xff]   ;;  %v4646_v27 = vld [vmem:[%s5001_s26 + $0x10] sm:$0xff]   ;;  %s3813_s25 = sshll.u32 %s377_s16, 3  ;;  %s4156_s12 = sshll.u32 %s4899_s21, 7 }
  0x1f   : > { %3844 = vmatmul.mubr.msk.bf16.vlgmr.msra.gmra.mxu1 %vm443_vm1, %v4630_v18  ;;  %707 = vmatpush1.bf16.msra.mxu0 %v5014_v17  ;;  %v4651_v28 = vld [vmem:[%s6210_s1 + $0x90] ss:$8 sps:$4 sm:$0x3f]   ;;  %v5082_v30 = vld [vmem:[%s5001_s26 + $0x48] sm:$0xff]   ;;  %v5126_v36 = vld [vmem:[%s5001_s26 + $0x40] sm:$0xff]   ;;  %s379_s13 = scalar_lea.vmem [#allocation2], %s3813_s25  ;;  %s6168_s22 = scalar_lea.hbm %s6220_s11, %s4156_s12 }
  0x20   : > { %842 = vmatpush1.bf16.msra.mxu1 %v5020_v19  ;;  %502 = vmatprep.mubr.bf16.mxu0 %v4813_v3  ;;  %v5079_v29 = vld [vmem:[%s5001_s26 + $0x30] sm:$0xff]   ;;  %v5085_v31 = vsel %vm453_vm0, %v4651_v28, 0  ;;  %v5090_v32 = vld [vmem:[%s6210_s1 + $0x84] ss:$8 sps:$4 sm:$0xff]   ;;  %v5095_v33 = vld [vmem:[%s6210_s1 + $0x80] ss:$8 sps:$4 sm:$0xff]  }
  0x21   : > { %613 = vmatprep.mubr.bf16.mxu1 %v4813_v3  ;;  %708 = vmatprep.subr.bf16.mxu0 %v5008_v15  ;;  %v5105_v34 = vld [vmem:[%s5001_s26 + $0x38] sm:$0xff]   ;;  %v5109_v35 = vld [vmem:[%s5001_s26 + $0x50] sm:$0xff]   ;;  %v5138_v38 = vld [vmem:[%s5001_s26 + $0x60] sm:$0xff]   ;;  %s3737_s24 = scalar_lea.sflag [#allocation3], %s377_s16  ;;  %s4817_s21 = smov [#allocation2]  }
  0x22   : > { %843 = vmatprep.subr.bf16.mxu1 %v5036_v21  ;;  %v5129_v37 = vld [vmem:[%s5001_s26 + $0x58] sm:$0xff]   ;;  %v5148_v39 = vld [vmem:[%s5001_s26 + $0x68] sm:$0xff]   ;;  %v5166_v40 = vld [vmem:[%s5001_s26 + $0x70] sm:$0xff]   ;;  %s4755_s25 = sshll.u32 %s4817_s21, 4  ;;  %s4756_s25 = int_to_ptr.vmem [resolvable:$false] %s4755_s25 }
  0x23   : > { %709 = vmatpush1.bf16.msra.mxu0 %v5029_v20  ;;  %v5203_v41 = vld [vmem:[%s5001_s26 + $0x78] sm:$0xff]   ;;  %v5216_v42 = vld [vmem:[%s5001_s26 + $0x80] sm:$0xff]   ;;  %v5231_v43 = vld [vmem:[%s5001_s26 + $0x88] sm:$0xff]   ;;  %s4757_s30 = scalar_lea.vmem %s4756_s25, 256 }
  0x24   : > { %844 = vmatpush1.bf16.msra.mxu1 %v5041_v22  ;;  %3906 = vmatprep.subr.msk.bf16.mxu0 %vm453_vm0, %v5055_v25  ;;  %v5296_v44 = vld [vmem:[%s5001_s26 + $0x90] sm:$0xff]   ;;  %v5308_v45 = vld [vmem:[%s5001_s26 + $0x98] sm:$0xff]   ;;  %v5324_v46 = vld [vmem:[%s5001_s26 + $0xa0] sm:$0xff]  }
  0x25   : > { %3910 = vmatprep.subr.msk.bf16.mxu1 %vm453_vm0, %v4929_v0  ;;  %v4671_v52 = vld [vmem:[%s6212_s3 + $0x38] sm:$0xff]  }
  0x26   : > { %3834 = vmatmul.mubr.msk.bf16.gmra.mxu0 %vm443_vm1, %v5046_v23 }
  0x27   : > { %3845 = vmatmul.mubr.msk.bf16.gmra.mxu1 %vm443_vm1, %v4638_v24  ;;  %512 = vmatprep.mubr.bf16.mxu0 %v4813_v3 }
  0x28   : > { %623 = vmatprep.mubr.bf16.mxu1 %v4813_v3 }
  0x2e   : > { %3835 = vmatmul.mubr.msk.bf16.gmra.mxu0 %vm443_vm1, %v5067_v26 }
  0x2f   : > { %3846 = vmatmul.mubr.msk.bf16.gmra.mxu1 %vm443_vm1, %v4646_v27  ;;  %726 = vmatprep.mubr.bf16.mxu0 %v4813_v3 }
  0x30   : > { %861 = vmatprep.mubr.bf16.mxu1 %v4813_v3 }
  0x36   : > { %3865 = vmatmul.mubr.msk.bf16.vlgmr.msra.gmra.mxu0 %vm443_vm1, %v5079_v29 }
  0x37   : > { %3886 = vmatmul.mubr.msk.bf16.vlgmr.msra.gmra.mxu1 %vm443_vm1, %v5082_v30  ;;  %977 = vmatpush1.bf16.msra.mxu0 %v5085_v31 }
  0x38   : > { %1087 = vmatpush1.bf16.msra.mxu1 %v4954_v6  ;;  %736 = vmatprep.mubr.bf16.mxu0 %v4813_v3 }
  0x39   : > { %871 = vmatprep.mubr.bf16.mxu1 %v4813_v3  ;;  %978 = vmatprep.subr.bf16.mxu0 %v5090_v32 }
  0x3a   : > { %1088 = vmatprep.subr.bf16.mxu1 %v4948_v5 }
  0x3b   : > { %979 = vmatpush1.bf16.msra.mxu0 %v5095_v33 }
  0x3c   : > { %1089 = vmatpush1.bf16.msra.mxu1 %v4969_v9  ;;  %3914 = vmatprep.subr.msk.bf16.mxu0 %vm453_vm0, %v4936_v1 }
  0x3d   : > { %3918 = vmatprep.subr.msk.bf16.mxu1 %vm453_vm0, %v4983_v11 }
  0x3e   : > { %3866 = vmatmul.mubr.msk.bf16.gmra.mxu0 %vm443_vm1, %v5105_v34 }
  0x3f   : > { %3887 = vmatmul.mubr.msk.bf16.gmra.mxu1 %vm443_vm1, %v5109_v35  ;;  %746 = vmatprep.mubr.bf16.mxu0 %v4813_v3 }
  0x40   : > { %881 = vmatprep.mubr.bf16.mxu1 %v4813_v3 }
  0x46   : > { %3867 = vmatmul.mubr.msk.bf16.gmra.mxu0 %vm443_vm1, %v5126_v36 }
  0x47   : > { %3888 = vmatmul.mubr.msk.bf16.gmra.mxu1 %vm443_vm1, %v5129_v37  ;;  %996 = vmatprep.mubr.bf16.mxu0 %v4813_v3 }
  0x48   : > { %1106 = vmatprep.mubr.bf16.mxu1 %v4813_v3 }
  0x4e   : > { %3907 = vmatmul.mubr.msk.bf16.vlgmr.msra.gmra.mxu0 %vm443_vm1, %v5138_v38 }
  0x4f   : > { %3911 = vmatmul.mubr.msk.bf16.vlgmr.msra.gmra.mxu1 %vm443_vm1, %v5079_v29  ;;  %1150 = vmatpush1.bf16.msra.mxu0 %v4964_v8 }
  0x50   : > { %1213 = vmatpush1.bf16.msra.mxu1 %v5014_v17  ;;  %1006 = vmatprep.mubr.bf16.mxu0 %v4813_v3 }
  0x51   : > { %1116 = vmatprep.mubr.bf16.mxu1 %v4813_v3  ;;  %1151 = vmatprep.subr.bf16.mxu0 %v4959_v7 }
  0x52   : > { %1214 = vmatprep.subr.bf16.mxu1 %v5008_v15 }
  0x53   : > { %1152 = vmatpush1.bf16.msra.mxu0 %v4974_v10 }
  0x54   : > { %1215 = vmatpush1.bf16.msra.mxu1 %v5029_v20  ;;  %3922 = vmatprep.subr.msk.bf16.mxu0 %vm453_vm0, %v4991_v13 }
  0x55   : > { %3935 = vmatprep.subr.msk.bf16.mxu1 %vm453_vm0, %v5055_v25 }
  0x56   : > { %3908 = vmatmul.mubr.msk.bf16.gmra.mxu0 %vm443_vm1, %v5148_v39 }
  0x57   : > { %3912 = vmatmul.mubr.msk.bf16.gmra.mxu1 %vm443_vm1, %v5105_v34  ;;  %1016 = vmatprep.mubr.bf16.mxu0 %v4813_v3 }
  0x58   : > { %1126 = vmatprep.mubr.bf16.mxu1 %v4813_v3 }
  0x5e   : > { %3909 = vmatmul.mubr.msk.bf16.gmra.mxu0 %vm443_vm1, %v5166_v40 }
  0x5f   : > { %3913 = vmatmul.mubr.msk.bf16.gmra.mxu1 %vm443_vm1, %v5126_v36  ;;  %1169 = vmatprep.mubr.bf16.mxu0 %v4813_v3 }
  0x60   : > { %1232 = vmatprep.mubr.bf16.mxu1 %v4813_v3 }
  0x66   : > { %3915 = vmatmul.mubr.msk.bf16.vlgmr.msra.gmra.mxu0 %vm443_vm1, %v5011_v16 }
  0x67   : > { %3919 = vmatmul.mubr.msk.bf16.vlgmr.msra.gmra.mxu1 %vm443_vm1, %v5082_v30  ;;  %1288 = vmatpush1.bf16.msra.mxu0 %v5020_v19 }
  0x68   : > { %1394 = vmatpush1.bf16.msra.mxu1 %v5085_v31  ;;  %1179 = vmatprep.mubr.bf16.mxu0 %v4813_v3 }
  0x69   : > { %1242 = vmatprep.mubr.bf16.mxu1 %v4813_v3  ;;  %1289 = vmatprep.subr.bf16.mxu0 %v5036_v21 }
  0x6a   : > { %1395 = vmatprep.subr.bf16.mxu1 %v5090_v32 }
  0x6b   : > { %1290 = vmatpush1.bf16.msra.mxu0 %v5041_v22 }
  0x6c   : > { %1396 = vmatpush1.bf16.msra.mxu1 %v5095_v33  ;;  %3939 = vmatprep.subr.msk.bf16.mxu0 %vm453_vm0, %v4929_v0 }
  0x6d   : > { %3943 = vmatprep.subr.msk.bf16.mxu1 %vm453_vm0, %v4936_v1 }
  0x6e   : > { %3916 = vmatmul.mubr.msk.bf16.gmra.mxu0 %vm443_vm1, %v5046_v23 }
  0x6f   : > { %3920 = vmatmul.mubr.msk.bf16.gmra.mxu1 %vm443_vm1, %v5109_v35  ;;  %1189 = vmatprep.mubr.bf16.mxu0 %v4813_v3 }
  0x70   : > { %1252 = vmatprep.mubr.bf16.mxu1 %v4813_v3 }
  0x76   : > { %3917 = vmatmul.mubr.msk.bf16.gmra.mxu0 %vm443_vm1, %v5067_v26 }
  0x77   : > { %3921 = vmatmul.mubr.msk.bf16.gmra.mxu1 %vm443_vm1, %v5129_v37  ;;  %1307 = vmatprep.mubr.bf16.mxu0 %v4813_v3 }
  0x78   : > { %1413 = vmatprep.mubr.bf16.mxu1 %v4813_v3 }
  0x7e   : > { %3923 = vmatmul.mubr.msk.bf16.vlgmr.msra.gmra.mxu0 %vm443_vm1, %v5138_v38 }
  0x7f   : > { %3936 = vmatmul.mubr.msk.bf16.vlgmr.msra.gmra.mxu1 %vm443_vm1, %v5203_v41  ;;  %1511 = vmatpush1.bf16.msra.mxu0 %v4954_v6 }
  0x80   : > { %1574 = vmatpush1.bf16.msra.mxu1 %v4964_v8  ;;  %1317 = vmatprep.mubr.bf16.mxu0 %v4813_v3 }
  0x81   : > { %1423 = vmatprep.mubr.bf16.mxu1 %v4813_v3  ;;  %1512 = vmatprep.subr.bf16.mxu0 %v4948_v5 }
  0x82   : > { %1575 = vmatprep.subr.bf16.mxu1 %v4959_v7 }
  0x83   : > { %1513 = vmatpush1.bf16.msra.mxu0 %v4969_v9 }
  0x84   : > { %1576 = vmatpush1.bf16.msra.mxu1 %v4974_v10  ;;  %3947 = vmatprep.subr.msk.bf16.mxu0 %vm453_vm0, %v4983_v11 }
  0x85   : > { %3951 = vmatprep.subr.msk.bf16.mxu1 %vm453_vm0, %v4991_v13 }
  0x86   : > { %3924 = vmatmul.mubr.msk.bf16.gmra.mxu0 %vm443_vm1, %v5148_v39 }
  0x87   : > { %3937 = vmatmul.mubr.msk.bf16.gmra.mxu1 %vm443_vm1, %v5216_v42  ;;  %1327 = vmatprep.mubr.bf16.mxu0 %v4813_v3 }
  0x88   : > { %1433 = vmatprep.mubr.bf16.mxu1 %v4813_v3 }
  0x8e   : > { %3925 = vmatmul.mubr.msk.bf16.gmra.mxu0 %vm443_vm1, %v5166_v40 }
  0x8f   : > { %3938 = vmatmul.mubr.msk.bf16.gmra.mxu1 %vm443_vm1, %v5231_v43  ;;  %1530 = vmatprep.mubr.bf16.mxu0 %v4813_v3 }
  0x90   : > { %1593 = vmatprep.mubr.bf16.mxu1 %v4813_v3 }
  0x96   : > { %3940 = vmatmul.mubr.msk.bf16.vlgmr.msra.gmra.mxu0 %vm443_vm1, %v5082_v30 }
  0x97   : > { %3944 = vmatmul.mubr.msk.bf16.vlgmr.msra.gmra.mxu1 %vm443_vm1, %v5079_v29  ;;  %1637 = vmatpush1.bf16.msra.mxu0 %v5014_v17  ;;  %v4673_v29 = vld [vmem:[%s6212_s3 + $0x28] sm:$0xff]  }
  0x98   : > { %1712 = vmatpush1.bf16.msra.mxu1 %v5020_v19  ;;  %1540 = vmatprep.mubr.bf16.mxu0 %v4813_v3 }
  0x99   : > { %1603 = vmatprep.mubr.bf16.mxu1 %v4813_v3  ;;  %1638 = vmatprep.subr.bf16.mxu0 %v5008_v15 }
  0x9a   : > { %1713 = vmatprep.subr.bf16.mxu1 %v5036_v21 }
  0x9b   : > { %1639 = vmatpush1.bf16.msra.mxu0 %v5029_v20 }
  0x9c   : > { %1714 = vmatpush1.bf16.msra.mxu1 %v5041_v22  ;;  %3964 = vmatprep.subr.msk.bf16.mxu0 %vm453_vm0, %v5055_v25 }
  0x9d   : > { %3968 = vmatprep.subr.msk.bf16.mxu1 %vm453_vm0, %v4929_v0 }
  0x9e   : > { %3941 = vmatmul.mubr.msk.bf16.gmra.mxu0 %vm443_vm1, %v5109_v35 }
  0x9f   : > { %3945 = vmatmul.mubr.msk.bf16.gmra.mxu1 %vm443_vm1, %v5105_v34  ;;  %1550 = vmatprep.mubr.bf16.mxu0 %v4813_v3  ;;  %v4669_v34 = vld [vmem:[%s5001_s26 + $0xb0] sm:$0xff]  }
  0xa0   : > { %1613 = vmatprep.mubr.bf16.mxu1 %v4813_v3 }
  0xa6   : > { %3942 = vmatmul.mubr.msk.bf16.gmra.mxu0 %vm443_vm1, %v5129_v37 }
  0xa7   : > { %3946 = vmatmul.mubr.msk.bf16.gmra.mxu1 %vm443_vm1, %v5126_v36  ;;  %1656 = vmatprep.mubr.bf16.mxu0 %v4813_v3 }
  0xa8   : > { %1731 = vmatprep.mubr.bf16.mxu1 %v4813_v3 }
  0xae   : > { %3948 = vmatmul.mubr.msk.bf16.vlgmr.msra.gmra.mxu0 %vm443_vm1, %v5138_v38 }
  0xaf   : > { %3952 = vmatmul.mubr.msk.bf16.vlgmr.msra.gmra.mxu1 %vm443_vm1, %v5203_v41  ;;  %1818 = vmatpush1.bf16.msra.mxu0 %v5085_v31 }
  0xb0   : > { %1917 = vmatpush1.bf16.msra.mxu1 %v4954_v6  ;;  %1666 = vmatprep.mubr.bf16.mxu0 %v4813_v3 }
  0xb1   : > { %1741 = vmatprep.mubr.bf16.mxu1 %v4813_v3  ;;  %1819 = vmatprep.subr.bf16.mxu0 %v5090_v32 }
  0xb2   : > { %1918 = vmatprep.subr.bf16.mxu1 %v4948_v5 }
  0xb3   : > { %1820 = vmatpush1.bf16.msra.mxu0 %v5095_v33 }
  0xb4   : > { %1919 = vmatpush1.bf16.msra.mxu1 %v4969_v9  ;;  %3972 = vmatprep.subr.msk.bf16.mxu0 %vm453_vm0, %v4936_v1 }
  0xb5   : > { %3976 = vmatprep.subr.msk.bf16.mxu1 %vm453_vm0, %v4983_v11 }
  0xb6   : > { %3949 = vmatmul.mubr.msk.bf16.gmra.mxu0 %vm443_vm1, %v5148_v39 }
  0xb7   : > { %3953 = vmatmul.mubr.msk.bf16.gmra.mxu1 %vm443_vm1, %v5216_v42  ;;  %1676 = vmatprep.mubr.bf16.mxu0 %v4813_v3 }
  0xb8   : > { %1751 = vmatprep.mubr.bf16.mxu1 %v4813_v3 }
  0xbe   : > { %3950 = vmatmul.mubr.msk.bf16.gmra.mxu0 %vm443_vm1, %v5166_v40 }
  0xbf   : > { %3954 = vmatmul.mubr.msk.bf16.gmra.mxu1 %vm443_vm1, %v5231_v43  ;;  %1837 = vmatprep.mubr.bf16.mxu0 %v4813_v3 }
  0xc0   : > { %1936 = vmatprep.mubr.bf16.mxu1 %v4813_v3 }
  0xc6   : > { %3965 = vmatmul.mubr.msk.bf16.vlgmr.msra.gmra.mxu0 %vm443_vm1, %v5296_v44 }
  0xc7   : > { %3969 = vmatmul.mubr.msk.bf16.vlgmr.msra.gmra.mxu1 %vm443_vm1, %v5138_v38  ;;  %1980 = vmatpush1.bf16.msra.mxu0 %v4964_v8  ;;  %v4674_v38 = vld [vmem:[%s6212_s3 + $0x20] sm:$0xff]  }
  0xc8   : > { %2043 = vmatpush1.bf16.msra.mxu1 %v5014_v17  ;;  %1847 = vmatprep.mubr.bf16.mxu0 %v4813_v3  ;;  %v4668_v17 = vld [vmem:[%s5001_s26 + $0xa8] sm:$0xff]  }
  0xc9   : > { %1946 = vmatprep.mubr.bf16.mxu1 %v4813_v3  ;;  %1981 = vmatprep.subr.bf16.mxu0 %v4959_v7 }
  0xca   : > { %2044 = vmatprep.subr.bf16.mxu1 %v5008_v15 }
  0xcb   : > { %1982 = vmatpush1.bf16.msra.mxu0 %v4974_v10 }
  0xcc   : > { %2045 = vmatpush1.bf16.msra.mxu1 %v5029_v20  ;;  %3980 = vmatprep.subr.msk.bf16.mxu0 %vm453_vm0, %v4991_v13 }
  0xcd   : > { %3993 = vmatprep.subr.msk.bf16.mxu1 %vm453_vm0, %v5055_v25 }
  0xce   : > { %3966 = vmatmul.mubr.msk.bf16.gmra.mxu0 %vm443_vm1, %v5308_v45 }
  0xcf   : > { %3970 = vmatmul.mubr.msk.bf16.gmra.mxu1 %vm443_vm1, %v5148_v39  ;;  %1857 = vmatprep.mubr.bf16.mxu0 %v4813_v3 }
  0xd0   : > { %1956 = vmatprep.mubr.bf16.mxu1 %v4813_v3 }
  0xd6   : > { %3967 = vmatmul.mubr.msk.bf16.gmra.mxu0 %vm443_vm1, %v5324_v46 }
  0xd7   : > { %3971 = vmatmul.mubr.msk.bf16.gmra.mxu1 %vm443_vm1, %v5166_v40  ;;  %1999 = vmatprep.mubr.bf16.mxu0 %v4813_v3 }
  0xd8   : > { %2062 = vmatprep.mubr.bf16.mxu1 %v4813_v3 }
  0xde   : > { %v494_v47 = vpop.f32.mrf.mxu0  ;;  %3973 = vmatmul.mubr.msk.bf16.vlgmr.msra.gmra.mxu0 %vm443_vm1, %v5082_v30 }
  0xdf   : > { %v605_v48 = vpop.f32.mrf.mxu1  ;;  %3977 = vmatmul.mubr.msk.bf16.vlgmr.msra.gmra.mxu1 %vm443_vm1, %v5203_v41  ;;  %2118 = vmatpush1.bf16.msra.mxu0 %v5020_v19 }
  0xe0   : > { %v606_v49 = vadd.f32 %v605_v48, %v494_v47  ;;  %v496_v50 = vpop.f32.mrf.mxu0  ;;  %2224 = vmatpush1.bf16.msra.mxu1 %v5085_v31  ;;  %2009 = vmatprep.mubr.bf16.mxu0 %v4813_v3 }
  0xe1   : > { %v607_v51 = vpop.f32.mrf.mxu1  ;;  %2072 = vmatprep.mubr.bf16.mxu1 %v4813_v3  ;;  %2119 = vmatprep.subr.bf16.mxu0 %v5036_v21  ;;  %v4672_v21 = vld [vmem:[%s6212_s3 + $0x30] sm:$0xff]  }
  0xe2   : > { %v608_v53 = vadd.f32 %v607_v51, %v496_v50  ;;  %v498_v54 = vpop.f32.mrf.mxu0  ;;  %2225 = vmatprep.subr.bf16.mxu1 %v5090_v32 }
  0xe3   : > { %v609_v55 = vpop.f32.mrf.mxu1  ;;  %2120 = vmatpush1.bf16.msra.mxu0 %v5041_v22 }
  0xe4   : > { %v610_v56 = vadd.f32 %v609_v55, %v498_v54  ;;  %v500_v57 = vpop.f32.mrf.mxu0  ;;  %2226 = vmatpush1.bf16.msra.mxu1 %v5095_v33  ;;  %v4676_v55 = vld [vmem:[%s6212_s3 + $0x10] sm:$0xff]  }
  0xe5   : > { %v611_v58 = vpop.f32.mrf.mxu1  ;;  %4313 = vmatprep.subr.bf16.mxu1 %v4671_v52 }
  0xe6   : > { %v5347_v59 = vadd.f32 %v611_v58, %v500_v57  ;;  %v504_v60 = vpop.f32.mrf.mxu0  ;;  %3974 = vmatmul.mubr.msk.bf16.gmra.mxu0 %vm443_vm1, %v5109_v35 }
  0xe7   : > { %v615_v61 = vpop.f32.mrf.mxu1  ;;  %3978 = vmatmul.mubr.msk.bf16.gmra.mxu1 %vm443_vm1, %v5216_v42  ;;  %2019 = vmatprep.mubr.bf16.mxu0 %v4813_v3 }
  0xe8   : > { %v616_v62 = vadd.f32 %v615_v61, %v504_v60  ;;  %v506_v63 = vpop.f32.mrf.mxu0  ;;  %2082 = vmatprep.mubr.bf16.mxu1 %v4813_v3 }
  0xe9   : > { %v617_v0 = vpop.f32.mrf.mxu1 }
  0xea   : > { %v618_v1 = vadd.f32 %v617_v0, %v506_v63  ;;  %v508_v2 = vpop.f32.mrf.mxu0  ;;  %v4677_v0 = vld [vmem:[%s6212_s3 + $0x8] sm:$0xff]  }
  0xeb   : > { %v619_v4 = vpop.f32.mrf.mxu1 }
  0xec   : > { %v620_v5 = vadd.f32 %v619_v4, %v508_v2  ;;  %v510_v6 = vpop.f32.mrf.mxu0 }
  0xed   : > { %v621_v7 = vpop.f32.mrf.mxu1 }
  0xee   : > { %v5355_v8 = vadd.f32 %v621_v7, %v510_v6  ;;  %v514_v9 = vpop.f32.mrf.mxu0  ;;  %3975 = vmatmul.mubr.msk.bf16.gmra.mxu0 %vm443_vm1, %v5129_v37 }
  0xef   : > { %v625_v10 = vpop.f32.mrf.mxu1  ;;  %3979 = vmatmul.mubr.msk.bf16.gmra.mxu1 %vm443_vm1, %v5231_v43  ;;  %2137 = vmatprep.mubr.bf16.mxu0 %v4813_v3 }
  0xf0   : > { %v5362_v11 = vadd.f32 %v625_v10, %v514_v9  ;;  %v516_v12 = vpop.f32.mrf.mxu0  ;;  %2243 = vmatprep.mubr.bf16.mxu1 %v4813_v3  ;;  %v4678_v9 = vld [vmem:[%s6212_s3] sm:$0xff]  }
  0xf1   : > { %v627_v13 = vpop.f32.mrf.mxu1 }
  0xf2   : > { %v5365_v14 = vadd.f32 %v627_v13, %v516_v12  ;;  %v518_v15 = vpop.f32.mrf.mxu0 }
  0xf3   : > { %v629_v16 = vpop.f32.mrf.mxu1 }
  0xf4   : > { %v5368_v18 = vadd.f32 %v629_v16, %v518_v15  ;;  %v5370_v19 = vpop.f32.mrf.mxu0 }
  0xf5   : > { %v5372_v20 = vpop.f32.mrf.mxu1 }
  0xf6   : > { %v728_v22 = vpop.f32.mrf.mxu0  ;;  %3981 = vmatmul.mubr.msk.bf16.vlgmr.msra.gmra.mxu0 %vm443_vm1, %v5296_v44 }
  0xf7   : > { %v757_v23 = vadd.f32 %v728_v22, %v606_v49  ;;  %v863_v24 = vpop.f32.mrf.mxu1  ;;  %3994 = vmatmul.mubr.msk.bf16.vlgmr.msra.gmra.mxu1 %vm443_vm1, %v4668_v17  ;;  %2147 = vmatprep.mubr.bf16.mxu0 %v4813_v3 }
  0xf8   : > { %v730_v25 = vpop.f32.mrf.mxu0  ;;  %2253 = vmatprep.mubr.bf16.mxu1 %v4813_v3  ;;  %4314 = vmatpush3.bf16.msra.mxu1 %v4671_v52  ;;  %v4670_v52 = vld [vmem:[%s5001_s26 + $0xb8] sm:$0xff]  }
  0xf9   : > { %v5382_v26 = vadd.f32 %v863_v24, %v757_v23  ;;  %v758_v27 = vadd.f32 %v730_v25, %v608_v53  ;;  %v865_v28 = vpop.f32.mrf.mxu1  ;;  %4315 = vmatprep.subr.bf16.mxu1 %v4672_v21 }
  0xfa   : > { %v732_v30 = vpop.f32.mrf.mxu0 }
  0xfb   : > { %v5387_v31 = vadd.f32 %v865_v28, %v758_v27  ;;  %v759_v32 = vadd.f32 %v732_v30, %v610_v56  ;;  %v867_v33 = vpop.f32.mrf.mxu1 }
  0xfc   : > { %v5390_v35 = vpop.f32.mrf.mxu0  ;;  %4316 = vmatpush3.bf16.msra.mxu1 %v4672_v21 }
  0xfd   : > { %v5392_v36 = vadd.f32 %v867_v33, %v759_v32  ;;  %v5394_v37 = vpop.f32.mrf.mxu1  ;;  %4317 = vmatprep.subr.bf16.mxu1 %v4673_v29 }
  0xfe   : > { %v738_v39 = vpop.f32.mrf.mxu0  ;;  %3982 = vmatmul.mubr.msk.bf16.gmra.mxu0 %vm443_vm1, %v5308_v45  ;;  %v4675_v45 = vld [vmem:[%s6212_s3 + $0x18] sm:$0xff]  }
  0xff   : > { %v761_v40 = vadd.f32 %v738_v39, %v616_v62  ;;  %v873_v41 = vpop.f32.mrf.mxu1  ;;  %3995 = vmatmul.mubr.msk.bf16.gmra.mxu1 %vm443_vm1, %v4669_v34  ;;  %2157 = vmatprep.mubr.bf16.mxu0 %v4813_v3 }
 0x100   : > { %v740_v42 = vpop.f32.mrf.mxu0  ;;  %2263 = vmatprep.mubr.bf16.mxu1 %v4813_v3  ;;  %4318 = vmatpush3.bf16.msra.mxu1 %v4673_v29 }
 0x101   : > { %v5404_v43 = vadd.f32 %v873_v41, %v761_v40  ;;  %v762_v44 = vadd.f32 %v740_v42, %v618_v1  ;;  %v875_v47 = vpop.f32.mrf.mxu1  ;;  %4319 = vmatprep.subr.bf16.mxu1 %v4674_v38 }
 0x102   : > { %v742_v48 = vpop.f32.mrf.mxu0 }
 0x103   : > { %v5409_v49 = vadd.f32 %v875_v47, %v762_v44  ;;  %v763_v50 = vadd.f32 %v742_v48, %v620_v5  ;;  %v877_v51 = vpop.f32.mrf.mxu1 }
 0x104   : > { %v5412_v53 = vpop.f32.mrf.mxu0  ;;  %4320 = vmatpush3.bf16.msra.mxu1 %v4674_v38 }
 0x105   : > { %v5414_v3 = vadd.f32 %v877_v51, %v763_v50  ;;  %v5416_v54 = vpop.f32.mrf.mxu1  ;;  %4321 = vmatprep.subr.bf16.mxu1 %v4675_v45 }
 0x106   : > { %v748_v56 = vpop.f32.mrf.mxu0  ;;  %3983 = vmatmul.mubr.msk.bf16.gmra.mxu0 %vm443_vm1, %v5324_v46 }
 0x107   : > { %v765_v57 = vadd.f32 %v748_v56, %v5362_v11  ;;  %v883_v58 = vpop.f32.mrf.mxu1  ;;  %3996 = vmatmul.mubr.msk.bf16.gmra.mxu1 %vm443_vm1, %v4670_v52 }
 0x108   : > { %v750_v60 = vpop.f32.mrf.mxu0  ;;  %4322 = vmatpush3.bf16.msra.mxu1 %v4675_v45 }
 0x109   : > { %v900_v61 = vadd.f32 %v883_v58, %v765_v57  ;;  %v766_v62 = vadd.f32 %v750_v60, %v5365_v14  ;;  %v885_v63 = vpop.f32.mrf.mxu1  ;;  %4323 = vmatprep.subr.bf16.mxu1 %v4676_v55  ;;  %v1040_v57 = vlaneseq }
 0x10a   : > { %v752_v1 = vpop.f32.mrf.mxu0 }
 0x10b   : > { %v901_v2 = vadd.f32 %v885_v63, %v766_v62  ;;  %v767_v46 = vadd.f32 %v752_v1, %v5368_v18  ;;  %v887_v4 = vpop.f32.mrf.mxu1  ;;  %v5492_v63 = vld [vmem:[%s6212_s3 + $0x78] sm:$0xff]  }
 0x10c   : > { %v5430_v5 = vpop.f32.mrf.mxu0  ;;  %4324 = vmatpush3.bf16.msra.mxu1 %v4676_v55  ;;  %6264 = vst [vmem:[#allocation12_spill] sm:$0xff] %v5492_v63  ;;  %4293 = vmatprep.subr.bf16.mxu0 %v5492_v63 }
 0x10d   : > { %v902_v6 = vadd.f32 %v887_v4, %v767_v46  ;;  %v5432_v7 = vpop.f32.mrf.mxu1  ;;  %4325 = vmatprep.subr.bf16.mxu1 %v4677_v0  ;;  %4294 = vmatpush3.bf16.msra.mxu0 %v5492_v63 }
 0x10e   : > { %6258 = vst [vmem:[#allocation6_spill] sm:$0xff] %v5432_v7  ;;  %v5437_v10 = vpop.f32.mrf.mxu0 }
 0x10f   : > { %v5439_v11 = vpop.f32.mrf.mxu1 }
 0x110   : > { %v5441_v12 = vpop.f32.mrf.mxu0  ;;  %4326 = vmatpush3.bf16.msra.mxu1 %v4677_v0  ;;  %v1041_v0 = vshrl.u32 %v1040_v57, 7 }
 0x111   : > { %v5443_v13 = vpop.f32.mrf.mxu1  ;;  %4327 = vmatprep.subr.bf16.mxu1 %v4678_v9 }
 0x112   : > { %v5445_v14 = vpop.f32.mrf.mxu0  ;;  %v1046_v57 = vsub.s32 1, %v1041_v0 }
 0x113   : > { %v5447_v15 = vpop.f32.mrf.mxu1 }
 0x114   : > { %v5449_v16 = vpop.f32.mrf.mxu0  ;;  %4328 = vmatpush3.bf16.msra.mxu1 %v4678_v9  ;;  %v5510_v9 = vld [vmem:[%s6212_s3 + $0xf8] sm:$0xff]  }
 0x115   : > { %v5451_v17 = vpop.f32.mrf.mxu1  ;;  %6266 = vst [vmem:[#allocation14_spill] sm:$0xff] %v5510_v9  ;;  %4353 = vmatprep.subr.bf16.mxu1 %v5510_v9 }
 0x116   : > { %v5453_v18 = vpop.f32.mrf.mxu0 }
 0x117   : > { %v5455_v21 = vpop.f32.mrf.mxu1 }
 0x118   : > { %v5457_v22 = vpop.f32.mrf.mxu0 }
 0x119   : > { %v5459_v23 = vpop.f32.mrf.mxu1 }
 0x11a   : > { %v5461_v24 = vpop.f32.mrf.mxu0 }
 0x11b   : > { %v5463_v25 = vpop.f32.mrf.mxu1 }
 0x11c   : > { %v5465_v27 = vpop.f32.mrf.mxu0 }
 0x11d   : > { %6259 = vst [vmem:[#allocation7_spill] sm:$0xff] %v5465_v27  ;;  %v5467_v28 = vpop.f32.mrf.mxu1 }
 0x11e   : > { %v1018_v29 = vpop.f32.mrf.mxu0 }
 0x11f   : > { %v5469_v30 = vadd.f32 %v1018_v29, %v900_v61  ;;  %v1128_v32 = vpop.f32.mrf.mxu1  ;;  %v1042_v29 = vsub.s32 0, %v1041_v0  ;;  %v5524_v0 = vld [vmem:[%s6212_s3 + $0x68] sm:$0xff]  }
 0x120   : > { %v1020_v33 = vpop.f32.mrf.mxu0  ;;  %6267 = vst [vmem:[#allocation15_spill] sm:$0xff] %v5524_v0 }
 0x121   : > { %6260 = vst [vmem:[#allocation8_spill] sm:$0xff] %v5469_v30  ;;  %v5471_v34 = vadd.f32 %v1020_v33, %v901_v2  ;;  %v1130_v38 = vpop.f32.mrf.mxu1 }
 0x122   : > { %v1022_v39 = vpop.f32.mrf.mxu0 }
 0x123   : > { %6261 = vst [vmem:[#allocation9_spill] sm:$0xff] %v5471_v34  ;;  %v5473_v40 = vadd.f32 %v1022_v39, %v902_v6  ;;  %v1132_v41 = vpop.f32.mrf.mxu1  ;;  %v4680_v6 = vld [vmem:[%s6212_s3 + $0x70] sm:$0xff]   ;;  %v386_v39 = vld [vmem:[%s6211_s2] sm:$0x3]  ;;  %v760_v34 = vadd.f32 %v5390_v35, %v5347_v59 }
 0x124   : > { %v5475_v42 = vpop.f32.mrf.mxu0  ;;  %4295 = vmatprep.subr.bf16.mxu0 %v4680_v6  ;;  %v5530_v59 = vrot.slane %v386_v39, %v1046_v57 }
 0x125   : > { %6262 = vst [vmem:[#allocation10_spill] sm:$0xff] %v5473_v40  ;;  %6263 = vst [vmem:[#allocation11_spill] sm:$0xff] %v5475_v42  ;;  %v1134_v44 = vpop.f32.mrf.mxu1  ;;  %4296 = vmatpush3.bf16.msra.mxu0 %v4680_v6 }
 0x126   : > { %v1171_v47 = vpop.f32.mrf.mxu0  ;;  %4297 = vmatprep.subr.bf16.mxu0 %v5524_v0 }
 0x127   : > { %v1234_v45 = vpop.f32.mrf.mxu1  ;;  %v1172_v7 = vadd.f32 %v1171_v47, %v5439_v11  ;;  %v764_v47 = vadd.f32 %v5412_v53, %v5355_v8  ;;  %v5550_v8 = vld [vmem:[%s6212_s3 + $0x60] sm:$0xff]  }
 0x128   : > { %v1173_v48 = vpop.f32.mrf.mxu0  ;;  %6268 = vst [vmem:[#allocation16_spill] sm:$0xff] %v5550_v8 }
 0x129   : > { %v1236_v50 = vpop.f32.mrf.mxu1  ;;  %v1174_v35 = vadd.f32 %v1173_v48, %v5443_v13  ;;  %4298 = vmatpush3.bf16.msra.mxu0 %v5524_v0  ;;  %v1263_v13 = vadd.f32 %v1234_v45, %v1172_v7 }
 0x12a   : > { %v1175_v51 = vpop.f32.mrf.mxu0  ;;  %4299 = vmatprep.subr.bf16.mxu0 %v5550_v8 }
 0x12b   : > { %v5477_v52 = vpop.f32.mrf.mxu1  ;;  %v1264_v7 = vadd.f32 %v1236_v50, %v1174_v35 }
 0x12c   : > { %v1177_v55 = vpop.f32.mrf.mxu0 }
 0x12d   : > { %v5479_v56 = vpop.f32.mrf.mxu1  ;;  %4300 = vmatpush3.bf16.msra.mxu0 %v5550_v8 }
 0x12e   : > { %v5481_v58 = vpop.f32.mrf.mxu0 }
 0x12f   : > { %v5483_v60 = vpop.f32.mrf.mxu1 }
 0x130   : > { %v5485_v61 = vpop.f32.mrf.mxu0 }
 0x131   : > { %v5487_v62 = vpop.f32.mrf.mxu1 }
 0x132   : > { %v5494_v1 = vpop.f32.mrf.mxu0 }
 0x133   : > { %v5496_v2 = vpop.f32.mrf.mxu1 }
 0x134   : > { %v5499_v46 = vpop.f32.mrf.mxu0 }
 0x135   : > { %v5502_v4 = vpop.f32.mrf.mxu1 }
 0x136   : > { %6265 = vst [vmem:[#allocation13_spill] sm:$0xff] %v5502_v4  ;;  %v1191_v33 = vpop.f32.mrf.mxu0 }
 0x137   : > { %v1192_v40 = vadd.f32 %v1191_v33, %v1128_v32  ;;  %v1254_v63 = vpop.f32.mrf.mxu1  ;;  %v1027_v32 = vadd.f32 %v5437_v10, %v5382_v26  ;;  %v5528_v33 = vrot.slane %v386_v39, %v1042_v29  ;;  %v1028_v26 = vadd.f32 %v5441_v12, %v5387_v31 }
 0x138   : > { %v1193_v42 = vpop.f32.mrf.mxu0  ;;  %v1029_v10 = vadd.f32 %v5445_v14, %v5392_v36  ;;  %v632_v31 = vadd.f32 %v5372_v20, %v5370_v19  ;;  %v1178_v12 = vadd.f32 %v1177_v55, %v5451_v17  ;;  %v1031_v20 = vadd.f32 %v5453_v18, %v5404_v43 }
 0x139   : > { %v5519_v30 = vadd.f32 %v1254_v63, %v1192_v40  ;;  %v1194_v4 = vadd.f32 %v1193_v42, %v1130_v38  ;;  %v1256_v27 = vpop.f32.mrf.mxu1  ;;  %v895_v42 = vadd.f32 %v5394_v37, %v760_v34  ;;  %v5555_v36 = vadd.f32 %v5528_v33, %v1027_v32 }
 0x13a   : > { %v1195_v9 = vpop.f32.mrf.mxu0  ;;  %v1051_v45 = vadd.f32 %v5530_v59, %v1028_v26  ;;  %v5565_v19 = vadd.f32 %v5528_v33, %v1029_v10  ;;  %v5571_v17 = vadd.f32 %v5430_v5, %v632_v31  ;;  %v1182_v18 = vadd.f32 %v5481_v58, %v5455_v21  ;;  %v5603_v10 = vld [vmem:[%s6212_s3 + $0x50] sm:$0xff]  }
 0x13b   : > { %v5533_v11 = vadd.f32 %v1256_v27, %v1194_v4  ;;  %v1196_v40 = vadd.f32 %v1195_v9, %v1132_v41  ;;  %v1258_v38 = vpop.f32.mrf.mxu1  ;;  %v1176_v27 = vadd.f32 %v1175_v51, %v5447_v15  ;;  %v1030_v37 = vadd.f32 %v5449_v16, %v895_v42  ;;  %6270 = vst [vmem:[#allocation18_spill] sm:$0xff] %v5603_v10 }
 0x13c   : > { %v1197_v63 = vpop.f32.mrf.mxu0  ;;  %v1062_v9 = vmax.f32 %v5555_v36, 0.0  ;;  %v1184_v5 = vadd.f32 %v5485_v61, %v5459_v23  ;;  %v1266_v29 = vadd.f32 %v5479_v56, %v1178_v12  ;;  %v5592_v42 = vadd.f32 %v5528_v33, %v1031_v20 }
 0x13d   : > { %v5545_v41 = vadd.f32 %v1258_v38, %v1196_v40  ;;  %v1198_v48 = vadd.f32 %v1197_v63, %v1134_v44  ;;  %v1260_v4 = vpop.f32.mrf.mxu1  ;;  %v899_v44 = vadd.f32 %v5416_v54, %v764_v47  ;;  %v1265_v50 = vadd.f32 %v5477_v52, %v1176_v27  ;;  %v5577_v54 = vld [vmem:[%s6212_s3 + $0x58] sm:$0xff]  }
 0x13e   : > { %v1309_v53 = vpop.f32.mrf.mxu0  ;;  %6269 = vst [vmem:[#allocation17_spill] sm:$0xff] %v5577_v54  ;;  %v5581_v43 = vadd.f32 %v5530_v59, %v1030_v37  ;;  %4301 = vmatprep.subr.bf16.mxu0 %v5577_v54  ;;  %v1063_v40 = vmax.f32 %v1051_v45, 0.0  ;;  %v1064_v38 = vmax.f32 %v5565_v19, 0.0  ;;  %v1032_v21 = vadd.f32 %v5457_v22, %v5409_v49  ;;  %v6272_v45 = vld [vmem:[#allocation7_spill] sm:$0xff] }
 0x13f   : > { %v5559_v14 = vadd.f32 %v1260_v4, %v1198_v48  ;;  %v1338_v15 = vadd.f32 %v1309_v53, %v1263_v13  ;;  %v1415_v34 = vpop.f32.mrf.mxu1  ;;  %4302 = vmatpush3.bf16.msra.mxu0 %v5577_v54  ;;  %v1186_v56 = vadd.f32 %v5494_v1, %v5463_v25  ;;  %v1267_v49 = vadd.f32 %v5483_v60, %v1182_v18 }
 0x140   : > { %v1311_v16 = vpop.f32.mrf.mxu0  ;;  %v1065_v63 = vmax.f32 %v5581_v43, 0.0  ;;  %v1268_v22 = vadd.f32 %v5487_v62, %v1184_v5  ;;  %v1188_v25 = vadd.f32 %v5499_v46, %v5467_v28  ;;  %4303 = vmatprep.subr.bf16.mxu0 %v5603_v10  ;;  %v1066_v36 = vmax.f32 %v5592_v42, 0.0 }
 0x141   : > { %v1444_v51 = vadd.f32 %v1415_v34, %v1338_v15  ;;  %v1339_v55 = vadd.f32 %v1311_v16, %v1264_v7  ;;  %v1417_v6 = vpop.f32.mrf.mxu1  ;;  %v1055_v37 = vadd.f32 %v5530_v59, %v1032_v21  ;;  %v1033_v60 = vadd.f32 %v5461_v24, %v5414_v3  ;;  %v5622_v34 = vld [vmem:[%s6212_s3 + $0x48] sm:$0xff]   ;;  %v6275_v21 = vld [vmem:[#allocation8_spill] sm:$0xff] }
 0x142   : > { %v1313_v52 = vpop.f32.mrf.mxu0  ;;  %v1269_v28 = vadd.f32 %v5496_v2, %v1186_v56  ;;  %6271 = vst [vmem:[#allocation19_spill] sm:$0xff] %v5622_v34  ;;  %v1034_v19 = vadd.f32 %v6272_v45, %v899_v44 }
 0x143   : > { %v1456_v39 = vadd.f32 %v1444_v51, %v5528_v33  ;;  %v1445_v57 = vadd.f32 %v1417_v6, %v1339_v55  ;;  %v1340_v32 = vadd.f32 %v1313_v52, %v1265_v50  ;;  %v1419_v35 = vpop.f32.mrf.mxu1  ;;  %4304 = vmatpush3.bf16.msra.mxu0 %v5603_v10  ;;  %v6273_v50 = vld [vmem:[#allocation13_spill] sm:$0xff]  ;;  %v1067_v18 = vmax.f32 %v1055_v37, 0.0 }
 0x144   : > { %v1315_v23 = vpop.f32.mrf.mxu0  ;;  %v1270_v51 = vadd.f32 %v6273_v50, %v1188_v25  ;;  %4305 = vmatprep.subr.bf16.mxu0 %v5622_v34  ;;  %v1056_v5 = vadd.f32 %v5528_v33, %v1033_v60  ;;  %v1057_v42 = vadd.f32 %v5530_v59, %v1034_v19 }
 0x145   : > { %v1457_v58 = vadd.f32 %v1445_v57, %v5530_v59  ;;  %v1446_v61 = vadd.f32 %v1419_v35, %v1340_v32  ;;  %v1341_v47 = vadd.f32 %v1315_v23, %v1266_v29  ;;  %v1421_v26 = vpop.f32.mrf.mxu1  ;;  %v1468_v13 = vmax.f32 %v1456_v39, 0.0 }
 0x146   : > { %v1319_v27 = vpop.f32.mrf.mxu0  ;;  %v1058_v23 = vadd.f32 %v5528_v33, %v6275_v21  ;;  %v1068_v25 = vmax.f32 %v1056_v5, 0.0  ;;  %v6281_v5 = vld [vmem:[#allocation10_spill] sm:$0xff] }
 0x147   : > { %v1469_v1 = vmax.f32 %v1457_v58, 0.0  ;;  %v1458_v48 = vadd.f32 %v1446_v61, %v5528_v33  ;;  %v1447_v4 = vadd.f32 %v1421_v26, %v1341_v47  ;;  %v1425_v31 = vpop.f32.mrf.mxu1  ;;  %v1342_v62 = vadd.f32 %v1319_v27, %v1267_v49  ;;  %4306 = vmatpush3.bf16.msra.mxu0 %v5622_v34 }
 0x148   : > { %v1321_v53 = vpop.f32.mrf.mxu0  ;;  %v1480_v20 = vmax.f32 %v1062_v9, %v1468_v13  ;;  %v6276_v13 = vld [vmem:[#allocation6_spill] sm:$0xff] }
 0x149   : > { %v1481_v46 = vmax.f32 %v1063_v40, %v1469_v1  ;;  %v1459_v7 = vadd.f32 %v1447_v4, %v5530_v59  ;;  %v1343_v12 = vadd.f32 %v1321_v53, %v1268_v22  ;;  %v1427_v15 = vpop.f32.mrf.mxu1  ;;  %v1470_v3 = vmax.f32 %v1458_v48, 0.0  ;;  %v5634_v40 = vld [vmem:[%s6212_s3 + $0x40] sm:$0xff]  }
 0x14a   : > { %v1448_v24 = vadd.f32 %v1425_v31, %v1342_v62  ;;  %v1323_v16 = vpop.f32.mrf.mxu0  ;;  %6274 = vst [vmem:[#allocation7_spill] sm:$0xff] %v5634_v40  ;;  %4307 = vmatprep.subr.bf16.mxu0 %v5634_v40  ;;  %v903_v27 = vadd.f32 %v6276_v13, %v5571_v17  ;;  %v1069_v53 = vmax.f32 %v1057_v42, 0.0 }
 0x14b   : > { %v1471_v55 = vmax.f32 %v1459_v7, 0.0  ;;  %v1449_v2 = vadd.f32 %v1427_v15, %v1343_v12  ;;  %v1344_v6 = vadd.f32 %v1323_v16, %v1269_v28  ;;  %v1429_v43 = vpop.f32.mrf.mxu1  ;;  %v1492_v39 = vmax.f32 %v1480_v20, %v1481_v46  ;;  %4308 = vmatpush3.bf16.msra.mxu0 %v5634_v40  ;;  %v6278_v7 = vld [vmem:[#allocation11_spill] sm:$0xff] }
 0x14c   : > { %v1460_v52 = vadd.f32 %v1448_v24, %v5528_v33  ;;  %v1325_v29 = vpop.f32.mrf.mxu0  ;;  %v1482_v56 = vmax.f32 %v1064_v38, %v1470_v3  ;;  %v1070_v28 = vmax.f32 %v1058_v23, 0.0  ;;  %v1038_v12 = vadd.f32 %v6278_v7, %v903_v27  ;;  %v6279_v3 = vld [vmem:[#allocation9_spill] sm:$0xff] }
 0x14d   : > { %v1483_v44 = vmax.f32 %v1065_v63, %v1471_v55  ;;  %v1461_v9 = vadd.f32 %v1449_v2, %v5530_v59  ;;  %v1450_v57 = vadd.f32 %v1429_v43, %v1344_v6  ;;  %v1345_v32 = vadd.f32 %v1325_v29, %v1270_v51  ;;  %v1431_v35 = vpop.f32.mrf.mxu1 }
 0x14e   : > { %v1472_v58 = vmax.f32 %v1460_v52, 0.0  ;;  %v1329_v61 = vpop.f32.mrf.mxu0  ;;  %v1059_v24 = vadd.f32 %v5530_v59, %v6279_v3  ;;  %v1060_v52 = vadd.f32 %v5528_v33, %v6281_v5  ;;  %v5693_v3 = vld [vmem:[%s6212_s3 + $0xe0] sm:$0xff]  }
 0x14f   : > { %v1473_v47 = vmax.f32 %v1461_v9, 0.0  ;;  %v1462_v26 = vadd.f32 %v1450_v57, %v5528_v33  ;;  %v1451_v63 = vadd.f32 %v1431_v35, %v1345_v32  ;;  %v1346_v49 = vadd.f32 %v1329_v61, %v5519_v30  ;;  %v1435_v22 = vpop.f32.mrf.mxu1  ;;  %v5649_v30 = vld [vmem:[%s6212_s3 + $0xb8] sm:$0xff]   ;;  %6288 = vst [vmem:[#allocation20_spill] sm:$0xff] %v5693_v3 }
 0x150   : > { %v1484_v1 = vmax.f32 %v1066_v36, %v1472_v58  ;;  %v1331_v48 = vpop.f32.mrf.mxu0  ;;  %v1493_v4 = vmax.f32 %v1482_v56, %v1483_v44  ;;  %6277 = vst [vmem:[#allocation13_spill] sm:$0xff] %v5649_v30  ;;  %4333 = vmatprep.subr.bf16.mxu0 %v5649_v30  ;;  %v1061_v9 = vadd.f32 %v5530_v59, %v1038_v12  ;;  %v1071_v42 = vmax.f32 %v1059_v24, 0.0 }
 0x151   : > { %v1485_v38 = vmax.f32 %v1067_v18, %v1473_v47  ;;  %v1474_v31 = vmax.f32 %v1462_v26, 0.0  ;;  %v1463_v37 = vadd.f32 %v1451_v63, %v5530_v59  ;;  %v1452_v60 = vadd.f32 %v1435_v22, %v1346_v49  ;;  %v1437_v62 = vpop.f32.mrf.mxu1  ;;  %v5674_v26 = vld [vmem:[%s6212_s3 + $0xf0] sm:$0xff]  }
 0x152   : > { %v1347_v17 = vadd.f32 %v1331_v48, %v5533_v11  ;;  %v1333_v36 = vpop.f32.mrf.mxu0  ;;  %v2328_v46 = vpack.c.bf16 %v1493_v4, %v1492_v39  ;;  %6283 = vst [vmem:[#allocation11_spill] sm:$0xff] %v5674_v26  ;;  %v1072_v63 = vmax.f32 %v1060_v52, 0.0 }
 0x153   : > { %v1494_v15 = vmax.f32 %v1484_v1, %v1485_v38  ;;  %v1475_v45 = vmax.f32 %v1463_v37, 0.0  ;;  %v1464_v19 = vadd.f32 %v1452_v60, %v5528_v33  ;;  %v1439_v20 = vpop.f32.mrf.mxu1  ;;  %v1486_v16 = vmax.f32 %v1068_v25, %v1474_v31  ;;  %v6284_v60 = vld [vmem:[#allocation14_spill] sm:$0xff] }
 0x154   : > { %v1453_v50 = vadd.f32 %v1437_v62, %v1347_v17  ;;  %v1348_v51 = vadd.f32 %v1333_v36, %v5545_v41  ;;  %4329 = vmatprep.mubr.bf16.mxu1 %v2328_v46  ;;  %v1335_v11 = vpop.f32.mrf.mxu0  ;;  %v1073_v25 = vmax.f32 %v1061_v9, 0.0 }
 0x155   : > { %v1487_v55 = vmax.f32 %v1069_v53, %v1475_v45  ;;  %v1476_v2 = vmax.f32 %v1464_v19, 0.0  ;;  %v1349_v6 = vadd.f32 %v1335_v11, %v5559_v14  ;;  %v1441_v43 = vpop.f32.mrf.mxu1  ;;  %v5659_v18 = vpack.c.bf16 %v1494_v15, %v1493_v4 }
 0x156   : > { %v1465_v29 = vadd.f32 %v1453_v50, %v5530_v59  ;;  %v1454_v39 = vadd.f32 %v1439_v20, %v1348_v51  ;;  %v1532_v44 = vpop.f32.mrf.mxu0 }
 0x157   : > { %6280 = vst [vmem:[#allocation8_spill] sm:$0xff] %v5659_v18  ;;  %v1495_v57 = vmax.f32 %v1486_v16, %v1487_v55  ;;  %v1488_v41 = vmax.f32 %v1070_v28, %v1476_v2  ;;  %v1455_v32 = vadd.f32 %v1441_v43, %v1349_v6  ;;  %v1595_v35 = vpop.f32.mrf.mxu1  ;;  %v5682_v28 = vld [vmem:[%s6212_s3 + $0xe8] sm:$0xff]   ;;  %v5700_v2 = vld [vmem:[%s6212_s3 + $0xd8] sm:$0xff]  }
 0x158   : > { %v1477_v21 = vmax.f32 %v1465_v29, 0.0  ;;  %v1466_v14 = vadd.f32 %v1454_v39, %v5528_v33  ;;  %v5666_v23 = vadd.f32 %v1595_v35, %v1532_v44  ;;  %v1534_v56 = vpop.f32.mrf.mxu0  ;;  %6285 = vst [vmem:[#allocation9_spill] sm:$0xff] %v5682_v28  ;;  %6289 = vst [vmem:[#allocation21_spill] sm:$0xff] %v5700_v2  ;;  %v5707_v44 = vld [vmem:[%s6212_s3 + $0xd0] sm:$0xff]  }
 0x159   : > { %v5668_v58 = vpack.c.bf16 %v1495_v57, %v1494_v15  ;;  %v1467_v61 = vadd.f32 %v1455_v32, %v5530_v59  ;;  %v1597_v47 = vpop.f32.mrf.mxu1  ;;  %6290 = vst [vmem:[#allocation22_spill] sm:$0xff] %v5707_v44 }
 0x15a   : > { %v1489_v49 = vmax.f32 %v1071_v42, %v1477_v21  ;;  %v1478_v22 = vmax.f32 %v1466_v14, 0.0  ;;  %v1598_v13 = vadd.f32 %v1597_v47, %v1534_v56  ;;  %v1536_v27 = vpop.f32.mrf.mxu0  ;;  %v5714_v21 = vld [vmem:[%s6212_s3 + $0xc8] sm:$0xff]  }
 0x15b   : > { %6282 = vst [vmem:[#allocation6_spill] sm:$0xff] %v5668_v58  ;;  %v1479_v1 = vmax.f32 %v1467_v61, 0.0  ;;  %v1599_v48 = vpop.f32.mrf.mxu1  ;;  %4330 = vmatmul.mubr.bf16.vlgmr.msra.gmra.mxu1 %v5668_v58  ;;  %6291 = vst [vmem:[#allocation23_spill] sm:$0xff] %v5714_v21 }
 0x15c   : > { %v1496_v4 = vmax.f32 %v1488_v41, %v1489_v49  ;;  %v1490_v38 = vmax.f32 %v1072_v63, %v1478_v22  ;;  %v1600_v31 = vadd.f32 %v1599_v48, %v1536_v27  ;;  %v1538_v37 = vpop.f32.mrf.mxu0  ;;  %4354 = vmatpush3.bf16.msra.mxu1 %v6284_v60 }
 0x15d   : > { %v1491_v62 = vmax.f32 %v1073_v25, %v1479_v1  ;;  %v1601_v53 = vpop.f32.mrf.mxu1  ;;  %4355 = vmatprep.subr.bf16.mxu1 %v5674_v26  ;;  %v5724_v25 = vld [vmem:[%s6212_s3 + $0xc0] sm:$0xff]  }
 0x15e   : > { %v5684_v17 = vpack.c.bf16 %v1496_v4, %v1495_v57  ;;  %v1602_v36 = vadd.f32 %v1601_v53, %v1538_v37  ;;  %v1542_v46 = vpop.f32.mrf.mxu0  ;;  %6292 = vst [vmem:[#allocation24_spill] sm:$0xff] %v5724_v25 }
 0x15f   : > { %v1497_v7 = vmax.f32 %v1490_v38, %v1491_v62  ;;  %v1605_v12 = vpop.f32.mrf.mxu1 }
 0x160   : > { %6286 = vst [vmem:[#allocation10_spill] sm:$0xff] %v5684_v17  ;;  %v1606_v15 = vadd.f32 %v1605_v12, %v1542_v46  ;;  %v1544_v45 = vpop.f32.mrf.mxu0  ;;  %4356 = vmatpush3.bf16.msra.mxu1 %v5674_v26 }
 0x161   : > { %v5687_v19 = vpack.c.bf16 %v1497_v7, %v1496_v4  ;;  %v1607_v20 = vpop.f32.mrf.mxu1  ;;  %4357 = vmatprep.subr.bf16.mxu1 %v5682_v28 }
 0x162   : > { %v1608_v24 = vadd.f32 %v1607_v20, %v1544_v45  ;;  %v1546_v16 = vpop.f32.mrf.mxu0 }
 0x163   : > { %6287 = vst [vmem:[#allocation14_spill] sm:$0xff] %v5687_v19  ;;  %v1609_v50 = vpop.f32.mrf.mxu1 }
 0x164   : > { %v1610_v51 = vadd.f32 %v1609_v50, %v1546_v16  ;;  %v1548_v11 = vpop.f32.mrf.mxu0  ;;  %4358 = vmatpush3.bf16.msra.mxu1 %v5682_v28  ;;  %v6293_v16 = vld [vmem:[#allocation12_spill] sm:$0xff] }
 0x165   : > { %v1611_v55 = vpop.f32.mrf.mxu1  ;;  %4359 = vmatprep.subr.bf16.mxu1 %v5693_v3 }
 0x166   : > { %v1612_v6 = vadd.f32 %v1611_v55, %v1548_v11  ;;  %v1552_v43 = vpop.f32.mrf.mxu0 }
 0x167   : > { %v1615_v5 = vpop.f32.mrf.mxu1 }
 0x168   : > { %v1616_v52 = vadd.f32 %v1615_v5, %v1552_v43  ;;  %v1554_v29 = vpop.f32.mrf.mxu0  ;;  %4360 = vmatpush3.bf16.msra.mxu1 %v5693_v3 }
 0x169   : > { %v1617_v39 = vpop.f32.mrf.mxu1  ;;  %4361 = vmatprep.subr.bf16.mxu1 %v5700_v2 }
 0x16a   : > { %v1618_v9 = vadd.f32 %v1617_v39, %v1554_v29  ;;  %v1556_v57 = vpop.f32.mrf.mxu0 }
 0x16b   : > { %v1619_v41 = vpop.f32.mrf.mxu1 }
 0x16c   : > { %v1620_v32 = vadd.f32 %v1619_v41, %v1556_v57  ;;  %v1558_v35 = vpop.f32.mrf.mxu0  ;;  %4362 = vmatpush3.bf16.msra.mxu1 %v5700_v2 }
 0x16d   : > { %v1621_v42 = vpop.f32.mrf.mxu1  ;;  %4363 = vmatprep.subr.bf16.mxu1 %v5707_v44 }
 0x16e   : > { %v1622_v14 = vadd.f32 %v1621_v42, %v1558_v35  ;;  %v1658_v56 = vpop.f32.mrf.mxu0 }
 0x16f   : > { %v1687_v61 = vadd.f32 %v1658_v56, %v5666_v23  ;;  %v1733_v47 = vpop.f32.mrf.mxu1 }
 0x170   : > { %v1660_v63 = vpop.f32.mrf.mxu0  ;;  %4364 = vmatpush3.bf16.msra.mxu1 %v5707_v44 }
 0x171   : > { %v5718_v49 = vadd.f32 %v1733_v47, %v1687_v61  ;;  %v1688_v22 = vadd.f32 %v1660_v63, %v1598_v13  ;;  %v1735_v27 = vpop.f32.mrf.mxu1  ;;  %4365 = vmatprep.subr.bf16.mxu1 %v5714_v21 }
 0x172   : > { %v1662_v1 = vpop.f32.mrf.mxu0 }
 0x173   : > { %v5726_v48 = vadd.f32 %v1735_v27, %v1688_v22  ;;  %v1689_v4 = vadd.f32 %v1662_v1, %v1600_v31  ;;  %v1737_v23 = vpop.f32.mrf.mxu1 }
 0x174   : > { %v1664_v38 = vpop.f32.mrf.mxu0  ;;  %4366 = vmatpush3.bf16.msra.mxu1 %v5714_v21 }
 0x175   : > { %v5729_v37 = vadd.f32 %v1737_v23, %v1689_v4  ;;  %v1690_v60 = vadd.f32 %v1664_v38, %v1602_v36  ;;  %v1739_v13 = vpop.f32.mrf.mxu1  ;;  %4367 = vmatprep.subr.bf16.mxu1 %v5724_v25 }
 0x176   : > { %v1668_v62 = vpop.f32.mrf.mxu0 }
 0x177   : > { %v5732_v53 = vadd.f32 %v1739_v13, %v1690_v60  ;;  %v1691_v46 = vadd.f32 %v1668_v62, %v1606_v15  ;;  %v1743_v7 = vpop.f32.mrf.mxu1 }
 0x178   : > { %v1670_v12 = vpop.f32.mrf.mxu0  ;;  %4368 = vmatpush3.bf16.msra.mxu1 %v5724_v25 }
 0x179   : > { %v5735_v45 = vadd.f32 %v1743_v7, %v1691_v46  ;;  %v1692_v31 = vadd.f32 %v1670_v12, %v1608_v24  ;;  %v1745_v20 = vpop.f32.mrf.mxu1  ;;  %4393 = vmatprep.subr.bf16.mxu1 %v6293_v16 }
 0x17a   : > { %v1672_v50 = vpop.f32.mrf.mxu0 }
 0x17b   : > { %v5738_v11 = vadd.f32 %v1745_v20, %v1692_v31  ;;  %v1693_v36 = vadd.f32 %v1672_v50, %v1610_v51  ;;  %v1747_v55 = vpop.f32.mrf.mxu1 }
 0x17c   : > { %v1674_v43 = vpop.f32.mrf.mxu0 }
 0x17d   : > { %v5740_v5 = vadd.f32 %v1747_v55, %v1693_v36  ;;  %v1694_v29 = vadd.f32 %v1674_v43, %v1612_v6  ;;  %v1749_v15 = vpop.f32.mrf.mxu1 }
 0x17e   : > { %v1678_v39 = vpop.f32.mrf.mxu0 }
 0x17f   : > { %v5742_v57 = vadd.f32 %v1749_v15, %v1694_v29  ;;  %v1695_v41 = vadd.f32 %v1678_v39, %v1616_v52  ;;  %v1753_v35 = vpop.f32.mrf.mxu1 }
 0x180   : > { %v1680_v42 = vpop.f32.mrf.mxu0 }
 0x181   : > { %v5744_v24 = vadd.f32 %v1753_v35, %v1695_v41  ;;  %v1696_v56 = vadd.f32 %v1680_v42, %v1618_v9  ;;  %v1755_v61 = vpop.f32.mrf.mxu1 }
 0x182   : > { %v1682_v47 = vpop.f32.mrf.mxu0 }
 0x183   : > { %v5746_v63 = vadd.f32 %v1755_v61, %v1696_v56  ;;  %v1697_v51 = vadd.f32 %v1682_v47, %v1620_v32  ;;  %v1757_v22 = vpop.f32.mrf.mxu1 }
 0x184   : > { %v1684_v27 = vpop.f32.mrf.mxu0 }
 0x185   : > { %v1772_v1 = vadd.f32 %v1757_v22, %v1697_v51  ;;  %v1698_v4 = vadd.f32 %v1684_v27, %v1622_v14  ;;  %v1759_v6 = vpop.f32.mrf.mxu1 }
 0x186   : > { %v1839_v23 = vpop.f32.mrf.mxu0 }
 0x187   : > { %v1773_v38 = vadd.f32 %v1759_v6, %v1698_v4  ;;  %v1938_v60 = vpop.f32.mrf.mxu1  ;;  %v1868_v58 = vadd.f32 %v1839_v23, %v5718_v49 }
 0x188   : > { %v1841_v13 = vpop.f32.mrf.mxu0 }
 0x189   : > { %v1940_v52 = vpop.f32.mrf.mxu1  ;;  %v1869_v17 = vadd.f32 %v1841_v13, %v5726_v48 }
 0x18a   : > { %v1843_v62 = vpop.f32.mrf.mxu0 }
 0x18b   : > { %v1942_v46 = vpop.f32.mrf.mxu1  ;;  %v1870_v54 = vadd.f32 %v1843_v62, %v5729_v37 }
 0x18c   : > { %v1845_v7 = vpop.f32.mrf.mxu0 }
 0x18d   : > { %v1944_v12 = vpop.f32.mrf.mxu1  ;;  %v1871_v49 = vadd.f32 %v1845_v7, %v5732_v53 }
 0x18e   : > { %v5748_v9 = vpop.f32.mrf.mxu0 }
 0x18f   : > { %v5750_v31 = vpop.f32.mrf.mxu1 }
 0x190   : > { %v1851_v20 = vpop.f32.mrf.mxu0 }
 0x191   : > { %v5752_v32 = vpop.f32.mrf.mxu1  ;;  %v1873_v48 = vadd.f32 %v1851_v20, %v5738_v11  ;;  %v5812_v11 = vadd.f32 %v1871_v49, %v5530_v59 }
 0x192   : > { %v5754_v16 = vpop.f32.mrf.mxu0 }
 0x193   : > { %v5756_v14 = vpop.f32.mrf.mxu1  ;;  %v1874_v20 = vadd.f32 %v5754_v16, %v5740_v5 }
 0x194   : > { %v5758_v50 = vpop.f32.mrf.mxu0 }
 0x195   : > { %v5760_v36 = vpop.f32.mrf.mxu1  ;;  %v1875_v5 = vadd.f32 %v5758_v50, %v5742_v57 }
 0x196   : > { %v5762_v55 = vpop.f32.mrf.mxu0 }
 0x197   : > { %v5764_v43 = vpop.f32.mrf.mxu1 }
 0x198   : > { %v5766_v29 = vpop.f32.mrf.mxu0 }
 0x199   : > { %v5768_v15 = vpop.f32.mrf.mxu1 }
 0x19a   : > { %v1863_v39 = vpop.f32.mrf.mxu0 }
 0x19b   : > { %v5770_v41 = vadd.f32 %v1863_v39, %v1772_v1  ;;  %v1962_v35 = vpop.f32.mrf.mxu1 }
 0x19c   : > { %v1865_v42 = vpop.f32.mrf.mxu0 }
 0x19d   : > { %6294 = vst [vmem:[#allocation12_spill] sm:$0xff] %v5770_v41  ;;  %v5772_v56 = vadd.f32 %v1865_v42, %v1773_v38  ;;  %v1964_v61 = vpop.f32.mrf.mxu1  ;;  %v5799_v41 = vadd.f32 %v1869_v17, %v5530_v59 }
 0x19e   : > { %v2001_v47 = vpop.f32.mrf.mxu0 }
 0x19f   : > { %6295 = vst [vmem:[#allocation25_spill] sm:$0xff] %v5772_v56  ;;  %v2064_v51 = vpop.f32.mrf.mxu1  ;;  %v2002_v34 = vadd.f32 %v2001_v47, %v1938_v60  ;;  %v5796_v56 = vadd.f32 %v1868_v58, %v5528_v33 }
 0x1a0   : > { %v2003_v22 = vpop.f32.mrf.mxu0 }
 0x1a1   : > { %v2066_v27 = vpop.f32.mrf.mxu1  ;;  %v2004_v0 = vadd.f32 %v2003_v22, %v1940_v52  ;;  %v2093_v60 = vadd.f32 %v2064_v51, %v2002_v34  ;;  %v1892_v53 = vmax.f32 %v5796_v56, 0.0  ;;  %v1872_v34 = vadd.f32 %v5748_v9, %v5735_v45 }
 0x1a2   : > { %v2005_v4 = vpop.f32.mrf.mxu0 }
 0x1a3   : > { %v2068_v6 = vpop.f32.mrf.mxu1  ;;  %v2006_v13 = vadd.f32 %v2005_v4, %v1942_v46  ;;  %v2094_v58 = vadd.f32 %v2066_v27, %v2004_v0 }
 0x1a4   : > { %v2007_v25 = vpop.f32.mrf.mxu0 }
 0x1a5   : > { %v2070_v21 = vpop.f32.mrf.mxu1  ;;  %v2095_v0 = vadd.f32 %v2068_v6, %v2006_v13  ;;  %v5828_v6 = vadd.f32 %v1872_v34, %v5528_v33 }
 0x1a6   : > { %v2011_v44 = vpop.f32.mrf.mxu0 }
 0x1a7   : > { %v5774_v2 = vpop.f32.mrf.mxu1  ;;  %v2012_v56 = vadd.f32 %v2011_v44, %v5750_v31 }
 0x1a8   : > { %v2013_v3 = vpop.f32.mrf.mxu0 }
 0x1a9   : > { %v5776_v28 = vpop.f32.mrf.mxu1 }
 0x1aa   : > { %v2015_v1 = vpop.f32.mrf.mxu0 }
 0x1ab   : > { %v5778_v39 = vpop.f32.mrf.mxu1 }
 0x1ac   : > { %v5780_v38 = vpop.f32.mrf.mxu0 }
 0x1ad   : > { %v5782_v42 = vpop.f32.mrf.mxu1  ;;  %v2018_v57 = vadd.f32 %v5780_v38, %v5760_v36 }
 0x1ae   : > { %v5784_v26 = vpop.f32.mrf.mxu0 }
 0x1af   : > { %v5786_v19 = vpop.f32.mrf.mxu1 }
 0x1b0   : > { %v5790_v40 = vpop.f32.mrf.mxu0 }
 0x1b1   : > { %v5792_v10 = vpop.f32.mrf.mxu1  ;;  %v2024_v34 = vadd.f32 %v5790_v40, %v5768_v15 }
 0x1b2   : > { %6296 = vst [vmem:[#allocation26_spill] sm:$0xff] %v5792_v10  ;;  %v2025_v8 = vpop.f32.mrf.mxu0 }
 0x1b3   : > { %v2026_v18 = vadd.f32 %v2025_v8, %v1962_v35  ;;  %v2088_v30 = vpop.f32.mrf.mxu1  ;;  %v5806_v8 = vadd.f32 %v1870_v54, %v5528_v33  ;;  %v2008_v35 = vadd.f32 %v2007_v25, %v1944_v12 }
 0x1b4   : > { %v2027_v23 = vpop.f32.mrf.mxu0 }
 0x1b5   : > { %v5803_v47 = vadd.f32 %v2088_v30, %v2026_v18  ;;  %v2028_v37 = vadd.f32 %v2027_v23, %v1964_v61  ;;  %v2090_v62 = vpop.f32.mrf.mxu1  ;;  %v5817_v30 = vadd.f32 %v1873_v48, %v5530_v59  ;;  %v1893_v18 = vmax.f32 %v5799_v41, 0.0 }
 0x1b6   : > { %v2139_v52 = vpop.f32.mrf.mxu0  ;;  %v1894_v12 = vmax.f32 %v5806_v8, 0.0  ;;  %v2014_v61 = vadd.f32 %v2013_v3, %v5752_v32  ;;  %v2096_v9 = vadd.f32 %v2070_v21, %v2008_v35  ;;  %v2016_v3 = vadd.f32 %v2015_v1, %v5756_v14 }
 0x1b7   : > { %v5808_v22 = vadd.f32 %v2090_v62, %v2028_v37  ;;  %v2168_v17 = vadd.f32 %v2139_v52, %v2093_v60  ;;  %v2245_v10 = vpop.f32.mrf.mxu1  ;;  %v1897_v49 = vmax.f32 %v5817_v30, 0.0  ;;  %v5836_v48 = vadd.f32 %v1874_v20, %v5528_v33  ;;  %v6298_v30 = vld [vmem:[#allocation12_spill] sm:$0xff] }
 0x1b8   : > { %v2141_v54 = vpop.f32.mrf.mxu0  ;;  %v2097_v23 = vadd.f32 %v5774_v2, %v2012_v56  ;;  %v2098_v60 = vadd.f32 %v5776_v28, %v2014_v61  ;;  %v5844_v8 = vadd.f32 %v1875_v5, %v5530_v59  ;;  %v1876_v52 = vadd.f32 %v5762_v55, %v5744_v24 }
 0x1b9   : > { %v2274_v25 = vadd.f32 %v2245_v10, %v2168_v17  ;;  %v2169_v46 = vadd.f32 %v2141_v54, %v2094_v58  ;;  %v2247_v7 = vpop.f32.mrf.mxu1  ;;  %v1895_v10 = vmax.f32 %v5812_v11, 0.0  ;;  %v2022_v2 = vadd.f32 %v5784_v26, %v5764_v43 }
 0x1ba   : > { %v2143_v45 = vpop.f32.mrf.mxu0  ;;  %v2099_v35 = vadd.f32 %v5778_v39, %v2016_v3  ;;  %v2100_v24 = vadd.f32 %v5782_v42, %v2018_v57  ;;  %v1888_v39 = vadd.f32 %v1876_v52, %v5528_v33  ;;  %v1877_v42 = vadd.f32 %v5766_v29, %v5746_v63 }
 0x1bb   : > { %v2286_v51 = vadd.f32 %v2274_v25, %v5528_v33  ;;  %v2275_v27 = vadd.f32 %v2247_v7, %v2169_v46  ;;  %v2170_v4 = vadd.f32 %v2143_v45, %v2095_v0  ;;  %v2249_v41 = vpop.f32.mrf.mxu1 }
 0x1bc   : > { %v2145_v44 = vpop.f32.mrf.mxu0  ;;  %v1889_v57 = vadd.f32 %v1877_v42, %v5530_v59  ;;  %v6301_v42 = vld [vmem:[#allocation8_spill] sm:$0xff] }
 0x1bd   : > { %v2287_v21 = vadd.f32 %v2275_v27, %v5530_v59  ;;  %v2276_v31 = vadd.f32 %v2249_v41, %v2170_v4  ;;  %v2171_v32 = vadd.f32 %v2145_v44, %v2096_v9  ;;  %v2251_v16 = vpop.f32.mrf.mxu1  ;;  %v2298_v13 = vmax.f32 %v2286_v51, 0.0  ;;  %v6297_v51 = vld [vmem:[#allocation26_spill] sm:$0xff] }
 0x1be   : > { %v2149_v37 = vpop.f32.mrf.mxu0  ;;  %v2102_v27 = vadd.f32 %v6297_v51, %v2024_v34 }
 0x1bf   : > { %v2299_v50 = vmax.f32 %v2287_v21, 0.0  ;;  %v2288_v14 = vadd.f32 %v2276_v31, %v5528_v33  ;;  %v2277_v1 = vadd.f32 %v2251_v16, %v2171_v32  ;;  %v2255_v62 = vpop.f32.mrf.mxu1  ;;  %v2172_v28 = vadd.f32 %v2149_v37, %v2097_v23 }
 0x1c0   : > { %v2151_v58 = vpop.f32.mrf.mxu0  ;;  %v2310_v54 = vmax.f32 %v1892_v53, %v2298_v13  ;;  %v1898_v32 = vmax.f32 %v5836_v48, 0.0  ;;  %v1899_v16 = vmax.f32 %v5844_v8, 0.0  ;;  %v1900_v48 = vmax.f32 %v1888_v39, 0.0 }
 0x1c1   : > { %v2311_v17 = vmax.f32 %v1893_v18, %v2299_v50  ;;  %v2289_v36 = vadd.f32 %v2277_v1, %v5530_v59  ;;  %v2173_v38 = vadd.f32 %v2151_v58, %v2098_v60  ;;  %v2257_v11 = vpop.f32.mrf.mxu1  ;;  %v2300_v0 = vmax.f32 %v2288_v14, 0.0 }
 0x1c2   : > { %v2278_v25 = vadd.f32 %v2255_v62, %v2172_v28  ;;  %v2153_v46 = vpop.f32.mrf.mxu0  ;;  %v2101_v18 = vadd.f32 %v5786_v19, %v2022_v2 }
 0x1c3   : > { %v2301_v55 = vmax.f32 %v2289_v36, 0.0  ;;  %v2279_v26 = vadd.f32 %v2257_v11, %v2173_v38  ;;  %v2174_v43 = vadd.f32 %v2153_v46, %v2099_v35  ;;  %v2259_v7 = vpop.f32.mrf.mxu1  ;;  %v2322_v61 = vmax.f32 %v2310_v54, %v2311_v17 }
 0x1c4   : > { %v2290_v20 = vadd.f32 %v2278_v25, %v5528_v33  ;;  %v2155_v56 = vpop.f32.mrf.mxu0  ;;  %v2312_v4 = vmax.f32 %v1894_v12, %v2300_v0  ;;  %v6299_v0 = vld [vmem:[#allocation25_spill] sm:$0xff] }
 0x1c5   : > { %v2313_v45 = vmax.f32 %v1895_v10, %v2301_v55  ;;  %v2291_v40 = vadd.f32 %v2279_v26, %v5530_v59  ;;  %v2280_v15 = vadd.f32 %v2259_v7, %v2174_v43  ;;  %v2175_v53 = vadd.f32 %v2155_v56, %v2100_v24  ;;  %v2261_v9 = vpop.f32.mrf.mxu1 }
 0x1c6   : > { %v2302_v41 = vmax.f32 %v2290_v20, 0.0  ;;  %v2159_v5 = vpop.f32.mrf.mxu0  ;;  %v1896_v10 = vmax.f32 %v5828_v6, 0.0  ;;  %v1891_v25 = vadd.f32 %v6299_v0, %v5530_v59  ;;  %v6315_v0 = vld [vmem:[#allocation22_spill] sm:$0xff] }
 0x1c7   : > { %v2303_v44 = vmax.f32 %v2291_v40, 0.0  ;;  %v2292_v19 = vadd.f32 %v2280_v15, %v5528_v33  ;;  %v2281_v3 = vadd.f32 %v2261_v9, %v2175_v53  ;;  %v2176_v21 = vadd.f32 %v2159_v5, %v2101_v18  ;;  %v2265_v31 = vpop.f32.mrf.mxu1  ;;  %v6300_v9 = vld [vmem:[#allocation13_spill] sm:$0xff] }
 0x1c8   : > { %v2161_v23 = vpop.f32.mrf.mxu0  ;;  %v2323_v60 = vmax.f32 %v2312_v4, %v2313_v45  ;;  %v2314_v50 = vmax.f32 %v1896_v10, %v2302_v41  ;;  %v5891_v45 = vld [vmem:[%s6212_s3 + $0xb0] sm:$0xff]   ;;  %v1903_v40 = vmax.f32 %v1891_v25, 0.0  ;;  %v4739_v41 = vld [vmem:[%s6212_s3 + $0x78] sm:$0xff]   ;;  %v6303_v10 = vld [vmem:[#allocation16_spill] sm:$0xff] }
 0x1c9   : > { %v2315_v63 = vmax.f32 %v1897_v49, %v2303_v44  ;;  %v2304_v29 = vmax.f32 %v2292_v19, 0.0  ;;  %v2293_v12 = vadd.f32 %v2281_v3, %v5530_v59  ;;  %v2177_v13 = vadd.f32 %v2161_v23, %v2102_v27  ;;  %v2267_v37 = vpop.f32.mrf.mxu1  ;;  %v4697_v27 = vld [vmem:[%s6212_s3 + $0xa8] sm:$0xff]   ;;  %v4698_v44 = vld [vmem:[%s6212_s3 + $0xa0] sm:$0xff]   ;;  %v4740_v19 = vld [vmem:[%s6212_s3 + $0x70] sm:$0xff]  }
 0x1ca   : > { %v2282_v14 = vadd.f32 %v2265_v31, %v2176_v21  ;;  %v2163_v1 = vpop.f32.mrf.mxu0  ;;  %v5870_v6 = vpack.c.bf16 %v2323_v60, %v2322_v61  ;;  %v1890_v49 = vadd.f32 %v6298_v30, %v5528_v33  ;;  %v6302_v3 = vld [vmem:[#allocation15_spill] sm:$0xff]  ;;  %v4741_v31 = vld [vmem:[%s6212_s3 + $0x68] sm:$0xff]   ;;  %v6310_v30 = vld [vmem:[#allocation14_spill] sm:$0xff] }
 0x1cb   : > { %v2305_v62 = vmax.f32 %v2293_v12, 0.0  ;;  %v2178_v8 = vadd.f32 %v2163_v1, %v5803_v47  ;;  %v2283_v52 = vadd.f32 %v2267_v37, %v2177_v13  ;;  %v2269_v2 = vpop.f32.mrf.mxu1  ;;  %v2316_v28 = vmax.f32 %v1898_v32, %v2304_v29  ;;  %v4699_v21 = vld [vmem:[%s6212_s3 + $0x98] sm:$0xff]   ;;  %v4700_v32 = vld [vmem:[%s6212_s3 + $0x90] sm:$0xff]   ;;  %v4701_v23 = vld [vmem:[%s6212_s3 + $0x88] sm:$0xff]  }
 0x1cc   : > { %v2294_v58 = vadd.f32 %v2282_v14, %v5528_v33  ;;  %4309 = vmatprep.mubr.bf16.mxu0 %v5870_v6  ;;  %v2165_v35 = vpop.f32.mrf.mxu0  ;;  %v2324_v17 = vmax.f32 %v2314_v50, %v2315_v63  ;;  %v1901_v47 = vmax.f32 %v1889_v57, 0.0  ;;  %v1902_v39 = vmax.f32 %v1890_v49, 0.0  ;;  %v4702_v63 = vld [vmem:[%s6212_s3 + $0x80] sm:$0xff]   ;;  %v6306_v29 = vld [vmem:[#allocation19_spill] sm:$0xff]  ;;  %v4704_v37 = vld [vmem:[%s6212_s3 + $0x130] sm:$0xff]  }
 0x1cd   : > { %v2317_v36 = vmax.f32 %v1899_v16, %v2305_v62  ;;  %v2295_v38 = vadd.f32 %v2283_v52, %v5530_v59  ;;  %v2179_v11 = vadd.f32 %v2165_v35, %v5808_v22  ;;  %v2284_v34 = vadd.f32 %v2269_v2, %v2178_v8  ;;  %v2271_v54 = vpop.f32.mrf.mxu1  ;;  %v6304_v16 = vld [vmem:[#allocation17_spill] sm:$0xff]  ;;  %v4703_v12 = vld [vmem:[%s6212_s3 + $0x138] sm:$0xff]   ;;  %v6308_v57 = vld [vmem:[#allocation10_spill] sm:$0xff] }
 0x1ce   : > { %v2306_v46 = vmax.f32 %v2294_v58, 0.0  ;;  %v5881_v24 = vpack.c.bf16 %v2324_v17, %v2323_v60  ;;  %v6305_v60 = vld [vmem:[#allocation18_spill] sm:$0xff]  ;;  %v6307_v13 = vld [vmem:[#allocation7_spill] sm:$0xff]  ;;  %v4705_v14 = vld [vmem:[%s6212_s3 + $0x128] sm:$0xff]  }
 0x1cf   : > { %v2325_v55 = vmax.f32 %v2316_v28, %v2317_v36  ;;  %v2307_v26 = vmax.f32 %v2295_v38, 0.0  ;;  %v2296_v43 = vadd.f32 %v2284_v34, %v5528_v33  ;;  %v2285_v7 = vadd.f32 %v2271_v54, %v2179_v11  ;;  %v6309_v50 = vld [vmem:[#allocation6_spill] sm:$0xff]  ;;  %v4706_v1 = vld [vmem:[%s6212_s3 + $0x120] sm:$0xff]   ;;  %v4709_v8 = vld [vmem:[%s6212_s3 + $0x108] sm:$0xff]  }
 0x1d0   : > { %v2318_v18 = vmax.f32 %v1900_v48, %v2306_v46  ;;  %4369 = vmatprep.mubr.bf16.mxu1 %v5881_v24  ;;  %v4707_v48 = vld [vmem:[%s6212_s3 + $0x118] sm:$0xff]   ;;  %v4708_v62 = vld [vmem:[%s6212_s3 + $0x110] sm:$0xff]   ;;  %v4710_v52 = vld [vmem:[%s6212_s3 + $0x100] sm:$0xff]  }
 0x1d1   : > { %v2319_v20 = vmax.f32 %v1901_v47, %v2307_v26  ;;  %v2308_v22 = vmax.f32 %v2296_v43, 0.0  ;;  %v2297_v56 = vadd.f32 %v2285_v7, %v5530_v59  ;;  %v5886_v61 = vpack.c.bf16 %v2325_v55, %v2324_v17  ;;  %v4742_v2 = vld [vmem:[%s6212_s3 + $0x38] sm:$0xff]   ;;  %v4743_v49 = vld [vmem:[%s6212_s3 + $0x30] sm:$0xff]   ;;  %v4744_v28 = vld [vmem:[%s6212_s3 + $0x28] sm:$0xff]  }
 0x1d2   : > { %v4746_v58 = vld [vmem:[%s6212_s3 + $0x18] sm:$0xff]   ;;  %v4747_v35 = vld [vmem:[%s6212_s3 + $0x10] sm:$0xff]   ;;  %v4748_v17 = vld [vmem:[%s6212_s3 + $0x8] sm:$0xff]   ;;  %v4814_v26 = vmov 0.0  }
 0x1d3   : > { %v2326_v15 = vmax.f32 %v2318_v18, %v2319_v20  ;;  %v2320_v53 = vmax.f32 %v1902_v39, %v2308_v22  ;;  %v2309_v33 = vmax.f32 %v2297_v56, 0.0  ;;  %4310 = vmatmul.mubr.bf16.vlgmr.msra.gmra.mxu0 %v5886_v61  ;;  %v4749_v36 = vld [vmem:[%s6212_s3] sm:$0xff]   ;;  %v4750_v38 = vld [vmem:[%s6212_s3 + $0xf8] sm:$0xff]   ;;  %v6312_v34 = vld [vmem:[#allocation9_spill] sm:$0xff] }
 0x1d4   : > { %4334 = vmatpush3.bf16.msra.mxu0 %v6300_v9  ;;  %4349 = vmatprep.mubr.bf16.mxu0 %v6301_v42  ;;  %v6311_v11 = vld [vmem:[#allocation11_spill] sm:$0xff]  ;;  %v6313_v54 = vld [vmem:[#allocation20_spill] sm:$0xff]  ;;  %v6314_v47 = vld [vmem:[#allocation21_spill] sm:$0xff] }
 0x1d5   : > { %v5896_v51 = vpack.c.bf16 %v2326_v15, %v2325_v55  ;;  %v2321_v59 = vmax.f32 %v1903_v40, %v2309_v33  ;;  %4335 = vmatprep.subr.bf16.mxu0 %v5891_v45  ;;  %v6316_v25 = vld [vmem:[#allocation23_spill] sm:$0xff]  ;;  %v6317_v46 = vld [vmem:[#allocation24_spill] sm:$0xff]  ;;  %v4713_v55 = vld [vmem:[%s6214_s5 + $0x28] sm:$0xff]  }
 0x1d6   : > { %v4712_v43 = vld [vmem:[%s6214_s5 + $0x8] sm:$0xff]  }
 0x1d7   : > { %v2327_v4 = vmax.f32 %v2320_v53, %v2321_v59  ;;  %4370 = vmatmul.mubr.bf16.vlgmr.msra.gmra.mxu1 %v5896_v51 }
 0x1d8   : > { %4336 = vmatpush3.bf16.msra.mxu0 %v5891_v45  ;;  %4394 = vmatpush3.bf16.msra.mxu1 %v4739_v41 }
 0x1d9   : > { %v5907_v5 = vpack.c.bf16 %v2327_v4, %v2326_v15  ;;  %4409 = vmatprep.mubr.bf16.mxu1 %v6301_v42  ;;  %4337 = vmatprep.subr.bf16.mxu0 %v4697_v27 }
 0x1da   : > { %4395 = vmatprep.subr.bf16.mxu1 %v4740_v19 }
 0x1dc   : > { %4338 = vmatpush3.bf16.msra.mxu0 %v4697_v27  ;;  %4396 = vmatpush3.bf16.msra.mxu1 %v4740_v19 }
 0x1dd   : > { %4339 = vmatprep.subr.bf16.mxu0 %v4698_v44  ;;  %4397 = vmatprep.subr.bf16.mxu1 %v6302_v3 }
 0x1e0   : > { %4340 = vmatpush3.bf16.msra.mxu0 %v4698_v44  ;;  %4398 = vmatpush3.bf16.msra.mxu1 %v4741_v31 }
 0x1e1   : > { %4341 = vmatprep.subr.bf16.mxu0 %v4699_v21  ;;  %4399 = vmatprep.subr.bf16.mxu1 %v6303_v10 }
 0x1e4   : > { %4342 = vmatpush3.bf16.msra.mxu0 %v4699_v21  ;;  %4400 = vmatpush3.bf16.msra.mxu1 %v6303_v10 }
 0x1e5   : > { %4343 = vmatprep.subr.bf16.mxu0 %v4700_v32  ;;  %4401 = vmatprep.subr.bf16.mxu1 %v6304_v16 }
 0x1e8   : > { %4344 = vmatpush3.bf16.msra.mxu0 %v4700_v32  ;;  %4402 = vmatpush3.bf16.msra.mxu1 %v6304_v16 }
 0x1e9   : > { %4345 = vmatprep.subr.bf16.mxu0 %v4701_v23  ;;  %4403 = vmatprep.subr.bf16.mxu1 %v6305_v60 }
 0x1ec   : > { %4346 = vmatpush3.bf16.msra.mxu0 %v4701_v23  ;;  %4404 = vmatpush3.bf16.msra.mxu1 %v6305_v60 }
 0x1ed   : > { %4347 = vmatprep.subr.bf16.mxu0 %v4702_v63  ;;  %4405 = vmatprep.subr.bf16.mxu1 %v6306_v29 }
 0x1f0   : > { %4348 = vmatpush3.bf16.msra.mxu0 %v4702_v63  ;;  %4406 = vmatpush3.bf16.msra.mxu1 %v6306_v29 }
 0x1f1   : > { %4373 = vmatprep.subr.bf16.mxu0 %v4703_v12  ;;  %4407 = vmatprep.subr.bf16.mxu1 %v6307_v13 }
 0x1f3   : > { %4350 = vmatmul.mubr.bf16.vlgmr.msra.gmra.mxu0 %v6308_v57 }
 0x1f4   : > { %4374 = vmatpush3.bf16.msra.mxu0 %v4703_v12  ;;  %4389 = vmatprep.mubr.bf16.mxu0 %v6309_v50 }
 0x1f5   : > { %4408 = vmatpush3.bf16.msra.mxu1 %v6307_v13  ;;  %4375 = vmatprep.subr.bf16.mxu0 %v4704_v37 }
 0x1f6   : > { %4433 = vmatprep.subr.bf16.mxu1 %v6300_v9 }
 0x1f8   : > { %4410 = vmatmul.mubr.bf16.vlgmr.msra.gmra.mxu1 %v6308_v57  ;;  %4376 = vmatpush3.bf16.msra.mxu0 %v4704_v37 }
 0x1f9   : > { %4434 = vmatpush3.bf16.msra.mxu1 %v6300_v9  ;;  %4449 = vmatprep.mubr.bf16.mxu1 %v5881_v24  ;;  %v4711_v24 = vld [vmem:[%s6214_s5 + $0x10] sm:$0xff]  }
 0x1fa   : > { %4377 = vmatprep.subr.bf16.mxu0 %v4705_v14  ;;  %4435 = vmatprep.subr.bf16.mxu1 %v5891_v45 }
 0x1fc   : > { %4378 = vmatpush3.bf16.msra.mxu0 %v4705_v14 }
 0x1fd   : > { %4436 = vmatpush3.bf16.msra.mxu1 %v5891_v45  ;;  %4379 = vmatprep.subr.bf16.mxu0 %v4706_v1 }
 0x1fe   : > { %4437 = vmatprep.subr.bf16.mxu1 %v4697_v27 }
 0x200   : > { %4380 = vmatpush3.bf16.msra.mxu0 %v4706_v1 }
 0x201   : > { %4438 = vmatpush3.bf16.msra.mxu1 %v4697_v27  ;;  %4381 = vmatprep.subr.bf16.mxu0 %v4707_v48 }
 0x202   : > { %4439 = vmatprep.subr.bf16.mxu1 %v4698_v44 }
 0x204   : > { %4382 = vmatpush3.bf16.msra.mxu0 %v4707_v48 }
 0x205   : > { %4440 = vmatpush3.bf16.msra.mxu1 %v4698_v44  ;;  %4383 = vmatprep.subr.bf16.mxu0 %v4708_v62 }
 0x206   : > { %4441 = vmatprep.subr.bf16.mxu1 %v4699_v21 }
 0x208   : > { %4384 = vmatpush3.bf16.msra.mxu0 %v4708_v62 }
 0x209   : > { %4442 = vmatpush3.bf16.msra.mxu1 %v4699_v21  ;;  %4385 = vmatprep.subr.bf16.mxu0 %v4709_v8 }
 0x20a   : > { %4443 = vmatprep.subr.bf16.mxu1 %v4700_v32 }
 0x20c   : > { %4386 = vmatpush3.bf16.msra.mxu0 %v4709_v8 }
 0x20d   : > { %4444 = vmatpush3.bf16.msra.mxu1 %v4700_v32  ;;  %4387 = vmatprep.subr.bf16.mxu0 %v4710_v52 }
 0x20e   : > { %4445 = vmatprep.subr.bf16.mxu1 %v4701_v23 }
 0x210   : > { %4388 = vmatpush3.bf16.msra.mxu0 %v4710_v52 }
 0x211   : > { %4446 = vmatpush3.bf16.msra.mxu1 %v4701_v23  ;;  %4413 = vmatprep.subr.bf16.mxu0 %v4742_v2 }
 0x212   : > { %4447 = vmatprep.subr.bf16.mxu1 %v4702_v63 }
 0x213   : > { %4390 = vmatmul.mubr.bf16.vlgmr.msra.gmra.mxu0 %v6310_v30 }
 0x214   : > { %4414 = vmatpush3.bf16.msra.mxu0 %v4742_v2  ;;  %4429 = vmatprep.mubr.bf16.mxu0 %v5870_v6  ;;  %v4745_v6 = vld [vmem:[%s6212_s3 + $0x20] sm:$0xff]  }
 0x215   : > { %4448 = vmatpush3.bf16.msra.mxu1 %v4702_v63  ;;  %4415 = vmatprep.subr.bf16.mxu0 %v4743_v49 }
 0x216   : > { %4473 = vmatprep.subr.bf16.mxu1 %v4703_v12 }
 0x218   : > { %4450 = vmatmul.mubr.bf16.vlgmr.msra.gmra.mxu1 %v5896_v51  ;;  %4416 = vmatpush3.bf16.msra.mxu0 %v4743_v49 }
 0x219   : > { %4474 = vmatpush3.bf16.msra.mxu1 %v4703_v12  ;;  %4489 = vmatprep.mubr.bf16.mxu1 %v5886_v61 }
 0x21a   : > { %4417 = vmatprep.subr.bf16.mxu0 %v4744_v28  ;;  %4475 = vmatprep.subr.bf16.mxu1 %v4704_v37 }
 0x21b   : > { %v4331_v7 = vpop.f32.mrf.mxu1 }
 0x21c   : > { %4418 = vmatpush3.bf16.msra.mxu0 %v4744_v28  ;;  %v4101_v28 = vld [vmem:[%s6213_s4] ss:$0 sm:$0xff] }
 0x21d   : > { %4476 = vmatpush3.bf16.msra.mxu1 %v4704_v37  ;;  %4419 = vmatprep.subr.bf16.mxu0 %v4745_v6  ;;  %v2544_v39 = vpop.f32.mrf.mxu1 }
 0x21e   : > { %4477 = vmatprep.subr.bf16.mxu1 %v4705_v14 }
 0x21f   : > { %v4332_v20 = vpop.f32.mrf.mxu1 }
 0x220   : > { %4420 = vmatpush3.bf16.msra.mxu0 %v4745_v6 }
 0x221   : > { %4478 = vmatpush3.bf16.msra.mxu1 %v4705_v14  ;;  %4421 = vmatprep.subr.bf16.mxu0 %v4746_v58  ;;  %v2547_v56 = vpop.f32.mrf.mxu1 }
 0x222   : > { %4479 = vmatprep.subr.bf16.mxu1 %v4706_v1 }
 0x224   : > { %4422 = vmatpush3.bf16.msra.mxu0 %v4746_v58 }
 0x225   : > { %4480 = vmatpush3.bf16.msra.mxu1 %v4706_v1  ;;  %4423 = vmatprep.subr.bf16.mxu0 %v4747_v35 }
 0x226   : > { %4481 = vmatprep.subr.bf16.mxu1 %v4707_v48 }
 0x228   : > { %4424 = vmatpush3.bf16.msra.mxu0 %v4747_v35  ;;  %v4714_v35 = vld [vmem:[%s6214_s5] sm:$0xff]  }
 0x229   : > { %4482 = vmatpush3.bf16.msra.mxu1 %v4707_v48  ;;  %4425 = vmatprep.subr.bf16.mxu0 %v4748_v17 }
 0x22a   : > { %4483 = vmatprep.subr.bf16.mxu1 %v4708_v62 }
 0x22c   : > { %4426 = vmatpush3.bf16.msra.mxu0 %v4748_v17  ;;  %v4715_v17 = vld [vmem:[%s6214_s5 + $0x20] sm:$0xff]  }
 0x22d   : > { %4484 = vmatpush3.bf16.msra.mxu1 %v4708_v62  ;;  %4427 = vmatprep.subr.bf16.mxu0 %v4749_v36 }
 0x22e   : > { %4485 = vmatprep.subr.bf16.mxu1 %v4709_v8 }
 0x230   : > { %4428 = vmatpush3.bf16.msra.mxu0 %v4749_v36 }
 0x231   : > { %4486 = vmatpush3.bf16.msra.mxu1 %v4709_v8  ;;  %4453 = vmatprep.subr.bf16.mxu0 %v4750_v38 }
 0x232   : > { %4487 = vmatprep.subr.bf16.mxu1 %v4710_v52 }
 0x233   : > { %4430 = vmatmul.mubr.bf16.vlgmr.msra.gmra.mxu0 %v5886_v61 }
 0x234   : > { %4454 = vmatpush3.bf16.msra.mxu0 %v4750_v38  ;;  %4469 = vmatprep.mubr.bf16.mxu0 %v6309_v50 }
 0x235   : > { %4488 = vmatpush3.bf16.msra.mxu1 %v4710_v52  ;;  %4455 = vmatprep.subr.bf16.mxu0 %v6311_v11 }
 0x236   : > { %4503 = vmatprep.subr.bf16.mxu1 %v4814_v26 }
 0x238   : > { %4490 = vmatmul.mubr.bf16.vlgmr.msra.gmra.mxu1 %v5907_v5  ;;  %4456 = vmatpush3.bf16.msra.mxu0 %v6311_v11 }
 0x239   : > { %4457 = vmatprep.subr.bf16.mxu0 %v6312_v34  ;;  %4504 = vmatpush3.bf16.msra.mxu1 %v4713_v55 }
 0x23a   : > { %4505 = vmatprep.subr.bf16.mxu1 %v4814_v26  ;;  %4509 = vmatprep.mubr.msk.bf16.mxu1 %vm4815_vm2, %v4814_v26 }
 0x23c   : > { %4458 = vmatpush3.bf16.msra.mxu0 %v6312_v34 }
 0x23d   : > { %4459 = vmatprep.subr.bf16.mxu0 %v6313_v54  ;;  %4506 = vmatpush3.bf16.msra.mxu1 %v4715_v17 }
 0x23e   : > { %4507 = vmatprep.subr.bf16.mxu1 %v4814_v26 }
 0x240   : > { %4460 = vmatpush3.bf16.msra.mxu0 %v6313_v54 }
 0x241   : > { %4461 = vmatprep.subr.bf16.mxu0 %v6314_v47 }
 0x244   : > { %4462 = vmatpush3.bf16.msra.mxu0 %v6314_v47 }
 0x245   : > { %4463 = vmatprep.subr.bf16.mxu0 %v6315_v0 }
 0x248   : > { %4464 = vmatpush3.bf16.msra.mxu0 %v6315_v0 }
 0x249   : > { %4465 = vmatprep.subr.bf16.mxu0 %v6316_v25 }
 0x24c   : > { %4466 = vmatpush3.bf16.msra.mxu0 %v6316_v25 }
 0x24d   : > { %4467 = vmatprep.subr.bf16.mxu0 %v6317_v46 }
 0x250   : > { %4468 = vmatpush3.bf16.msra.mxu0 %v6317_v46 }
 0x251   : > { %4493 = vmatprep.subr.bf16.mxu0 %v4814_v26 }
 0x253   : > { %4470 = vmatmul.mubr.bf16.vlgmr.msra.gmra.mxu0 %v6310_v30 }
 0x254   : > { %4494 = vmatpush3.bf16.msra.mxu0 %v4711_v24  ;;  %4499 = vmatprep.mubr.msk.bf16.mxu0 %vm4815_vm2, %v4814_v26 }
 0x255   : > { %4495 = vmatprep.subr.bf16.mxu0 %v4814_v26 }
 0x258   : > { %4496 = vmatpush3.bf16.msra.mxu0 %v4712_v43 }
 0x259   : > { %4497 = vmatprep.subr.bf16.mxu0 %v4814_v26 }
 0x25c   : > { %4498 = vmatpush3.bf16.msra.mxu0 %v4714_v35 }
 0x25d   : > { %4513 = vmatprep.subr.bf16.mxu0 %v4814_v26 }
 0x293   : > { %v4311_v18 = vpop.f32.mrf.mxu0 }
 0x294   : > { %v2553_v16 = vadd.f32 %v4331_v7, %v4311_v18  ;;  %v4716_v18 = vld [vmem:[%s6214_s5 + $0x18] sm:$0xff]  }
 0x295   : > { %v2447_v22 = vpop.f32.mrf.mxu0  ;;  %4508 = vmatpush3.bf16.msra.mxu1 %v4716_v18 }
 0x296   : > { %v2545_v63 = vadd.f32 %v2544_v39, %v2447_v22  ;;  %4523 = vmatprep.subr.bf16.mxu1 %v4814_v26 }
 0x297   : > { %v4312_v61 = vpop.f32.mrf.mxu0  ;;  %v4371_v45 = vpop.f32.mrf.mxu1 }
 0x298   : > { %v2556_v12 = vadd.f32 %v4332_v20, %v4312_v61 }
 0x299   : > { %v2450_v40 = vpop.f32.mrf.mxu0  ;;  %v2780_v15 = vpop.f32.mrf.mxu1 }
 0x29a   : > { %v2548_v14 = vadd.f32 %v2547_v56, %v2450_v40 }
 0x29b   : > { %v4372_v33 = vpop.f32.mrf.mxu1 }
 0x29d   : > { %v2783_v42 = vpop.f32.mrf.mxu1 }
 0x2b3   : > { %v4351_v53 = vpop.f32.mrf.mxu0 }
 0x2b4   : > { %v2677_v29 = vadd.f32 %v4351_v53, %v2553_v16 }
 0x2b5   : > { %v2660_v9 = vpop.f32.mrf.mxu0 }
 0x2b6   : > { %v2675_v13 = vadd.f32 %v2660_v9, %v2545_v63  ;;  %v2797_v48 = vadd.f32 %v4371_v45, %v2677_v29 }
 0x2b7   : > { %v4352_v51 = vpop.f32.mrf.mxu0 }
 0x2b8   : > { %v4411_v59 = vpop.f32.mrf.mxu1  ;;  %v2678_v1 = vadd.f32 %v4352_v51, %v2556_v12  ;;  %v2795_v30 = vadd.f32 %v2780_v15, %v2675_v13 }
 0x2b9   : > { %v2663_v27 = vpop.f32.mrf.mxu0 }
 0x2ba   : > { %v2966_v4 = vpop.f32.mrf.mxu1  ;;  %v2676_v52 = vadd.f32 %v2663_v27, %v2548_v14  ;;  %v2798_v38 = vadd.f32 %v4372_v33, %v2678_v1 }
 0x2bc   : > { %v4412_v5 = vpop.f32.mrf.mxu1  ;;  %v2796_v24 = vadd.f32 %v2783_v42, %v2676_v52 }
 0x2be   : > { %v2969_v19 = vpop.f32.mrf.mxu1 }
 0x2d3   : > { %v4391_v41 = vpop.f32.mrf.mxu0 }
 0x2d4   : > { %v2916_v2 = vadd.f32 %v4391_v41, %v2797_v48 }
 0x2d5   : > { %v2899_v44 = vpop.f32.mrf.mxu0 }
 0x2d6   : > { %v2914_v36 = vadd.f32 %v2899_v44, %v2795_v30  ;;  %v2926_v25 = vadd.f32 %v4101_v28, %v2916_v2  ;;  %v4720_v2 = vld [vmem:[%s6214_s5 + $0x30] sm:$0xff]  }
 0x2d7   : > { %v4392_v3 = vpop.f32.mrf.mxu0  ;;  %v4721_v30 = vld [vmem:[%s6214_s5 + $0x50] sm:$0xff]  }
 0x2d8   : > { %v4451_v21 = vpop.f32.mrf.mxu1  ;;  %v2917_v46 = vadd.f32 %v4392_v3, %v2798_v38  ;;  %v2924_v20 = vadd.f32 %v4101_v28, %v2914_v36  ;;  %v2930_v33 = vmax.f32 %v2926_v25, 0.0  ;;  %v4724_v36 = vld [vmem:[%s6216_s7 + $0x30] sm:$0xff]   ;;  %v4730_v25 = vld [vmem:[%s6216_s7] sm:$0xff]  }
 0x2d9   : > { %v2902_v31 = vpop.f32.mrf.mxu0 }
 0x2da   : > { %v3064_v10 = vpop.f32.mrf.mxu1  ;;  %v2915_v22 = vadd.f32 %v2902_v31, %v2796_v24  ;;  %v2927_v9 = vadd.f32 %v4101_v28, %v2917_v46  ;;  %v2928_v41 = vmax.f32 %v2924_v20, 0.0  ;;  %v4731_v46 = vld [vmem:[%s6218_s9 + $0x38] sm:$0xff]   ;;  %v4732_v24 = vld [vmem:[%s6218_s9 + $0x30] sm:$0xff]  }
 0x2dc   : > { %v4452_v23 = vpop.f32.mrf.mxu1 }
 0x2de   : > { %v3067_v37 = vpop.f32.mrf.mxu1 }
 0x2f3   : > { %v4431_v32 = vpop.f32.mrf.mxu0 }
 0x2f4   : > { %v3024_v50 = vadd.f32 %v4431_v32, %v4411_v59 }
 0x2f5   : > { %v3015_v60 = vpop.f32.mrf.mxu0 }
 0x2f6   : > { %v3016_v8 = vadd.f32 %v3015_v60, %v2966_v4  ;;  %v3081_v58 = vadd.f32 %v4451_v21, %v3024_v50 }
 0x2f7   : > { %v4432_v57 = vpop.f32.mrf.mxu0 }
 0x2f8   : > { %v4491_v62 = vpop.f32.mrf.mxu1  ;;  %v3027_v6 = vadd.f32 %v4432_v57, %v4412_v5  ;;  %v3079_v0 = vadd.f32 %v3064_v10, %v3016_v8  ;;  %v2925_v5 = vadd.f32 %v4101_v28, %v2915_v22  ;;  %v2931_v10 = vmax.f32 %v2927_v9, 0.0  ;;  %v4717_v57 = vld [vmem:[%s6214_s5 + $0x40] sm:$0xff]   ;;  %v4719_v8 = vld [vmem:[%s6214_s5 + $0x58] sm:$0xff]  }
 0x2f9   : > { %v3018_v49 = vpop.f32.mrf.mxu0 }
 0x2fa   : > { %v3171_v11 = vpop.f32.mrf.mxu1  ;;  %v3019_v54 = vadd.f32 %v3018_v49, %v2969_v19  ;;  %v3082_v39 = vadd.f32 %v4452_v23, %v3027_v6  ;;  %v2929_v60 = vmax.f32 %v2925_v5, 0.0  ;;  %v4722_v6 = vld [vmem:[%s6214_s5 + $0x48] sm:$0xff]  }
 0x2fc   : > { %v4492_v56 = vpop.f32.mrf.mxu1  ;;  %v3080_v15 = vadd.f32 %v3067_v37, %v3019_v54  ;;  %v4727_v54 = vld [vmem:[%s6216_s7 + $0x18] sm:$0xff]  }
 0x2fe   : > { %v3174_v44 = vpop.f32.mrf.mxu1 }
 0x313   : > { %v4471_v34 = vpop.f32.mrf.mxu0 }
 0x314   : > { %v3134_v47 = vadd.f32 %v4471_v34, %v3081_v58  ;;  %v4723_v58 = vld [vmem:[%s6216_s7 + $0x38] sm:$0xff]   ;;  %v4726_v34 = vld [vmem:[%s6216_s7 + $0x20] sm:$0xff]  }
 0x315   : > { %v3117_v55 = vpop.f32.mrf.mxu0 }
 0x316   : > { %v3188_v43 = vadd.f32 %v4491_v62, %v3134_v47  ;;  %v3132_v7 = vadd.f32 %v3117_v55, %v3079_v0  ;;  %v4718_v62 = vld [vmem:[%s6214_s5 + $0x38] sm:$0xff]   ;;  %v4728_v47 = vld [vmem:[%s6216_s7 + $0x10] sm:$0xff]   ;;  %v4729_v0 = vld [vmem:[%s6216_s7 + $0x8] sm:$0xff]  }
 0x317   : > { %v4472_v61 = vpop.f32.mrf.mxu0  ;;  %v4733_v55 = vld [vmem:[%s6218_s9 + $0x28] sm:$0xff]  }
 0x318   : > { %v3186_v45 = vadd.f32 %v3171_v11, %v3132_v7  ;;  %v3135_v40 = vadd.f32 %v4472_v61, %v3082_v39  ;;  %v3192_v53 = vadd.f32 %v4101_v28, %v3188_v43  ;;  %v4725_v11 = vld [vmem:[%s6216_s7 + $0x28] sm:$0xff]   ;;  %v4734_v43 = vld [vmem:[%s6218_s9 + $0x20] sm:$0xff]   ;;  %v4735_v7 = vld [vmem:[%s6218_s9 + $0x18] sm:$0xff]  }
 0x319   : > { %v3120_v42 = vpop.f32.mrf.mxu0  ;;  %v4736_v39 = vld [vmem:[%s6218_s9 + $0x10] sm:$0xff]  }
 0x31a   : > { %v3189_v51 = vadd.f32 %v4492_v56, %v3135_v40  ;;  %v3133_v59 = vadd.f32 %v3120_v42, %v3080_v15  ;;  %v3196_v27 = vmax.f32 %v3192_v53, 0.0  ;;  %v3190_v4 = vadd.f32 %v4101_v28, %v3186_v45  ;;  %v4106_v40 = vld [vmem:[%s6215_s6] ss:$0 sm:$0xff] }
 0x31c   : > { %v3193_v19 = vadd.f32 %v4101_v28, %v3189_v51  ;;  %v3187_v3 = vadd.f32 %v3174_v44, %v3133_v59  ;;  %v3200_v21 = vmax.f32 %v2930_v33, %v3196_v27  ;;  %v3194_v31 = vmax.f32 %v3190_v4, 0.0 }
 0x31e   : > { %v3197_v32 = vmax.f32 %v3193_v19, 0.0  ;;  %v3191_v16 = vadd.f32 %v4101_v28, %v3187_v3  ;;  %3210 = vrot.lane.b32.xlu1 %v3200_v21, %s4816_s14  ;;  %v3198_v23 = vmax.f32 %v2928_v41, %v3194_v31 }
 0x320   : > { %v3195_v63 = vmax.f32 %v3191_v16, 0.0  ;;  %3206 = vrot.lane.b32.xlu0 %v3198_v23, %s4816_s14  ;;  %v3201_v29 = vmax.f32 %v2931_v10, %v3197_v32  ;;  %v4737_v10 = vld [vmem:[%s6218_s9 + $0x8] sm:$0xff]   ;;  %v4738_v32 = vld [vmem:[%s6218_s9] sm:$0xff]  }
 0x321   : > { %v4137_v16 = vld [vmem:[%s6217_s8] ss:$0 sm:$0xff] }
 0x322   : > { %3212 = vrot.lane.b32.xlu1 %v3201_v29, %s4816_s14  ;;  %v3199_v12 = vmax.f32 %v2929_v60, %v3195_v63 }
 0x324   : > { %3208 = vrot.lane.b32.xlu0 %v3199_v12, %s4816_s14  ;;  %s3750_s14 = sshll.u32 %s379_s13, 4  ;;  %s6170_s14 = int_to_ptr.vmem [resolvable:$true] %s3750_s14 }
 0x325   : > { %s4751_s29 = scalar_lea.vmem %s6170_s14, 128  ;;  %p4758_p0 = scmp.lt.s32.totalorder %s6170_s14, %s4756_s25 }
 0x326   : > { %p4752_p11 = scmp.ne.s32.totalorder %s6170_s14, %s4751_s29  ;;  %p4759_p1 = scmp.lt.s32.totalorder %s4757_s30, %s4751_s29 }
 0x328   : > { %p4753_p12 = pnand %p4752_p11, %p4916_p5  ;;  %p4760_p2 = por %p4759_p1, %p4758_p0 }
 0x32a   : > { %p4754_p13 = pneg %p4753_p12 }
 0x32c   : > { %p4761_p3 = pnand %p4760_p2, %p4754_p13 }
 0x390   : > { %v3211_v48 = vpop.permute.xlu1 %3210 }
 0x391   : > { %v3220_v49 = vmax.f32 %v3200_v21, %v3211_v48 }
 0x392   : > { %v3207_v13 = vpop.permute.xlu0 %3206 }
 0x393   : > { %v3218_v37 = vmax.f32 %v3198_v23, %v3207_v13  ;;  %v3369_v35 = vpack.c.bf16 %v3220_v49, %v3220_v49 }
 0x394   : > { %v3213_v28 = vpop.permute.xlu1 %3212 }
 0x395   : > { %v3223_v50 = vpack.c.bf16 %v3218_v37, %v3218_v37  ;;  %v3221_v17 = vmax.f32 %v3201_v29, %v3213_v28 }
 0x396   : > { %v3209_v14 = vpop.permute.xlu0 %3208 }
 0x397   : > { %v3219_v1 = vmax.f32 %v3199_v12, %v3209_v14  ;;  %4500 = vmatmul.mubr.msk.bf16.vlgmr.msra.gmra.mxu0 %vm3248_vm3, %v3223_v50  ;;  %v3439_v38 = vpack.c.bf16 %v3221_v17, %v3221_v17 }
 0x398   : > { %4514 = vmatpush3.bf16.msra.mxu0 %v4717_v57  ;;  %4519 = vmatprep.mubr.msk.bf16.mxu0 %vm4815_vm2, %v4814_v26 }
 0x399   : > { %v3299_v52 = vpack.c.bf16 %v3219_v1, %v3219_v1  ;;  %4515 = vmatprep.subr.bf16.mxu0 %v4814_v26 }
 0x39b   : > { %4510 = vmatmul.mubr.msk.bf16.vlgmr.msra.gmra.mxu1 %vm3248_vm3, %v3299_v52 }
 0x39c   : > { %4516 = vmatpush3.bf16.msra.mxu0 %v4718_v62  ;;  %4524 = vmatpush3.bf16.msra.mxu1 %v4719_v8 }
 0x39d   : > { %4517 = vmatprep.subr.bf16.mxu0 %v4814_v26  ;;  %4525 = vmatprep.subr.bf16.mxu1 %v4814_v26 }
 0x39e   : > { %4529 = vmatprep.mubr.msk.bf16.mxu1 %vm4815_vm2, %v4814_v26 }
 0x3a0   : > { %4518 = vmatpush3.bf16.msra.mxu0 %v4720_v2  ;;  %4526 = vmatpush3.bf16.msra.mxu1 %v4721_v30 }
 0x3a1   : > { %4527 = vmatprep.subr.bf16.mxu1 %v4814_v26  ;;  %4533 = vmatprep.subr.bf16.mxu0 %v4814_v26 }
 0x3a3   : > { %4520 = vmatmul.mubr.msk.bf16.vlgmr.msra.gmra.mxu0 %vm3248_vm3, %v3369_v35 }
 0x3a4   : > { %4528 = vmatpush3.bf16.msra.mxu1 %v4722_v6  ;;  %4534 = vmatpush3.bf16.msra.mxu0 %v4723_v58 }
 0x3a5   : > { %4535 = vmatprep.subr.bf16.mxu0 %v4814_v26  ;;  %4549 = vmatprep.mubr.msk.bf16.mxu0 %vm4815_vm2, %v4814_v26 }
 0x3a6   : > { %4553 = vmatprep.subr.bf16.mxu1 %v4814_v26 }
 0x3a7   : > { %4530 = vmatmul.mubr.msk.bf16.vlgmr.msra.gmra.mxu1 %vm3248_vm3, %v3439_v38 }
 0x3a8   : > { %4536 = vmatpush3.bf16.msra.mxu0 %v4724_v36  ;;  %4569 = vmatprep.mubr.msk.bf16.mxu1 %vm4815_vm2, %v4814_v26 }
 0x3a9   : > { %4537 = vmatprep.subr.bf16.mxu0 %v4814_v26  ;;  %4554 = vmatpush3.bf16.msra.mxu1 %v4731_v46 }
 0x3aa   : > { %4555 = vmatprep.subr.bf16.mxu1 %v4814_v26 }
 0x3ac   : > { %4538 = vmatpush3.bf16.msra.mxu0 %v4725_v11 }
 0x3ad   : > { %4539 = vmatprep.subr.bf16.mxu0 %v4814_v26  ;;  %4556 = vmatpush3.bf16.msra.mxu1 %v4732_v24 }
 0x3ae   : > { %4557 = vmatprep.subr.bf16.mxu1 %v4814_v26 }
 0x3b0   : > { %4540 = vmatpush3.bf16.msra.mxu0 %v4726_v34 }
 0x3b1   : > { %4541 = vmatprep.subr.bf16.mxu0 %v4814_v26  ;;  %4558 = vmatpush3.bf16.msra.mxu1 %v4733_v55 }
 0x3b2   : > { %4559 = vmatprep.subr.bf16.mxu1 %v4814_v26 }
 0x3b4   : > { %4542 = vmatpush3.bf16.msra.mxu0 %v4727_v54 }
 0x3b5   : > { %4543 = vmatprep.subr.bf16.mxu0 %v4814_v26  ;;  %4560 = vmatpush3.bf16.msra.mxu1 %v4734_v43 }
 0x3b6   : > { %4561 = vmatprep.subr.bf16.mxu1 %v4814_v26 }
 0x3b8   : > { %4544 = vmatpush3.bf16.msra.mxu0 %v4728_v47 }
 0x3b9   : > { %4545 = vmatprep.subr.bf16.mxu0 %v4814_v26  ;;  %4562 = vmatpush3.bf16.msra.mxu1 %v4735_v7 }
 0x3ba   : > { %4563 = vmatprep.subr.bf16.mxu1 %v4814_v26 }
 0x3bc   : > { %4546 = vmatpush3.bf16.msra.mxu0 %v4729_v0 }
 0x3bd   : > { %4547 = vmatprep.subr.bf16.mxu0 %v4814_v26  ;;  %4564 = vmatpush3.bf16.msra.mxu1 %v4736_v39 }
 0x3be   : > { %4565 = vmatprep.subr.bf16.mxu1 %v4814_v26 }
 0x3c0   : > { %4548 = vmatpush3.bf16.msra.mxu0 %v4730_v25 }
 0x3c1   : > { %4566 = vmatpush3.bf16.msra.mxu1 %v4737_v10 }
 0x3c2   : > { %4567 = vmatprep.subr.bf16.mxu1 %v4814_v26  ;;  %v4146_v26 = vld [vmem:[%s6219_s10] ss:$0 sm:$0xff] }
 0x3c5   : > { %4568 = vmatpush3.bf16.msra.mxu1 %v4738_v32 }
 0x457   : > { %v3286_v18 = vpop.f32.mrf.mxu0 }
 0x458   : > { %v3298_v33 = vadd.f32 %v4106_v40, %v3286_v18 }
 0x459   : > { %v4501_v20 = vpop.f32.mrf.mxu0 }
 0x45b   : > { %v3289_v22 = vpop.f32.mrf.mxu0  ;;  %v3362_v56 = vpop.f32.mrf.mxu1 }
 0x45c   : > { %v3368_v42 = vadd.f32 %v3362_v56, %v3298_v33 }
 0x45d   : > { %v4502_v61 = vpop.f32.mrf.mxu0  ;;  %v4511_v45 = vpop.f32.mrf.mxu1 }
 0x45f   : > { %v3365_v15 = vpop.f32.mrf.mxu1 }
 0x461   : > { %v4512_v53 = vpop.f32.mrf.mxu1 }
 0x463   : > { %v3432_v9 = vpop.f32.mrf.mxu0 }
 0x464   : > { %v3438_v59 = vadd.f32 %v3432_v9, %v3368_v42 }
 0x465   : > { %v4521_v51 = vpop.f32.mrf.mxu0 }
 0x467   : > { %v3435_v27 = vpop.f32.mrf.mxu0  ;;  %v3502_v4 = vpop.f32.mrf.mxu1 }
 0x468   : > { %v3508_v41 = vadd.f32 %v3502_v4, %v3438_v59 }
 0x469   : > { %v4522_v5 = vpop.f32.mrf.mxu0  ;;  %v4531_v44 = vpop.f32.mrf.mxu1 }
 0x46a   : > { %v3509_v19 = vmax.f32 %v3508_v41, 0.0 }
 0x46b   : > { %v3505_v3 = vpop.f32.mrf.mxu1 }
 0x46c   : > { %v3510_v21 = vpack.c.bf16 %v3509_v19, %v3509_v19 }
 0x46d   : > { %v4532_v31 = vpop.f32.mrf.mxu1 }
 0x46e   : > { %4550 = vmatmul.mubr.bf16.vlgmr.msra.gmra.mxu0 %v3510_v21 }
 0x52e   : > { %v3616_v23 = vpop.f32.mrf.mxu0 }
 0x52f   : > { %v3617_v60 = vadd.f32 %v4137_v16, %v3616_v23 }
 0x530   : > { %v4551_v63 = vpop.f32.mrf.mxu0 }
 0x531   : > { %v3622_v29 = vmax.f32 %v3617_v60, 0.0 }
 0x532   : > { %v3619_v12 = vpop.f32.mrf.mxu0 }
 0x533   : > { %v3623_v13 = vpack.c.bf16 %v3622_v29, %v3622_v29 }
 0x534   : > { %v4552_v37 = vpop.f32.mrf.mxu0 }
 0x535   : > { %4570 = vmatmul.mubr.bf16.vlgmr.msra.gmra.mxu1 %v3623_v13 }
 0x5f5   : > { %v3729_v57 = vpop.f32.mrf.mxu1 }
 0x5f6   : > { %v3730_v50 = vadd.f32 %v4146_v26, %v3729_v57 }
 0x5f7   : > { %v4571_v14 = vpop.f32.mrf.mxu1 }
 0x5f8   : > { %3735 = vst [vmem:[%s379_s13] sm:$0xff] %v3730_v50 }
 0x5f9   : > { %v3732_v1 = vpop.f32.mrf.mxu1 }
 0x5fa   : > { %4764 = shalt.err (!%p4761_p3)
}
 0x5fb   : > { %s4765_s12 = scalar_lea.hbm %s6168_s22, 128  ;;  %s4769_s15 = scalar_lea.hbm %s6220_s11, 256 }
 0x5fc   : > { %p4766_p4 = scmp.ne.s32.totalorder %s6168_s22, %s4765_s12  ;;  %p4770_p9 = scmp.lt.s32.totalorder %s6168_s22, %s6220_s11 }
 0x5fd   : > { %p4771_p10 = scmp.lt.s32.totalorder %s4769_s15, %s4765_s12 }
 0x5fe   : > { %p4767_p7 = pnand %p4766_p4, %p4916_p5 }
 0x5ff   : > { %p4772_p11 = por %p4771_p10, %p4770_p9 }
 0x600   : > { %p4768_p8 = pneg %p4767_p7 }
 0x602   : > { %p4773_p12 = pnand %p4772_p11, %p4768_p8 }
 0x604   : > { %4776 = shalt.err (!%p4773_p12)
}
 0x605   : > { %4574 = dma.vmem_to_hbm [thread:$0]  (%p4916_p5), %s6170_s14, 128, %s6168_s22, %s3737_s24   ;;  %v4572_v48 = vpop.f32.mrf.mxu1 }
 0x606 PF: > { %p4580_p13 = scmp.ge.s32.totalorder %s4811_s20, 2  ;;  %s3762_s29 = sand.u32 1, %s4799_s17  }
 0x607   : > { %s3763_s25 = scalar_lea.sflag [#allocation3], %s3762_s29 }
 0x608   : > { %p4577_p0 = pnand %p4580_p13, %p4920_p6 }
 0x60a   : > { %p4578_p1 = pneg %p4577_p0 }
 0x60c   : > { %4794 = dma.done.wait (%p4578_p1), %s3763_s25, 128  }
 0x60d   : > { %4796 = vsyncadd (%p4578_p1), %s3763_s25, 4294967168  ;;  %s6318_s27 = sld [smem:[#allocation5_spill]]  ;;  %p21_p2 = scmp.ge.s32.totalorder %s4903_s23, 4  }
 0x60e   : > { %s6319_s17 = smov %s4803_s18  ;;  %s6320_s18 = smov %s4807_s19 }
 0x60f   : > { %s6322_s20 = smov %s4903_s23  ;;  %23 = sbr.rel (!%p21_p2) target bundleno = 3 (0x3), region = 117 }
 0x613   : > { %s6321_s19 = smov %s6318_s27 }
 0x614   :  { %3768 = vsyncpa [#allocation3], 1 }
 0x615   :  { %3770 = vsyncpa [#allocation3 + $0x1], 1 }

</bundles_post_ra>
